<compile_context>
chip_gen: v6e
topology: v6e:2x2x1
jax: 0.10.0
libtpu: 0.0.40
codegen_flags: <defaults>
</compile_context>

<pallas_src>
import jax
import jax.numpy as jnp
from jax import lax
from jax.experimental import pallas as pl
from jax.experimental.pallas import tpu as pltpu


def _round_up(x, m):
    return (x + m - 1) // m * m


# Single-buffer constant operands (weights/bias) when pipeline_mode is
# supported; flipped off (and retried) by the harness if this Pallas build
# rejects it.
_SINGLE_BUFFER_CONST = [True]


def _const_spec(shape):
    """BlockSpec for an operand whose block never changes across the grid."""
    index_map = lambda *_: (0,) * len(shape)
    if _SINGLE_BUFFER_CONST[0]:
        try:
            return pl.BlockSpec(shape, index_map, pipeline_mode=pl.Buffered(1))
        except Exception:           # older Pallas: no pipeline_mode kwarg
            pass
    return pl.BlockSpec(shape, index_map)


# ----------------------------------------------------------------------------
# 1x1 convolution (pointwise), NCHW-native:  out[:, :, hw] = W @ x[:, :, hw]+b
# ----------------------------------------------------------------------------
def _pointwise_kernel(x_ref, w_ref, b_ref, o_ref):
    # x: (1, C_in, t_hw) f32  -> cast to bf16 in VMEM (no HBM bf16 copy)
    # w: (C_out_p, C_in) bf16;  b: (C_out_p, 1) f32
    x = x_ref[0].astype(jnp.bfloat16)
    y = jnp.dot(w_ref[...], x, preferred_element_type=jnp.float32)
    o_ref[0] = y + b_ref[...]


def conv1x1(x_nchw, weight, bias):
    """1x1 conv, stride 1.  weight: (C_out, C_in, 1, 1), bias: (C_out,)."""
    n, c_in, h, w = x_nchw.shape
    c_out = weight.shape[0]
    c_out_p = _round_up(c_out, 128)
    hw = h * w

    # Lane tile over H*W: up to 2048, capped so the f32 activation block stays
    # ~<= 4 MiB (double-buffered in+out stays well under v7x scoped VMEM).
    cap = min(2048, max(128, ((4 << 20) // (4 * c_in)) // 128 * 128))
    if hw <= cap:
        t_hw, grid_hw = hw, 1                    # single full-width block
    else:
        t_hw, grid_hw = cap, -(-hw // cap)       # ragged last block: writes masked

    x = x_nchw.reshape(n, c_in, hw)                              # free view
    w2 = weight.reshape(c_out, c_in)
    w2 = jnp.pad(w2, ((0, c_out_p - c_out), (0, 0))).astype(jnp.bfloat16)
    b2 = jnp.pad(bias, (0, c_out_p - c_out)).astype(jnp.float32)
    b2 = b2.reshape(c_out_p, 1)

    out = pl.pallas_call(
        _pointwise_kernel,
        out_shape=jax.ShapeDtypeStruct((n, c_out_p, hw), jnp.float32),
        grid_spec=pltpu.PrefetchScalarGridSpec(
            num_scalar_prefetch=0,
            grid=(n, grid_hw),
            in_specs=[
                pl.BlockSpec((1, c_in, t_hw), lambda b, j: (b, 0, j)),
                _const_spec((c_out_p, c_in)),
                _const_spec((c_out_p, 1)),
            ],
            out_specs=pl.BlockSpec((1, c_out_p, t_hw), lambda b, j: (b, 0, j)),
        ),
        compiler_params=pltpu.CompilerParams(
            dimension_semantics=("parallel", "parallel")),
    )(x, w2, b2)

    return out[:, :c_out, :].reshape(n, c_out, h, w)


# ----------------------------------------------------------------------------
# 3x3 stride-2 pad-1 convolution: tap-level big-M matmuls over a flat
# stride-2 phase slab, grid over (batch, output-row tiles).
# ----------------------------------------------------------------------------
def _make_conv3x3s2_kernel(tr, wq, w_out, c_out_p):
    def kernel(slab_ref, w_ref, b_ref, o_ref):
        # slab_ref: (1, 1, 4, (tr+1)*wq, C_in) bf16 -- phase p = 2*rh + cw
        #           holds xpad[2*i + rh, 2*j + cw] flattened as (i*wq + j).
        # w_ref:    (9, C_in, C_out_p) bf16;  b_ref: (1, C_out_p) f32
        acc = [None, None]                           # per kw//2 column offset
        for kh in range(3):
            for kw in range(3):
                p = (kh % 2) * 2 + (kw % 2)          # phase of this tap
                dr, dc = kh // 2, kw // 2            # row / col offset in phase
                x = slab_ref[0, 0, p, pl.ds(dr * wq, tr * wq), :]
                y = jnp.dot(x, w_ref[kh * 3 + kw],
                            preferred_element_type=jnp.float32)
                acc[dc] = y if acc[dc] is None else acc[dc] + y
        # Resolve the kw//2 == 1 column offset with one shifted add, then a
        # single whole-tile, lane-dense store.
        yl = acc[0].reshape(tr, wq, c_out_p)[:, :w_out, :]
        yr = acc[1].reshape(tr, wq, c_out_p)[:, 1:w_out + 1, :]
        o_ref[0, 0] = (yl + yr + b_ref[...]).astype(o_ref.dtype)

    return kernel


def conv3x3_s2(x_nchw, weight, bias, *, relu_input=False, row_tile=8):
    """3x3 / stride 2 / pad 1 conv.  weight: (C_out, C_in, 3, 3)."""
    n, c_in, h, w = x_nchw.shape
    c_out = weight.shape[0]
    h_out = (h - 1) // 2 + 1
    w_out = (w - 1) // 2 + 1
    c_out_p = _round_up(c_out, 128)
    wq = _round_up(w_out + 1, 8)              # phase width (sublane aligned)
    tr = min(row_tile, h_out)                 # output rows per grid step
    num_t = -(-h_out // tr)
    h_pad = num_t * tr

    # One producer fusion: (ReLU) + zero-pad + stride-2 phase split + halo
    # row-tiling + bf16 cast.  Phase p = 2*rh + cw holds xpad[2i+rh, 2j+cw].
    x = jnp.maximum(x_nchw, 0.0) if relu_input else x_nchw
    x_nhwc = jnp.transpose(x, (0, 2, 3, 1))
    xp = jnp.pad(x_nhwc,
                 ((0, 0), (1, 2 * h_pad + 1 - h), (1, 2 * wq - 1 - w), (0, 0)))
    ph = jnp.stack([xp[:, rh::2, cw::2, :]
                    for rh in range(2) for cw in range(2)],
                   axis=1)                                 # (N,4,h_pad+1,wq,C)
    if num_t == 1:
        tiles = ph[:, None]
    else:                                    # one-row halo per output-row tile
        tiles = jnp.stack([ph[:, :, t * tr:t * tr + tr + 1]
                           for t in range(num_t)], axis=1)
    slab = tiles.reshape(n, num_t, 4, (tr + 1) * wq, c_in).astype(jnp.bfloat16)

    w2 = jnp.transpose(weight, (2, 3, 1, 0)).reshape(9, c_in, c_out)
    w2 = jnp.pad(w2, ((0, 0), (0, 0), (0, c_out_p - c_out))).astype(jnp.bfloat16)
    b2 = jnp.pad(bias, (0, c_out_p - c_out)).astype(jnp.float32)
    b2 = b2.reshape(1, c_out_p)

    out = pl.pallas_call(
        _make_conv3x3s2_kernel(tr, wq, w_out, c_out_p),
        out_shape=jax.ShapeDtypeStruct((n, num_t, tr, w_out, c_out_p),
                                       jnp.float32),
        grid_spec=pltpu.PrefetchScalarGridSpec(
            num_scalar_prefetch=0,
            grid=(n, num_t),
            in_specs=[
                pl.BlockSpec((1, 1, 4, (tr + 1) * wq, c_in),
                             lambda b, t: (b, t, 0, 0, 0)),
                _const_spec((9, c_in, c_out_p)),
                _const_spec((1, c_out_p)),
            ],
            out_specs=pl.BlockSpec((1, 1, tr, w_out, c_out_p),
                                   lambda b, t: (b, t, 0, 0, 0)),
        ),
        compiler_params=pltpu.CompilerParams(
            dimension_semantics=("parallel", "parallel")),
    )(slab, w2, b2)

    out = out.reshape(n, h_pad, w_out, c_out_p)[:, :h_out, :, :c_out]
    return jnp.transpose(out, (0, 3, 1, 2))


# ----------------------------------------------------------------------------
# FPNExtractor forward
# ----------------------------------------------------------------------------
def fpn_forward(c3, c4, c5, params):
    f3 = conv1x1(c3, params["c3_w"], params["c3_b"])
    f4 = conv1x1(c4, params["c4_w"], params["c4_b"])
    f5 = conv1x1(c5, params["c5_w"], params["c5_b"])
    f6 = conv3x3_s2(c5, params["c6_w"], params["c6_b"], relu_input=False)
    f7 = conv3x3_s2(f6, params["c7_w"], params["c7_b"], relu_input=True)
    return f3, f4, f5, f6, f7


# ----------------------------------------------------------------------------
# Pure-JAX reference (same bf16-input / f32-accumulation precision policy)
# ----------------------------------------------------------------------------
def _ref_conv(x, w, b, stride, pad):
    y = lax.conv_general_dilated(
        x.astype(jnp.bfloat16), w.astype(jnp.bfloat16),
        window_strides=(stride, stride),
        padding=[(pad, pad), (pad, pad)],
        dimension_numbers=("NCHW", "OIHW", "NCHW"),
        preferred_element_type=jnp.float32)
    return y + b[None, :, None, None]


def _reference_fpn(c3, c4, c5, p):
    f3 = _ref_conv(c3, p["c3_w"], p["c3_b"], 1, 0)
    f4 = _ref_conv(c4, p["c4_w"], p["c4_b"], 1, 0)
    f5 = _ref_conv(c5, p["c5_w"], p["c5_b"], 1, 0)
    f6 = _ref_conv(c5, p["c6_w"], p["c6_b"], 2, 1)
    f7 = _ref_conv(jnp.maximum(f6, 0.0), p["c7_w"], p["c7_b"], 2, 1)
    return f3, f4, f5, f6, f7


if __name__ == "__main__":
    N = 2
    C3, C4, C5 = 4, 8, 16          # pyramid input channels
    H3 = W3 = 16
    H4 = W4 = 8
    H5 = W5 = 4
    INNER = 128                    # lane-dense inner_channel

    key = jax.random.PRNGKey(0)
    keys = jax.random.split(key, 13)

    def winit(k, shape, scale=0.05):
        return scale * jax.random.normal(k, shape, jnp.float32)

    params = {
        "c3_w": winit(keys[0], (INNER, C3, 1, 1)),
        "c3_b": winit(keys[1], (INNER,)),
        "c4_w": winit(keys[2], (INNER, C4, 1, 1)),
        "c4_b": winit(keys[3], (INNER,)),
        "c5_w": winit(keys[4], (INNER, C5, 1, 1)),
        "c5_b": winit(keys[5], (INNER,)),
        "c6_w": winit(keys[6], (INNER, C5, 3, 3)),
        "c6_b": winit(keys[7], (INNER,)),
        "c7_w": winit(keys[8], (INNER, INNER, 3, 3)),
        "c7_b": winit(keys[9], (INNER,)),
    }
    c3 = jax.random.normal(keys[10], (N, C3, H3, W3), jnp.float32)
    c4 = jax.random.normal(keys[11], (N, C4, H4, W4), jnp.float32)
    c5 = jax.random.normal(keys[12], (N, C5, H5, W5), jnp.float32)

    fwd = jax.jit(fpn_forward)
    try:
        outs = jax.block_until_ready(fwd(c3, c4, c5, params))
    except Exception:
        # This Pallas build rejected single-buffered constant operands
        # (pipeline_mode=pl.Buffered(1)); retry with default double buffering.
        _SINGLE_BUFFER_CONST[0] = False
        jax.clear_caches()
        fwd = jax.jit(fpn_forward)
        outs = jax.block_until_ready(fwd(c3, c4, c5, params))

    refs = jax.block_until_ready(_reference_fpn(c3, c4, c5, params))

    expected = [(N, INNER, H3, W3), (N, INNER, H4, W4), (N, INNER, H5, W5),
                (N, INNER, H5 // 2, W5 // 2), (N, INNER, H5 // 4, W5 // 4)]
    for name, o, r, es in zip(["f3", "f4", "f5", "f6", "f7"],
                              outs, refs, expected):
        assert o.shape == es, (name, o.shape, es)
        err = float(jnp.max(jnp.abs(o - r)))
        assert jnp.allclose(o, r, atol=5e-3, rtol=5e-3), (name, err)

    print("KERNEL_OK")
</pallas_src>

<mosaic_0001>
module attributes {stable_mosaic.version = 11 : i64} {
  func.func @kernel(%arg0: i32, %arg1: i32, %arg2: memref<1x1x4x24x16xbf16, #tpu.memory_space<vmem>>, %arg3: memref<9x16x128xbf16, #tpu.memory_space<vmem>>, %arg4: memref<1x128xf32, #tpu.memory_space<vmem>>, %arg5: memref<1x1x2x2x128xf32, #tpu.memory_space<vmem>>) attributes {dimension_semantics = [#tpu.dimension_semantics<parallel>, #tpu.dimension_semantics<parallel>], iteration_bounds = array<i64: 2, 1>, scalar_prefetch = 0 : i64, scratch_operands = 0 : i64, tpu.core_type = #tpu.core_type<tc>, window_params = [{transform_indices = @transform_0, window_bounds = array<i64: 1, 1, 4, 24, 16>}, {pipeline_mode = #tpu.pipeline_mode<synchronous>, transform_indices = @transform_1, window_bounds = array<i64: 9, 16, 128>}, {pipeline_mode = #tpu.pipeline_mode<synchronous>, transform_indices = @transform_2, window_bounds = array<i64: 1, 128>}, {transform_indices = @transform_3, window_bounds = array<i64: 1, 1, 2, 2, 128>}]} {
    %c0 = arith.constant 0 : index
    %c0_0 = arith.constant 0 : index
    %c0_1 = arith.constant 0 : index
    %c0_2 = arith.constant 0 : index
    %c0_3 = arith.constant 0 : index
    %0 = vector.load %arg2[%c0, %c0_0, %c0_1, %c0_2, %c0_3] : memref<1x1x4x24x16xbf16, #tpu.memory_space<vmem>>, vector<1x1x1x16x16xbf16>
    %1 = vector.shape_cast %0 : vector<1x1x1x16x16xbf16> to vector<16x16xbf16>
    %c0_4 = arith.constant 0 : index
    %c0_5 = arith.constant 0 : index
    %c0_6 = arith.constant 0 : index
    %2 = vector.load %arg3[%c0_4, %c0_5, %c0_6] : memref<9x16x128xbf16, #tpu.memory_space<vmem>>, vector<1x16x128xbf16>
    %3 = vector.shape_cast %2 : vector<1x16x128xbf16> to vector<16x128xbf16>
    %cst = arith.constant dense<0.000000e+00> : vector<16x128xf32>
    %4 = tpu.matmul %1, %3, %cst {dimension_numbers = #tpu.dot_dimension_numbers<[1], [0], [0], [1], [0, 0, 1, 1], [], []>} : vector<16x16xbf16>, vector<16x128xbf16>, vector<16x128xf32> -> vector<16x128xf32>
    %c0_7 = arith.constant 0 : index
    %c0_8 = arith.constant 0 : index
    %c1 = arith.constant 1 : index
    %c0_9 = arith.constant 0 : index
    %c0_10 = arith.constant 0 : index
    %5 = vector.load %arg2[%c0_7, %c0_8, %c1, %c0_9, %c0_10] : memref<1x1x4x24x16xbf16, #tpu.memory_space<vmem>>, vector<1x1x1x16x16xbf16>
    %6 = vector.shape_cast %5 : vector<1x1x1x16x16xbf16> to vector<16x16xbf16>
    %c1_11 = arith.constant 1 : index
    %c0_12 = arith.constant 0 : index
    %c0_13 = arith.constant 0 : index
    %7 = vector.load %arg3[%c1_11, %c0_12, %c0_13] : memref<9x16x128xbf16, #tpu.memory_space<vmem>>, vector<1x16x128xbf16>
    %8 = vector.shape_cast %7 : vector<1x16x128xbf16> to vector<16x128xbf16>
    %cst_14 = arith.constant dense<0.000000e+00> : vector<16x128xf32>
    %9 = tpu.matmul %6, %8, %cst_14 {dimension_numbers = #tpu.dot_dimension_numbers<[1], [0], [0], [1], [0, 0, 1, 1], [], []>} : vector<16x16xbf16>, vector<16x128xbf16>, vector<16x128xf32> -> vector<16x128xf32>
    %10 = arith.addf %4, %9 : vector<16x128xf32>
    %c0_15 = arith.constant 0 : index
    %c0_16 = arith.constant 0 : index
    %c0_17 = arith.constant 0 : index
    %c0_18 = arith.constant 0 : index
    %c0_19 = arith.constant 0 : index
    %11 = vector.load %arg2[%c0_15, %c0_16, %c0_17, %c0_18, %c0_19] : memref<1x1x4x24x16xbf16, #tpu.memory_space<vmem>>, vector<1x1x1x16x16xbf16>
    %12 = vector.shape_cast %11 : vector<1x1x1x16x16xbf16> to vector<16x16xbf16>
    %c2 = arith.constant 2 : index
    %c0_20 = arith.constant 0 : index
    %c0_21 = arith.constant 0 : index
    %13 = vector.load %arg3[%c2, %c0_20, %c0_21] : memref<9x16x128xbf16, #tpu.memory_space<vmem>>, vector<1x16x128xbf16>
    %14 = vector.shape_cast %13 : vector<1x16x128xbf16> to vector<16x128xbf16>
    %cst_22 = arith.constant dense<0.000000e+00> : vector<16x128xf32>
    %15 = tpu.matmul %12, %14, %cst_22 {dimension_numbers = #tpu.dot_dimension_numbers<[1], [0], [0], [1], [0, 0, 1, 1], [], []>} : vector<16x16xbf16>, vector<16x128xbf16>, vector<16x128xf32> -> vector<16x128xf32>
    %c0_23 = arith.constant 0 : index
    %c0_24 = arith.constant 0 : index
    %c2_25 = arith.constant 2 : index
    %c0_26 = arith.constant 0 : index
    %c0_27 = arith.constant 0 : index
    %16 = vector.load %arg2[%c0_23, %c0_24, %c2_25, %c0_26, %c0_27] : memref<1x1x4x24x16xbf16, #tpu.memory_space<vmem>>, vector<1x1x1x16x16xbf16>
    %17 = vector.shape_cast %16 : vector<1x1x1x16x16xbf16> to vector<16x16xbf16>
    %c3 = arith.constant 3 : index
    %c0_28 = arith.constant 0 : index
    %c0_29 = arith.constant 0 : index
    %18 = vector.load %arg3[%c3, %c0_28, %c0_29] : memref<9x16x128xbf16, #tpu.memory_space<vmem>>, vector<1x16x128xbf16>
    %19 = vector.shape_cast %18 : vector<1x16x128xbf16> to vector<16x128xbf16>
    %cst_30 = arith.constant dense<0.000000e+00> : vector<16x128xf32>
    %20 = tpu.matmul %17, %19, %cst_30 {dimension_numbers = #tpu.dot_dimension_numbers<[1], [0], [0], [1], [0, 0, 1, 1], [], []>} : vector<16x16xbf16>, vector<16x128xbf16>, vector<16x128xf32> -> vector<16x128xf32>
    %21 = arith.addf %10, %20 : vector<16x128xf32>
    %c0_31 = arith.constant 0 : index
    %c0_32 = arith.constant 0 : index
    %c3_33 = arith.constant 3 : index
    %c0_34 = arith.constant 0 : index
    %c0_35 = arith.constant 0 : index
    %22 = vector.load %arg2[%c0_31, %c0_32, %c3_33, %c0_34, %c0_35] : memref<1x1x4x24x16xbf16, #tpu.memory_space<vmem>>, vector<1x1x1x16x16xbf16>
    %23 = vector.shape_cast %22 : vector<1x1x1x16x16xbf16> to vector<16x16xbf16>
    %c4 = arith.constant 4 : index
    %c0_36 = arith.constant 0 : index
    %c0_37 = arith.constant 0 : index
    %24 = vector.load %arg3[%c4, %c0_36, %c0_37] : memref<9x16x128xbf16, #tpu.memory_space<vmem>>, vector<1x16x128xbf16>
    %25 = vector.shape_cast %24 : vector<1x16x128xbf16> to vector<16x128xbf16>
    %cst_38 = arith.constant dense<0.000000e+00> : vector<16x128xf32>
    %26 = tpu.matmul %23, %25, %cst_38 {dimension_numbers = #tpu.dot_dimension_numbers<[1], [0], [0], [1], [0, 0, 1, 1], [], []>} : vector<16x16xbf16>, vector<16x128xbf16>, vector<16x128xf32> -> vector<16x128xf32>
    %27 = arith.addf %21, %26 : vector<16x128xf32>
    %c0_39 = arith.constant 0 : index
    %c0_40 = arith.constant 0 : index
    %c2_41 = arith.constant 2 : index
    %c0_42 = arith.constant 0 : index
    %c0_43 = arith.constant 0 : index
    %28 = vector.load %arg2[%c0_39, %c0_40, %c2_41, %c0_42, %c0_43] : memref<1x1x4x24x16xbf16, #tpu.memory_space<vmem>>, vector<1x1x1x16x16xbf16>
    %29 = vector.shape_cast %28 : vector<1x1x1x16x16xbf16> to vector<16x16xbf16>
    %c5 = arith.constant 5 : index
    %c0_44 = arith.constant 0 : index
    %c0_45 = arith.constant 0 : index
    %30 = vector.load %arg3[%c5, %c0_44, %c0_45] : memref<9x16x128xbf16, #tpu.memory_space<vmem>>, vector<1x16x128xbf16>
    %31 = vector.shape_cast %30 : vector<1x16x128xbf16> to vector<16x128xbf16>
    %cst_46 = arith.constant dense<0.000000e+00> : vector<16x128xf32>
    %32 = tpu.matmul %29, %31, %cst_46 {dimension_numbers = #tpu.dot_dimension_numbers<[1], [0], [0], [1], [0, 0, 1, 1], [], []>} : vector<16x16xbf16>, vector<16x128xbf16>, vector<16x128xf32> -> vector<16x128xf32>
    %33 = arith.addf %15, %32 : vector<16x128xf32>
    %c0_47 = arith.constant 0 : index
    %c0_48 = arith.constant 0 : index
    %c0_49 = arith.constant 0 : index
    %c8 = arith.constant 8 : index
    %c0_50 = arith.constant 0 : index
    %34 = vector.load %arg2[%c0_47, %c0_48, %c0_49, %c8, %c0_50] : memref<1x1x4x24x16xbf16, #tpu.memory_space<vmem>>, vector<1x1x1x16x16xbf16>
    %35 = vector.shape_cast %34 : vector<1x1x1x16x16xbf16> to vector<16x16xbf16>
    %c6 = arith.constant 6 : index
    %c0_51 = arith.constant 0 : index
    %c0_52 = arith.constant 0 : index
    %36 = vector.load %arg3[%c6, %c0_51, %c0_52] : memref<9x16x128xbf16, #tpu.memory_space<vmem>>, vector<1x16x128xbf16>
    %37 = vector.shape_cast %36 : vector<1x16x128xbf16> to vector<16x128xbf16>
    %cst_53 = arith.constant dense<0.000000e+00> : vector<16x128xf32>
    %38 = tpu.matmul %35, %37, %cst_53 {dimension_numbers = #tpu.dot_dimension_numbers<[1], [0], [0], [1], [0, 0, 1, 1], [], []>} : vector<16x16xbf16>, vector<16x128xbf16>, vector<16x128xf32> -> vector<16x128xf32>
    %39 = arith.addf %27, %38 : vector<16x128xf32>
    %c0_54 = arith.constant 0 : index
    %c0_55 = arith.constant 0 : index
    %c1_56 = arith.constant 1 : index
    %c8_57 = arith.constant 8 : index
    %c0_58 = arith.constant 0 : index
    %40 = vector.load %arg2[%c0_54, %c0_55, %c1_56, %c8_57, %c0_58] : memref<1x1x4x24x16xbf16, #tpu.memory_space<vmem>>, vector<1x1x1x16x16xbf16>
    %41 = vector.shape_cast %40 : vector<1x1x1x16x16xbf16> to vector<16x16xbf16>
    %c7 = arith.constant 7 : index
    %c0_59 = arith.constant 0 : index
    %c0_60 = arith.constant 0 : index
    %42 = vector.load %arg3[%c7, %c0_59, %c0_60] : memref<9x16x128xbf16, #tpu.memory_space<vmem>>, vector<1x16x128xbf16>
    %43 = vector.shape_cast %42 : vector<1x16x128xbf16> to vector<16x128xbf16>
    %cst_61 = arith.constant dense<0.000000e+00> : vector<16x128xf32>
    %44 = tpu.matmul %41, %43, %cst_61 {dimension_numbers = #tpu.dot_dimension_numbers<[1], [0], [0], [1], [0, 0, 1, 1], [], []>} : vector<16x16xbf16>, vector<16x128xbf16>, vector<16x128xf32> -> vector<16x128xf32>
    %45 = arith.addf %39, %44 : vector<16x128xf32>
    %c0_62 = arith.constant 0 : index
    %c0_63 = arith.constant 0 : index
    %c0_64 = arith.constant 0 : index
    %c8_65 = arith.constant 8 : index
    %c0_66 = arith.constant 0 : index
    %46 = vector.load %arg2[%c0_62, %c0_63, %c0_64, %c8_65, %c0_66] : memref<1x1x4x24x16xbf16, #tpu.memory_space<vmem>>, vector<1x1x1x16x16xbf16>
    %47 = vector.shape_cast %46 : vector<1x1x1x16x16xbf16> to vector<16x16xbf16>
    %c8_67 = arith.constant 8 : index
    %c0_68 = arith.constant 0 : index
    %c0_69 = arith.constant 0 : index
    %48 = vector.load %arg3[%c8_67, %c0_68, %c0_69] : memref<9x16x128xbf16, #tpu.memory_space<vmem>>, vector<1x16x128xbf16>
    %49 = vector.shape_cast %48 : vector<1x16x128xbf16> to vector<16x128xbf16>
    %cst_70 = arith.constant dense<0.000000e+00> : vector<16x128xf32>
    %50 = tpu.matmul %47, %49, %cst_70 {dimension_numbers = #tpu.dot_dimension_numbers<[1], [0], [0], [1], [0, 0, 1, 1], [], []>} : vector<16x16xbf16>, vector<16x128xbf16>, vector<16x128xf32> -> vector<16x128xf32>
    %51 = arith.addf %33, %50 : vector<16x128xf32>
    %52 = vector.shape_cast %45 : vector<16x128xf32> to vector<2x8x128xf32>
    %53 = vector.extract_strided_slice %52 {offsets = [0, 0, 0], sizes = [2, 2, 128], strides = [1, 1, 1]} : vector<2x8x128xf32> to vector<2x2x128xf32>
    %54 = vector.shape_cast %51 : vector<16x128xf32> to vector<2x8x128xf32>
    %55 = vector.extract_strided_slice %54 {offsets = [0, 1, 0], sizes = [2, 2, 128], strides = [1, 1, 1]} : vector<2x8x128xf32> to vector<2x2x128xf32>
    %56 = arith.addf %53, %55 : vector<2x2x128xf32>
    %c0_71 = arith.constant 0 : index
    %c0_72 = arith.constant 0 : index
    %57 = vector.load %arg4[%c0_71, %c0_72] : memref<1x128xf32, #tpu.memory_space<vmem>>, vector<1x128xf32>
    %58 = vector.shape_cast %57 : vector<1x128xf32> to vector<1x1x128xf32>
    %59 = vector.broadcast %58 : vector<1x1x128xf32> to vector<2x2x128xf32>
    %60 = arith.addf %56, %59 : vector<2x2x128xf32>
    %c0_73 = arith.constant 0 : index
    %c0_74 = arith.constant 0 : index
    %c0_75 = arith.constant 0 : index
    %c0_76 = arith.constant 0 : index
    %c0_77 = arith.constant 0 : index
    %61 = vector.load %arg5[%c0_73, %c0_74, %c0_75, %c0_76, %c0_77] : memref<1x1x2x2x128xf32, #tpu.memory_space<vmem>>, vector<1x1x2x2x128xf32>
    %62 = vector.shape_cast %61 : vector<1x1x2x2x128xf32> to vector<2x2x128xf32>
    %63 = vector.shape_cast %60 : vector<2x2x128xf32> to vector<1x1x2x2x128xf32>
    tpu.vector_store %arg5[%c0_73, %c0_74, %c0_75, %c0_76, %c0_77], %63 {strides = array<i32>} : memref<1x1x2x2x128xf32, #tpu.memory_space<vmem>>, vector<1x1x2x2x128xf32>,
    return
  }
  func.func @transform_0(%arg0: i32, %arg1: i32) -> (i32, i32, i32, i32, i32) {
    %c0_i32 = arith.constant 0 : i32
    %c0_i32_0 = arith.constant 0 : i32
    %c0_i32_1 = arith.constant 0 : i32
    %c0_i32_2 = arith.constant 0 : i32
    return %arg0, %arg1, %c0_i32, %c0_i32_0, %c0_i32_1 : i32, i32, i32, i32, i32
  }
  func.func @transform_1(%arg0: i32, %arg1: i32) -> (i32, i32, i32) {
    %c0_i32 = arith.constant 0 : i32
    %c0_i32_0 = arith.constant 0 : i32
    %c0_i32_1 = arith.constant 0 : i32
    %c0_i32_2 = arith.constant 0 : i32
    return %c0_i32, %c0_i32_0, %c0_i32_1 : i32, i32, i32
  }
  func.func @transform_2(%arg0: i32, %arg1: i32) -> (i32, i32) {
    %c0_i32 = arith.constant 0 : i32
    %c0_i32_0 = arith.constant 0 : i32
    %c0_i32_1 = arith.constant 0 : i32
    return %c0_i32, %c0_i32_0 : i32, i32
  }
  func.func @transform_3(%arg0: i32, %arg1: i32) -> (i32, i32, i32, i32, i32) {
    %c0_i32 = arith.constant 0 : i32
    %c0_i32_0 = arith.constant 0 : i32
    %c0_i32_1 = arith.constant 0 : i32
    %c0_i32_2 = arith.constant 0 : i32
    return %arg0, %arg1, %c0_i32, %c0_i32_0, %c0_i32_1 : i32, i32, i32, i32, i32
  }
}

module attributes {stable_mosaic.version = 11 : i64} {
  func.func @kernel(%arg0: i32, %arg1: i32, %arg2: memref<1x1x4x16x128xbf16, #tpu.memory_space<vmem>>, %arg3: memref<9x128x128xbf16, #tpu.memory_space<vmem>>, %arg4: memref<1x128xf32, #tpu.memory_space<vmem>>, %arg5: memref<1x1x1x1x128xf32, #tpu.memory_space<vmem>>) attributes {dimension_semantics = [#tpu.dimension_semantics<parallel>, #tpu.dimension_semantics<parallel>], iteration_bounds = array<i64: 2, 1>, scalar_prefetch = 0 : i64, scratch_operands = 0 : i64, tpu.core_type = #tpu.core_type<tc>, window_params = [{transform_indices = @transform_0, window_bounds = array<i64: 1, 1, 4, 16, 128>}, {pipeline_mode = #tpu.pipeline_mode<synchronous>, transform_indices = @transform_1, window_bounds = array<i64: 9, 128, 128>}, {pipeline_mode = #tpu.pipeline_mode<synchronous>, transform_indices = @transform_2, window_bounds = array<i64: 1, 128>}, {transform_indices = @transform_3, window_bounds = array<i64: 1, 1, 1, 1, 128>}]} {
    %c0 = arith.constant 0 : index
    %c0_0 = arith.constant 0 : index
    %c0_1 = arith.constant 0 : index
    %c0_2 = arith.constant 0 : index
    %c0_3 = arith.constant 0 : index
    %0 = vector.load %arg2[%c0, %c0_0, %c0_1, %c0_2, %c0_3] : memref<1x1x4x16x128xbf16, #tpu.memory_space<vmem>>, vector<1x1x1x8x128xbf16>
    %1 = vector.shape_cast %0 : vector<1x1x1x8x128xbf16> to vector<8x128xbf16>
    %c0_4 = arith.constant 0 : index
    %c0_5 = arith.constant 0 : index
    %c0_6 = arith.constant 0 : index
    %2 = vector.load %arg3[%c0_4, %c0_5, %c0_6] : memref<9x128x128xbf16, #tpu.memory_space<vmem>>, vector<1x128x128xbf16>
    %3 = vector.shape_cast %2 : vector<1x128x128xbf16> to vector<128x128xbf16>
    %cst = arith.constant dense<0.000000e+00> : vector<8x128xf32>
    %4 = tpu.matmul %1, %3, %cst {dimension_numbers = #tpu.dot_dimension_numbers<[1], [0], [0], [1], [0, 0, 1, 1], [], []>} : vector<8x128xbf16>, vector<128x128xbf16>, vector<8x128xf32> -> vector<8x128xf32>
    %c0_7 = arith.constant 0 : index
    %c0_8 = arith.constant 0 : index
    %c1 = arith.constant 1 : index
    %c0_9 = arith.constant 0 : index
    %c0_10 = arith.constant 0 : index
    %5 = vector.load %arg2[%c0_7, %c0_8, %c1, %c0_9, %c0_10] : memref<1x1x4x16x128xbf16, #tpu.memory_space<vmem>>, vector<1x1x1x8x128xbf16>
    %6 = vector.shape_cast %5 : vector<1x1x1x8x128xbf16> to vector<8x128xbf16>
    %c1_11 = arith.constant 1 : index
    %c0_12 = arith.constant 0 : index
    %c0_13 = arith.constant 0 : index
    %7 = vector.load %arg3[%c1_11, %c0_12, %c0_13] : memref<9x128x128xbf16, #tpu.memory_space<vmem>>, vector<1x128x128xbf16>
    %8 = vector.shape_cast %7 : vector<1x128x128xbf16> to vector<128x128xbf16>
    %cst_14 = arith.constant dense<0.000000e+00> : vector<8x128xf32>
    %9 = tpu.matmul %6, %8, %cst_14 {dimension_numbers = #tpu.dot_dimension_numbers<[1], [0], [0], [1], [0, 0, 1, 1], [], []>} : vector<8x128xbf16>, vector<128x128xbf16>, vector<8x128xf32> -> vector<8x128xf32>
    %10 = arith.addf %4, %9 : vector<8x128xf32>
    %c0_15 = arith.constant 0 : index
    %c0_16 = arith.constant 0 : index
    %c0_17 = arith.constant 0 : index
    %c0_18 = arith.constant 0 : index
    %c0_19 = arith.constant 0 : index
    %11 = vector.load %arg2[%c0_15, %c0_16, %c0_17, %c0_18, %c0_19] : memref<1x1x4x16x128xbf16, #tpu.memory_space<vmem>>, vector<1x1x1x8x128xbf16>
    %12 = vector.shape_cast %11 : vector<1x1x1x8x128xbf16> to vector<8x128xbf16>
    %c2 = arith.constant 2 : index
    %c0_20 = arith.constant 0 : index
    %c0_21 = arith.constant 0 : index
    %13 = vector.load %arg3[%c2, %c0_20, %c0_21] : memref<9x128x128xbf16, #tpu.memory_space<vmem>>, vector<1x128x128xbf16>
    %14 = vector.shape_cast %13 : vector<1x128x128xbf16> to vector<128x128xbf16>
    %cst_22 = arith.constant dense<0.000000e+00> : vector<8x128xf32>
    %15 = tpu.matmul %12, %14, %cst_22 {dimension_numbers = #tpu.dot_dimension_numbers<[1], [0], [0], [1], [0, 0, 1, 1], [], []>} : vector<8x128xbf16>, vector<128x128xbf16>, vector<8x128xf32> -> vector<8x128xf32>
    %c0_23 = arith.constant 0 : index
    %c0_24 = arith.constant 0 : index
    %c2_25 = arith.constant 2 : index
    %c0_26 = arith.constant 0 : index
    %c0_27 = arith.constant 0 : index
    %16 = vector.load %arg2[%c0_23, %c0_24, %c2_25, %c0_26, %c0_27] : memref<1x1x4x16x128xbf16, #tpu.memory_space<vmem>>, vector<1x1x1x8x128xbf16>
    %17 = vector.shape_cast %16 : vector<1x1x1x8x128xbf16> to vector<8x128xbf16>
    %c3 = arith.constant 3 : index
    %c0_28 = arith.constant 0 : index
    %c0_29 = arith.constant 0 : index
    %18 = vector.load %arg3[%c3, %c0_28, %c0_29] : memref<9x128x128xbf16, #tpu.memory_space<vmem>>, vector<1x128x128xbf16>
    %19 = vector.shape_cast %18 : vector<1x128x128xbf16> to vector<128x128xbf16>
    %cst_30 = arith.constant dense<0.000000e+00> : vector<8x128xf32>
    %20 = tpu.matmul %17, %19, %cst_30 {dimension_numbers = #tpu.dot_dimension_numbers<[1], [0], [0], [1], [0, 0, 1, 1], [], []>} : vector<8x128xbf16>, vector<128x128xbf16>, vector<8x128xf32> -> vector<8x128xf32>
    %21 = arith.addf %10, %20 : vector<8x128xf32>
    %c0_31 = arith.constant 0 : index
    %c0_32 = arith.constant 0 : index
    %c3_33 = arith.constant 3 : index
    %c0_34 = arith.constant 0 : index
    %c0_35 = arith.constant 0 : index
    %22 = vector.load %arg2[%c0_31, %c0_32, %c3_33, %c0_34, %c0_35] : memref<1x1x4x16x128xbf16, #tpu.memory_space<vmem>>, vector<1x1x1x8x128xbf16>
    %23 = vector.shape_cast %22 : vector<1x1x1x8x128xbf16> to vector<8x128xbf16>
    %c4 = arith.constant 4 : index
    %c0_36 = arith.constant 0 : index
    %c0_37 = arith.constant 0 : index
    %24 = vector.load %arg3[%c4, %c0_36, %c0_37] : memref<9x128x128xbf16, #tpu.memory_space<vmem>>, vector<1x128x128xbf16>
    %25 = vector.shape_cast %24 : vector<1x128x128xbf16> to vector<128x128xbf16>
    %cst_38 = arith.constant dense<0.000000e+00> : vector<8x128xf32>
    %26 = tpu.matmul %23, %25, %cst_38 {dimension_numbers = #tpu.dot_dimension_numbers<[1], [0], [0], [1], [0, 0, 1, 1], [], []>} : vector<8x128xbf16>, vector<128x128xbf16>, vector<8x128xf32> -> vector<8x128xf32>
    %27 = arith.addf %21, %26 : vector<8x128xf32>
    %c0_39 = arith.constant 0 : index
    %c0_40 = arith.constant 0 : index
    %c2_41 = arith.constant 2 : index
    %c0_42 = arith.constant 0 : index
    %c0_43 = arith.constant 0 : index
    %28 = vector.load %arg2[%c0_39, %c0_40, %c2_41, %c0_42, %c0_43] : memref<1x1x4x16x128xbf16, #tpu.memory_space<vmem>>, vector<1x1x1x8x128xbf16>
    %29 = vector.shape_cast %28 : vector<1x1x1x8x128xbf16> to vector<8x128xbf16>
    %c5 = arith.constant 5 : index
    %c0_44 = arith.constant 0 : index
    %c0_45 = arith.constant 0 : index
    %30 = vector.load %arg3[%c5, %c0_44, %c0_45] : memref<9x128x128xbf16, #tpu.memory_space<vmem>>, vector<1x128x128xbf16>
    %31 = vector.shape_cast %30 : vector<1x128x128xbf16> to vector<128x128xbf16>
    %cst_46 = arith.constant dense<0.000000e+00> : vector<8x128xf32>
    %32 = tpu.matmul %29, %31, %cst_46 {dimension_numbers = #tpu.dot_dimension_numbers<[1], [0], [0], [1], [0, 0, 1, 1], [], []>} : vector<8x128xbf16>, vector<128x128xbf16>, vector<8x128xf32> -> vector<8x128xf32>
    %33 = arith.addf %15, %32 : vector<8x128xf32>
    %c0_47 = arith.constant 0 : index
    %c0_48 = arith.constant 0 : index
    %c0_49 = arith.constant 0 : index
    %c8 = arith.constant 8 : index
    %c0_50 = arith.constant 0 : index
    %34 = vector.load %arg2[%c0_47, %c0_48, %c0_49, %c8, %c0_50] : memref<1x1x4x16x128xbf16, #tpu.memory_space<vmem>>, vector<1x1x1x8x128xbf16>
    %35 = vector.shape_cast %34 : vector<1x1x1x8x128xbf16> to vector<8x128xbf16>
    %c6 = arith.constant 6 : index
    %c0_51 = arith.constant 0 : index
    %c0_52 = arith.constant 0 : index
    %36 = vector.load %arg3[%c6, %c0_51, %c0_52] : memref<9x128x128xbf16, #tpu.memory_space<vmem>>, vector<1x128x128xbf16>
    %37 = vector.shape_cast %36 : vector<1x128x128xbf16> to vector<128x128xbf16>
    %cst_53 = arith.constant dense<0.000000e+00> : vector<8x128xf32>
    %38 = tpu.matmul %35, %37, %cst_53 {dimension_numbers = #tpu.dot_dimension_numbers<[1], [0], [0], [1], [0, 0, 1, 1], [], []>} : vector<8x128xbf16>, vector<128x128xbf16>, vector<8x128xf32> -> vector<8x128xf32>
    %39 = arith.addf %27, %38 : vector<8x128xf32>
    %c0_54 = arith.constant 0 : index
    %c0_55 = arith.constant 0 : index
    %c1_56 = arith.constant 1 : index
    %c8_57 = arith.constant 8 : index
    %c0_58 = arith.constant 0 : index
    %40 = vector.load %arg2[%c0_54, %c0_55, %c1_56, %c8_57, %c0_58] : memref<1x1x4x16x128xbf16, #tpu.memory_space<vmem>>, vector<1x1x1x8x128xbf16>
    %41 = vector.shape_cast %40 : vector<1x1x1x8x128xbf16> to vector<8x128xbf16>
    %c7 = arith.constant 7 : index
    %c0_59 = arith.constant 0 : index
    %c0_60 = arith.constant 0 : index
    %42 = vector.load %arg3[%c7, %c0_59, %c0_60] : memref<9x128x128xbf16, #tpu.memory_space<vmem>>, vector<1x128x128xbf16>
    %43 = vector.shape_cast %42 : vector<1x128x128xbf16> to vector<128x128xbf16>
    %cst_61 = arith.constant dense<0.000000e+00> : vector<8x128xf32>
    %44 = tpu.matmul %41, %43, %cst_61 {dimension_numbers = #tpu.dot_dimension_numbers<[1], [0], [0], [1], [0, 0, 1, 1], [], []>} : vector<8x128xbf16>, vector<128x128xbf16>, vector<8x128xf32> -> vector<8x128xf32>
    %45 = arith.addf %39, %44 : vector<8x128xf32>
    %c0_62 = arith.constant 0 : index
    %c0_63 = arith.constant 0 : index
    %c0_64 = arith.constant 0 : index
    %c8_65 = arith.constant 8 : index
    %c0_66 = arith.constant 0 : index
    %46 = vector.load %arg2[%c0_62, %c0_63, %c0_64, %c8_65, %c0_66] : memref<1x1x4x16x128xbf16, #tpu.memory_space<vmem>>, vector<1x1x1x8x128xbf16>
    %47 = vector.shape_cast %46 : vector<1x1x1x8x128xbf16> to vector<8x128xbf16>
    %c8_67 = arith.constant 8 : index
    %c0_68 = arith.constant 0 : index
    %c0_69 = arith.constant 0 : index
    %48 = vector.load %arg3[%c8_67, %c0_68, %c0_69] : memref<9x128x128xbf16, #tpu.memory_space<vmem>>, vector<1x128x128xbf16>
    %49 = vector.shape_cast %48 : vector<1x128x128xbf16> to vector<128x128xbf16>
    %cst_70 = arith.constant dense<0.000000e+00> : vector<8x128xf32>
    %50 = tpu.matmul %47, %49, %cst_70 {dimension_numbers = #tpu.dot_dimension_numbers<[1], [0], [0], [1], [0, 0, 1, 1], [], []>} : vector<8x128xbf16>, vector<128x128xbf16>, vector<8x128xf32> -> vector<8x128xf32>
    %51 = arith.addf %33, %50 : vector<8x128xf32>
    %52 = vector.shape_cast %45 : vector<8x128xf32> to vector<1x8x128xf32>
    %53 = vector.extract_strided_slice %52 {offsets = [0, 0, 0], sizes = [1, 1, 128], strides = [1, 1, 1]} : vector<1x8x128xf32> to vector<1x1x128xf32>
    %54 = vector.shape_cast %51 : vector<8x128xf32> to vector<1x8x128xf32>
    %55 = vector.extract_strided_slice %54 {offsets = [0, 1, 0], sizes = [1, 1, 128], strides = [1, 1, 1]} : vector<1x8x128xf32> to vector<1x1x128xf32>
    %56 = arith.addf %53, %55 : vector<1x1x128xf32>
    %c0_71 = arith.constant 0 : index
    %c0_72 = arith.constant 0 : index
    %57 = vector.load %arg4[%c0_71, %c0_72] : memref<1x128xf32, #tpu.memory_space<vmem>>, vector<1x128xf32>
    %58 = vector.shape_cast %57 : vector<1x128xf32> to vector<1x1x128xf32>
    %59 = arith.addf %56, %58 : vector<1x1x128xf32>
    %c0_73 = arith.constant 0 : index
    %c0_74 = arith.constant 0 : index
    %c0_75 = arith.constant 0 : index
    %c0_76 = arith.constant 0 : index
    %c0_77 = arith.constant 0 : index
    %60 = vector.load %arg5[%c0_73, %c0_74, %c0_75, %c0_76, %c0_77] : memref<1x1x1x1x128xf32, #tpu.memory_space<vmem>>, vector<1x1x1x1x128xf32>
    %61 = vector.shape_cast %60 : vector<1x1x1x1x128xf32> to vector<1x1x128xf32>
    %62 = vector.shape_cast %59 : vector<1x1x128xf32> to vector<1x1x1x1x128xf32>
    tpu.vector_store %arg5[%c0_73, %c0_74, %c0_75, %c0_76, %c0_77], %62 {strides = array<i32>} : memref<1x1x1x1x128xf32, #tpu.memory_space<vmem>>, vector<1x1x1x1x128xf32>,
    return
  }
  func.func @transform_0(%arg0: i32, %arg1: i32) -> (i32, i32, i32, i32, i32) {
    %c0_i32 = arith.constant 0 : i32
    %c0_i32_0 = arith.constant 0 : i32
    %c0_i32_1 = arith.constant 0 : i32
    %c0_i32_2 = arith.constant 0 : i32
    return %arg0, %arg1, %c0_i32, %c0_i32_0, %c0_i32_1 : i32, i32, i32, i32, i32
  }
  func.func @transform_1(%arg0: i32, %arg1: i32) -> (i32, i32, i32) {
    %c0_i32 = arith.constant 0 : i32
    %c0_i32_0 = arith.constant 0 : i32
    %c0_i32_1 = arith.constant 0 : i32
    %c0_i32_2 = arith.constant 0 : i32
    return %c0_i32, %c0_i32_0, %c0_i32_1 : i32, i32, i32
  }
  func.func @transform_2(%arg0: i32, %arg1: i32) -> (i32, i32) {
    %c0_i32 = arith.constant 0 : i32
    %c0_i32_0 = arith.constant 0 : i32
    %c0_i32_1 = arith.constant 0 : i32
    return %c0_i32, %c0_i32_0 : i32, i32
  }
  func.func @transform_3(%arg0: i32, %arg1: i32) -> (i32, i32, i32, i32, i32) {
    %c0_i32 = arith.constant 0 : i32
    %c0_i32_0 = arith.constant 0 : i32
    %c0_i32_1 = arith.constant 0 : i32
    %c0_i32_2 = arith.constant 0 : i32
    return %arg0, %arg1, %c0_i32, %c0_i32_0, %c0_i32_1 : i32, i32, i32, i32, i32
  }
}

module attributes {stable_mosaic.version = 11 : i64} {
  func.func @_pointwise_kernel(%arg0: i32, %arg1: i32, %arg2: memref<1x4x256xf32, #tpu.memory_space<vmem>>, %arg3: memref<128x4xbf16, #tpu.memory_space<vmem>>, %arg4: memref<128x1xf32, #tpu.memory_space<vmem>>, %arg5: memref<1x128x256xf32, #tpu.memory_space<vmem>>) attributes {dimension_semantics = [#tpu.dimension_semantics<parallel>, #tpu.dimension_semantics<parallel>], iteration_bounds = array<i64: 2, 1>, scalar_prefetch = 0 : i64, scratch_operands = 0 : i64, tpu.core_type = #tpu.core_type<tc>, window_params = [{transform_indices = @transform_0, window_bounds = array<i64: 1, 4, 256>}, {pipeline_mode = #tpu.pipeline_mode<synchronous>, transform_indices = @transform_1, window_bounds = array<i64: 128, 4>}, {pipeline_mode = #tpu.pipeline_mode<synchronous>, transform_indices = @transform_2, window_bounds = array<i64: 128, 1>}, {transform_indices = @transform_3, window_bounds = array<i64: 1, 128, 256>}]} {
    %c0 = arith.constant 0 : index
    %c0_0 = arith.constant 0 : index
    %c0_1 = arith.constant 0 : index
    %0 = vector.load %arg2[%c0, %c0_0, %c0_1] : memref<1x4x256xf32, #tpu.memory_space<vmem>>, vector<1x4x256xf32>
    %1 = vector.shape_cast %0 : vector<1x4x256xf32> to vector<4x256xf32>
    %2 = arith.truncf %1 : vector<4x256xf32> to vector<4x256xbf16>
    %c0_2 = arith.constant 0 : index
    %c0_3 = arith.constant 0 : index
    %3 = vector.load %arg3[%c0_2, %c0_3] : memref<128x4xbf16, #tpu.memory_space<vmem>>, vector<128x4xbf16>
    %cst = arith.constant dense<0.000000e+00> : vector<128x256xf32>
    %4 = tpu.matmul %3, %2, %cst {dimension_numbers = #tpu.dot_dimension_numbers<[1], [0], [0], [1], [0, 0, 1, 1], [], []>} : vector<128x4xbf16>, vector<4x256xbf16>, vector<128x256xf32> -> vector<128x256xf32>
    %c0_4 = arith.constant 0 : index
    %c0_5 = arith.constant 0 : index
    %5 = vector.load %arg4[%c0_4, %c0_5] : memref<128x1xf32, #tpu.memory_space<vmem>>, vector<128x1xf32>
    %6 = vector.broadcast %5 : vector<128x1xf32> to vector<128x256xf32>
    %7 = arith.addf %4, %6 : vector<128x256xf32>
    %c0_6 = arith.constant 0 : index
    %c0_7 = arith.constant 0 : index
    %c0_8 = arith.constant 0 : index
    %8 = vector.load %arg5[%c0_6, %c0_7, %c0_8] : memref<1x128x256xf32, #tpu.memory_space<vmem>>, vector<1x128x256xf32>
    %9 = vector.shape_cast %8 : vector<1x128x256xf32> to vector<128x256xf32>
    %10 = vector.shape_cast %7 : vector<128x256xf32> to vector<1x128x256xf32>
    tpu.vector_store %arg5[%c0_6, %c0_7, %c0_8], %10 {strides = array<i32>} : memref<1x128x256xf32, #tpu.memory_space<vmem>>, vector<1x128x256xf32>,
    return
  }
  func.func @transform_0(%arg0: i32, %arg1: i32) -> (i32, i32, i32) {
    %c0_i32 = arith.constant 0 : i32
    %c0_i32_0 = arith.constant 0 : i32
    return %arg0, %c0_i32, %arg1 : i32, i32, i32
  }
  func.func @transform_1(%arg0: i32, %arg1: i32) -> (i32, i32) {
    %c0_i32 = arith.constant 0 : i32
    %c0_i32_0 = arith.constant 0 : i32
    %c0_i32_1 = arith.constant 0 : i32
    return %c0_i32, %c0_i32_0 : i32, i32
  }
  func.func @transform_2(%arg0: i32, %arg1: i32) -> (i32, i32) {
    %c0_i32 = arith.constant 0 : i32
    %c0_i32_0 = arith.constant 0 : i32
    %c0_i32_1 = arith.constant 0 : i32
    return %c0_i32, %c0_i32_0 : i32, i32
  }
  func.func @transform_3(%arg0: i32, %arg1: i32) -> (i32, i32, i32) {
    %c0_i32 = arith.constant 0 : i32
    %c0_i32_0 = arith.constant 0 : i32
    return %arg0, %c0_i32, %arg1 : i32, i32, i32
  }
}

module attributes {stable_mosaic.version = 11 : i64} {
  func.func @_pointwise_kernel(%arg0: i32, %arg1: i32, %arg2: memref<1x8x64xf32, #tpu.memory_space<vmem>>, %arg3: memref<128x8xbf16, #tpu.memory_space<vmem>>, %arg4: memref<128x1xf32, #tpu.memory_space<vmem>>, %arg5: memref<1x128x64xf32, #tpu.memory_space<vmem>>) attributes {dimension_semantics = [#tpu.dimension_semantics<parallel>, #tpu.dimension_semantics<parallel>], iteration_bounds = array<i64: 2, 1>, scalar_prefetch = 0 : i64, scratch_operands = 0 : i64, tpu.core_type = #tpu.core_type<tc>, window_params = [{transform_indices = @transform_0, window_bounds = array<i64: 1, 8, 64>}, {pipeline_mode = #tpu.pipeline_mode<synchronous>, transform_indices = @transform_1, window_bounds = array<i64: 128, 8>}, {pipeline_mode = #tpu.pipeline_mode<synchronous>, transform_indices = @transform_2, window_bounds = array<i64: 128, 1>}, {transform_indices = @transform_3, window_bounds = array<i64: 1, 128, 64>}]} {
    %c0 = arith.constant 0 : index
    %c0_0 = arith.constant 0 : index
    %c0_1 = arith.constant 0 : index
    %0 = vector.load %arg2[%c0, %c0_0, %c0_1] : memref<1x8x64xf32, #tpu.memory_space<vmem>>, vector<1x8x64xf32>
    %1 = vector.shape_cast %0 : vector<1x8x64xf32> to vector<8x64xf32>
    %2 = arith.truncf %1 : vector<8x64xf32> to vector<8x64xbf16>
    %c0_2 = arith.constant 0 : index
    %c0_3 = arith.constant 0 : index
    %3 = vector.load %arg3[%c0_2, %c0_3] : memref<128x8xbf16, #tpu.memory_space<vmem>>, vector<128x8xbf16>
    %cst = arith.constant dense<0.000000e+00> : vector<128x64xf32>
    %4 = tpu.matmul %3, %2, %cst {dimension_numbers = #tpu.dot_dimension_numbers<[1], [0], [0], [1], [0, 0, 1, 1], [], []>} : vector<128x8xbf16>, vector<8x64xbf16>, vector<128x64xf32> -> vector<128x64xf32>
    %c0_4 = arith.constant 0 : index
    %c0_5 = arith.constant 0 : index
    %5 = vector.load %arg4[%c0_4, %c0_5] : memref<128x1xf32, #tpu.memory_space<vmem>>, vector<128x1xf32>
    %6 = vector.broadcast %5 : vector<128x1xf32> to vector<128x64xf32>
    %7 = arith.addf %4, %6 : vector<128x64xf32>
    %c0_6 = arith.constant 0 : index
    %c0_7 = arith.constant 0 : index
    %c0_8 = arith.constant 0 : index
    %8 = vector.load %arg5[%c0_6, %c0_7, %c0_8] : memref<1x128x64xf32, #tpu.memory_space<vmem>>, vector<1x128x64xf32>
    %9 = vector.shape_cast %8 : vector<1x128x64xf32> to vector<128x64xf32>
    %10 = vector.shape_cast %7 : vector<128x64xf32> to vector<1x128x64xf32>
    tpu.vector_store %arg5[%c0_6, %c0_7, %c0_8], %10 {strides = array<i32>} : memref<1x128x64xf32, #tpu.memory_space<vmem>>, vector<1x128x64xf32>,
    return
  }
  func.func @transform_0(%arg0: i32, %arg1: i32) -> (i32, i32, i32) {
    %c0_i32 = arith.constant 0 : i32
    %c0_i32_0 = arith.constant 0 : i32
    return %arg0, %c0_i32, %arg1 : i32, i32, i32
  }
  func.func @transform_1(%arg0: i32, %arg1: i32) -> (i32, i32) {
    %c0_i32 = arith.constant 0 : i32
    %c0_i32_0 = arith.constant 0 : i32
    %c0_i32_1 = arith.constant 0 : i32
    return %c0_i32, %c0_i32_0 : i32, i32
  }
  func.func @transform_2(%arg0: i32, %arg1: i32) -> (i32, i32) {
    %c0_i32 = arith.constant 0 : i32
    %c0_i32_0 = arith.constant 0 : i32
    %c0_i32_1 = arith.constant 0 : i32
    return %c0_i32, %c0_i32_0 : i32, i32
  }
  func.func @transform_3(%arg0: i32, %arg1: i32) -> (i32, i32, i32) {
    %c0_i32 = arith.constant 0 : i32
    %c0_i32_0 = arith.constant 0 : i32
    return %arg0, %c0_i32, %arg1 : i32, i32, i32
  }
}

module attributes {stable_mosaic.version = 11 : i64} {
  func.func @_pointwise_kernel(%arg0: i32, %arg1: i32, %arg2: memref<1x16x16xf32, #tpu.memory_space<vmem>>, %arg3: memref<128x16xbf16, #tpu.memory_space<vmem>>, %arg4: memref<128x1xf32, #tpu.memory_space<vmem>>, %arg5: memref<1x128x16xf32, #tpu.memory_space<vmem>>) attributes {dimension_semantics = [#tpu.dimension_semantics<parallel>, #tpu.dimension_semantics<parallel>], iteration_bounds = array<i64: 2, 1>, scalar_prefetch = 0 : i64, scratch_operands = 0 : i64, tpu.core_type = #tpu.core_type<tc>, window_params = [{transform_indices = @transform_0, window_bounds = array<i64: 1, 16, 16>}, {pipeline_mode = #tpu.pipeline_mode<synchronous>, transform_indices = @transform_1, window_bounds = array<i64: 128, 16>}, {pipeline_mode = #tpu.pipeline_mode<synchronous>, transform_indices = @transform_2, window_bounds = array<i64: 128, 1>}, {transform_indices = @transform_3, window_bounds = array<i64: 1, 128, 16>}]} {
    %c0 = arith.constant 0 : index
    %c0_0 = arith.constant 0 : index
    %c0_1 = arith.constant 0 : index
    %0 = vector.load %arg2[%c0, %c0_0, %c0_1] : memref<1x16x16xf32, #tpu.memory_space<vmem>>, vector<1x16x16xf32>
    %1 = vector.shape_cast %0 : vector<1x16x16xf32> to vector<16x16xf32>
    %2 = arith.truncf %1 : vector<16x16xf32> to vector<16x16xbf16>
    %c0_2 = arith.constant 0 : index
    %c0_3 = arith.constant 0 : index
    %3 = vector.load %arg3[%c0_2, %c0_3] : memref<128x16xbf16, #tpu.memory_space<vmem>>, vector<128x16xbf16>
    %cst = arith.constant dense<0.000000e+00> : vector<128x16xf32>
    %4 = tpu.matmul %3, %2, %cst {dimension_numbers = #tpu.dot_dimension_numbers<[1], [0], [0], [1], [0, 0, 1, 1], [], []>} : vector<128x16xbf16>, vector<16x16xbf16>, vector<128x16xf32> -> vector<128x16xf32>
    %c0_4 = arith.constant 0 : index
    %c0_5 = arith.constant 0 : index
    %5 = vector.load %arg4[%c0_4, %c0_5] : memref<128x1xf32, #tpu.memory_space<vmem>>, vector<128x1xf32>
    %6 = vector.broadcast %5 : vector<128x1xf32> to vector<128x16xf32>
    %7 = arith.addf %4, %6 : vector<128x16xf32>
    %c0_6 = arith.constant 0 : index
    %c0_7 = arith.constant 0 : index
    %c0_8 = arith.constant 0 : index
    %8 = vector.load %arg5[%c0_6, %c0_7, %c0_8] : memref<1x128x16xf32, #tpu.memory_space<vmem>>, vector<1x128x16xf32>
    %9 = vector.shape_cast %8 : vector<1x128x16xf32> to vector<128x16xf32>
    %10 = vector.shape_cast %7 : vector<128x16xf32> to vector<1x128x16xf32>
    tpu.vector_store %arg5[%c0_6, %c0_7, %c0_8], %10 {strides = array<i32>} : memref<1x128x16xf32, #tpu.memory_space<vmem>>, vector<1x128x16xf32>,
    return
  }
  func.func @transform_0(%arg0: i32, %arg1: i32) -> (i32, i32, i32) {
    %c0_i32 = arith.constant 0 : i32
    %c0_i32_0 = arith.constant 0 : i32
    return %arg0, %c0_i32, %arg1 : i32, i32, i32
  }
  func.func @transform_1(%arg0: i32, %arg1: i32) -> (i32, i32) {
    %c0_i32 = arith.constant 0 : i32
    %c0_i32_0 = arith.constant 0 : i32
    %c0_i32_1 = arith.constant 0 : i32
    return %c0_i32, %c0_i32_0 : i32, i32
  }
  func.func @transform_2(%arg0: i32, %arg1: i32) -> (i32, i32) {
    %c0_i32 = arith.constant 0 : i32
    %c0_i32_0 = arith.constant 0 : i32
    %c0_i32_1 = arith.constant 0 : i32
    return %c0_i32, %c0_i32_0 : i32, i32
  }
  func.func @transform_3(%arg0: i32, %arg1: i32) -> (i32, i32, i32) {
    %c0_i32 = arith.constant 0 : i32
    %c0_i32_0 = arith.constant 0 : i32
    return %arg0, %c0_i32, %arg1 : i32, i32, i32
  }
}

module attributes {stable_mosaic.version = 11 : i64} {
  func.func @kernel(%arg0: i32, %arg1: i32, %arg2: memref<1x1x4x24x16xbf16, #tpu.memory_space<vmem>>, %arg3: memref<9x16x128xbf16, #tpu.memory_space<vmem>>, %arg4: memref<1x128xf32, #tpu.memory_space<vmem>>, %arg5: memref<1x1x2x2x128xf32, #tpu.memory_space<vmem>>) attributes {dimension_semantics = [#tpu.dimension_semantics<parallel>, #tpu.dimension_semantics<parallel>], iteration_bounds = array<i64: 2, 1>, scalar_prefetch = 0 : i64, scratch_operands = 0 : i64, tpu.core_type = #tpu.core_type<tc>, window_params = [{transform_indices = @transform_0, window_bounds = array<i64: 1, 1, 4, 24, 16>}, {pipeline_mode = #tpu.pipeline_mode<synchronous>, transform_indices = @transform_1, window_bounds = array<i64: 9, 16, 128>}, {pipeline_mode = #tpu.pipeline_mode<synchronous>, transform_indices = @transform_2, window_bounds = array<i64: 1, 128>}, {transform_indices = @transform_3, window_bounds = array<i64: 1, 1, 2, 2, 128>}]} {
    %c0 = arith.constant 0 : index
    %c0_0 = arith.constant 0 : index
    %c0_1 = arith.constant 0 : index
    %c0_2 = arith.constant 0 : index
    %c0_3 = arith.constant 0 : index
    %0 = vector.load %arg2[%c0, %c0_0, %c0_1, %c0_2, %c0_3] : memref<1x1x4x24x16xbf16, #tpu.memory_space<vmem>>, vector<1x1x1x16x16xbf16>
    %1 = vector.shape_cast %0 : vector<1x1x1x16x16xbf16> to vector<16x16xbf16>
    %c0_4 = arith.constant 0 : index
    %c0_5 = arith.constant 0 : index
    %c0_6 = arith.constant 0 : index
    %2 = vector.load %arg3[%c0_4, %c0_5, %c0_6] : memref<9x16x128xbf16, #tpu.memory_space<vmem>>, vector<1x16x128xbf16>
    %3 = vector.shape_cast %2 : vector<1x16x128xbf16> to vector<16x128xbf16>
    %cst = arith.constant dense<0.000000e+00> : vector<16x128xf32>
    %4 = tpu.matmul %1, %3, %cst {dimension_numbers = #tpu.dot_dimension_numbers<[1], [0], [0], [1], [0, 0, 1, 1], [], []>} : vector<16x16xbf16>, vector<16x128xbf16>, vector<16x128xf32> -> vector<16x128xf32>
    %c0_7 = arith.constant 0 : index
    %c0_8 = arith.constant 0 : index
    %c1 = arith.constant 1 : index
    %c0_9 = arith.constant 0 : index
    %c0_10 = arith.constant 0 : index
    %5 = vector.load %arg2[%c0_7, %c0_8, %c1, %c0_9, %c0_10] : memref<1x1x4x24x16xbf16, #tpu.memory_space<vmem>>, vector<1x1x1x16x16xbf16>
    %6 = vector.shape_cast %5 : vector<1x1x1x16x16xbf16> to vector<16x16xbf16>
    %c1_11 = arith.constant 1 : index
    %c0_12 = arith.constant 0 : index
    %c0_13 = arith.constant 0 : index
    %7 = vector.load %arg3[%c1_11, %c0_12, %c0_13] : memref<9x16x128xbf16, #tpu.memory_space<vmem>>, vector<1x16x128xbf16>
    %8 = vector.shape_cast %7 : vector<1x16x128xbf16> to vector<16x128xbf16>
    %cst_14 = arith.constant dense<0.000000e+00> : vector<16x128xf32>
    %9 = tpu.matmul %6, %8, %cst_14 {dimension_numbers = #tpu.dot_dimension_numbers<[1], [0], [0], [1], [0, 0, 1, 1], [], []>} : vector<16x16xbf16>, vector<16x128xbf16>, vector<16x128xf32> -> vector<16x128xf32>
    %10 = arith.addf %4, %9 : vector<16x128xf32>
    %c0_15 = arith.constant 0 : index
    %c0_16 = arith.constant 0 : index
    %c0_17 = arith.constant 0 : index
    %c0_18 = arith.constant 0 : index
    %c0_19 = arith.constant 0 : index
    %11 = vector.load %arg2[%c0_15, %c0_16, %c0_17, %c0_18, %c0_19] : memref<1x1x4x24x16xbf16, #tpu.memory_space<vmem>>, vector<1x1x1x16x16xbf16>
    %12 = vector.shape_cast %11 : vector<1x1x1x16x16xbf16> to vector<16x16xbf16>
    %c2 = arith.constant 2 : index
    %c0_20 = arith.constant 0 : index
    %c0_21 = arith.constant 0 : index
    %13 = vector.load %arg3[%c2, %c0_20, %c0_21] : memref<9x16x128xbf16, #tpu.memory_space<vmem>>, vector<1x16x128xbf16>
    %14 = vector.shape_cast %13 : vector<1x16x128xbf16> to vector<16x128xbf16>
    %cst_22 = arith.constant dense<0.000000e+00> : vector<16x128xf32>
    %15 = tpu.matmul %12, %14, %cst_22 {dimension_numbers = #tpu.dot_dimension_numbers<[1], [0], [0], [1], [0, 0, 1, 1], [], []>} : vector<16x16xbf16>, vector<16x128xbf16>, vector<16x128xf32> -> vector<16x128xf32>
    %c0_23 = arith.constant 0 : index
    %c0_24 = arith.constant 0 : index
    %c2_25 = arith.constant 2 : index
    %c0_26 = arith.constant 0 : index
    %c0_27 = arith.constant 0 : index
    %16 = vector.load %arg2[%c0_23, %c0_24, %c2_25, %c0_26, %c0_27] : memref<1x1x4x24x16xbf16, #tpu.memory_space<vmem>>, vector<1x1x1x16x16xbf16>
    %17 = vector.shape_cast %16 : vector<1x1x1x16x16xbf16> to vector<16x16xbf16>
    %c3 = arith.constant 3 : index
    %c0_28 = arith.constant 0 : index
    %c0_29 = arith.constant 0 : index
    %18 = vector.load %arg3[%c3, %c0_28, %c0_29] : memref<9x16x128xbf16, #tpu.memory_space<vmem>>, vector<1x16x128xbf16>
    %19 = vector.shape_cast %18 : vector<1x16x128xbf16> to vector<16x128xbf16>
    %cst_30 = arith.constant dense<0.000000e+00> : vector<16x128xf32>
    %20 = tpu.matmul %17, %19, %cst_30 {dimension_numbers = #tpu.dot_dimension_numbers<[1], [0], [0], [1], [0, 0, 1, 1], [], []>} : vector<16x16xbf16>, vector<16x128xbf16>, vector<16x128xf32> -> vector<16x128xf32>
    %21 = arith.addf %10, %20 : vector<16x128xf32>
    %c0_31 = arith.constant 0 : index
    %c0_32 = arith.constant 0 : index
    %c3_33 = arith.constant 3 : index
    %c0_34 = arith.constant 0 : index
    %c0_35 = arith.constant 0 : index
    %22 = vector.load %arg2[%c0_31, %c0_32, %c3_33, %c0_34, %c0_35] : memref<1x1x4x24x16xbf16, #tpu.memory_space<vmem>>, vector<1x1x1x16x16xbf16>
    %23 = vector.shape_cast %22 : vector<1x1x1x16x16xbf16> to vector<16x16xbf16>
    %c4 = arith.constant 4 : index
    %c0_36 = arith.constant 0 : index
    %c0_37 = arith.constant 0 : index
    %24 = vector.load %arg3[%c4, %c0_36, %c0_37] : memref<9x16x128xbf16, #tpu.memory_space<vmem>>, vector<1x16x128xbf16>
    %25 = vector.shape_cast %24 : vector<1x16x128xbf16> to vector<16x128xbf16>
    %cst_38 = arith.constant dense<0.000000e+00> : vector<16x128xf32>
    %26 = tpu.matmul %23, %25, %cst_38 {dimension_numbers = #tpu.dot_dimension_numbers<[1], [0], [0], [1], [0, 0, 1, 1], [], []>} : vector<16x16xbf16>, vector<16x128xbf16>, vector<16x128xf32> -> vector<16x128xf32>
    %27 = arith.addf %21, %26 : vector<16x128xf32>
    %c0_39 = arith.constant 0 : index
    %c0_40 = arith.constant 0 : index
    %c2_41 = arith.constant 2 : index
    %c0_42 = arith.constant 0 : index
    %c0_43 = arith.constant 0 : index
    %28 = vector.load %arg2[%c0_39, %c0_40, %c2_41, %c0_42, %c0_43] : memref<1x1x4x24x16xbf16, #tpu.memory_space<vmem>>, vector<1x1x1x16x16xbf16>
    %29 = vector.shape_cast %28 : vector<1x1x1x16x16xbf16> to vector<16x16xbf16>
    %c5 = arith.constant 5 : index
    %c0_44 = arith.constant 0 : index
    %c0_45 = arith.constant 0 : index
    %30 = vector.load %arg3[%c5, %c0_44, %c0_45] : memref<9x16x128xbf16, #tpu.memory_space<vmem>>, vector<1x16x128xbf16>
    %31 = vector.shape_cast %30 : vector<1x16x128xbf16> to vector<16x128xbf16>
    %cst_46 = arith.constant dense<0.000000e+00> : vector<16x128xf32>
    %32 = tpu.matmul %29, %31, %cst_46 {dimension_numbers = #tpu.dot_dimension_numbers<[1], [0], [0], [1], [0, 0, 1, 1], [], []>} : vector<16x16xbf16>, vector<16x128xbf16>, vector<16x128xf32> -> vector<16x128xf32>
    %33 = arith.addf %15, %32 : vector<16x128xf32>
    %c0_47 = arith.constant 0 : index
    %c0_48 = arith.constant 0 : index
    %c0_49 = arith.constant 0 : index
    %c8 = arith.constant 8 : index
    %c0_50 = arith.constant 0 : index
    %34 = vector.load %arg2[%c0_47, %c0_48, %c0_49, %c8, %c0_50] : memref<1x1x4x24x16xbf16, #tpu.memory_space<vmem>>, vector<1x1x1x16x16xbf16>
    %35 = vector.shape_cast %34 : vector<1x1x1x16x16xbf16> to vector<16x16xbf16>
    %c6 = arith.constant 6 : index
    %c0_51 = arith.constant 0 : index
    %c0_52 = arith.constant 0 : index
    %36 = vector.load %arg3[%c6, %c0_51, %c0_52] : memref<9x16x128xbf16, #tpu.memory_space<vmem>>, vector<1x16x128xbf16>
    %37 = vector.shape_cast %36 : vector<1x16x128xbf16> to vector<16x128xbf16>
    %cst_53 = arith.constant dense<0.000000e+00> : vector<16x128xf32>
    %38 = tpu.matmul %35, %37, %cst_53 {dimension_numbers = #tpu.dot_dimension_numbers<[1], [0], [0], [1], [0, 0, 1, 1], [], []>} : vector<16x16xbf16>, vector<16x128xbf16>, vector<16x128xf32> -> vector<16x128xf32>
    %39 = arith.addf %27, %38 : vector<16x128xf32>
    %c0_54 = arith.constant 0 : index
    %c0_55 = arith.constant 0 : index
    %c1_56 = arith.constant 1 : index
    %c8_57 = arith.constant 8 : index
    %c0_58 = arith.constant 0 : index
    %40 = vector.load %arg2[%c0_54, %c0_55, %c1_56, %c8_57, %c0_58] : memref<1x1x4x24x16xbf16, #tpu.memory_space<vmem>>, vector<1x1x1x16x16xbf16>
    %41 = vector.shape_cast %40 : vector<1x1x1x16x16xbf16> to vector<16x16xbf16>
    %c7 = arith.constant 7 : index
    %c0_59 = arith.constant 0 : index
    %c0_60 = arith.constant 0 : index
    %42 = vector.load %arg3[%c7, %c0_59, %c0_60] : memref<9x16x128xbf16, #tpu.memory_space<vmem>>, vector<1x16x128xbf16>
    %43 = vector.shape_cast %42 : vector<1x16x128xbf16> to vector<16x128xbf16>
    %cst_61 = arith.constant dense<0.000000e+00> : vector<16x128xf32>
    %44 = tpu.matmul %41, %43, %cst_61 {dimension_numbers = #tpu.dot_dimension_numbers<[1], [0], [0], [1], [0, 0, 1, 1], [], []>} : vector<16x16xbf16>, vector<16x128xbf16>, vector<16x128xf32> -> vector<16x128xf32>
    %45 = arith.addf %39, %44 : vector<16x128xf32>
    %c0_62 = arith.constant 0 : index
    %c0_63 = arith.constant 0 : index
    %c0_64 = arith.constant 0 : index
    %c8_65 = arith.constant 8 : index
    %c0_66 = arith.constant 0 : index
    %46 = vector.load %arg2[%c0_62, %c0_63, %c0_64, %c8_65, %c0_66] : memref<1x1x4x24x16xbf16, #tpu.memory_space<vmem>>, vector<1x1x1x16x16xbf16>
    %47 = vector.shape_cast %46 : vector<1x1x1x16x16xbf16> to vector<16x16xbf16>
    %c8_67 = arith.constant 8 : index
    %c0_68 = arith.constant 0 : index
    %c0_69 = arith.constant 0 : index
    %48 = vector.load %arg3[%c8_67, %c0_68, %c0_69] : memref<9x16x128xbf16, #tpu.memory_space<vmem>>, vector<1x16x128xbf16>
    %49 = vector.shape_cast %48 : vector<1x16x128xbf16> to vector<16x128xbf16>
    %cst_70 = arith.constant dense<0.000000e+00> : vector<16x128xf32>
    %50 = tpu.matmul %47, %49, %cst_70 {dimension_numbers = #tpu.dot_dimension_numbers<[1], [0], [0], [1], [0, 0, 1, 1], [], []>} : vector<16x16xbf16>, vector<16x128xbf16>, vector<16x128xf32> -> vector<16x128xf32>
    %51 = arith.addf %33, %50 : vector<16x128xf32>
    %52 = vector.shape_cast %45 : vector<16x128xf32> to vector<2x8x128xf32>
    %53 = vector.extract_strided_slice %52 {offsets = [0, 0, 0], sizes = [2, 2, 128], strides = [1, 1, 1]} : vector<2x8x128xf32> to vector<2x2x128xf32>
    %54 = vector.shape_cast %51 : vector<16x128xf32> to vector<2x8x128xf32>
    %55 = vector.extract_strided_slice %54 {offsets = [0, 1, 0], sizes = [2, 2, 128], strides = [1, 1, 1]} : vector<2x8x128xf32> to vector<2x2x128xf32>
    %56 = arith.addf %53, %55 : vector<2x2x128xf32>
    %c0_71 = arith.constant 0 : index
    %c0_72 = arith.constant 0 : index
    %57 = vector.load %arg4[%c0_71, %c0_72] : memref<1x128xf32, #tpu.memory_space<vmem>>, vector<1x128xf32>
    %58 = vector.shape_cast %57 : vector<1x128xf32> to vector<1x1x128xf32>
    %59 = vector.broadcast %58 : vector<1x1x128xf32> to vector<2x2x128xf32>
    %60 = arith.addf %56, %59 : vector<2x2x128xf32>
    %c0_73 = arith.constant 0 : index
    %c0_74 = arith.constant 0 : index
    %c0_75 = arith.constant 0 : index
    %c0_76 = arith.constant 0 : index
    %c0_77 = arith.constant 0 : index
    %61 = vector.load %arg5[%c0_73, %c0_74, %c0_75, %c0_76, %c0_77] : memref<1x1x2x2x128xf32, #tpu.memory_space<vmem>>, vector<1x1x2x2x128xf32>
    %62 = vector.shape_cast %61 : vector<1x1x2x2x128xf32> to vector<2x2x128xf32>
    %63 = vector.shape_cast %60 : vector<2x2x128xf32> to vector<1x1x2x2x128xf32>
    tpu.vector_store %arg5[%c0_73, %c0_74, %c0_75, %c0_76, %c0_77], %63 {strides = array<i32>} : memref<1x1x2x2x128xf32, #tpu.memory_space<vmem>>, vector<1x1x2x2x128xf32>,
    return
  }
  func.func @transform_0(%arg0: i32, %arg1: i32) -> (i32, i32, i32, i32, i32) {
    %c0_i32 = arith.constant 0 : i32
    %c0_i32_0 = arith.constant 0 : i32
    %c0_i32_1 = arith.constant 0 : i32
    %c0_i32_2 = arith.constant 0 : i32
    return %arg0, %arg1, %c0_i32, %c0_i32_0, %c0_i32_1 : i32, i32, i32, i32, i32
  }
  func.func @transform_1(%arg0: i32, %arg1: i32) -> (i32, i32, i32) {
    %c0_i32 = arith.constant 0 : i32
    %c0_i32_0 = arith.constant 0 : i32
    %c0_i32_1 = arith.constant 0 : i32
    %c0_i32_2 = arith.constant 0 : i32
    return %c0_i32, %c0_i32_0, %c0_i32_1 : i32, i32, i32
  }
  func.func @transform_2(%arg0: i32, %arg1: i32) -> (i32, i32) {
    %c0_i32 = arith.constant 0 : i32
    %c0_i32_0 = arith.constant 0 : i32
    %c0_i32_1 = arith.constant 0 : i32
    return %c0_i32, %c0_i32_0 : i32, i32
  }
  func.func @transform_3(%arg0: i32, %arg1: i32) -> (i32, i32, i32, i32, i32) {
    %c0_i32 = arith.constant 0 : i32
    %c0_i32_0 = arith.constant 0 : i32
    %c0_i32_1 = arith.constant 0 : i32
    %c0_i32_2 = arith.constant 0 : i32
    return %arg0, %arg1, %c0_i32, %c0_i32_0, %c0_i32_1 : i32, i32, i32, i32, i32
  }
}

module attributes {stable_mosaic.version = 11 : i64} {
  func.func @kernel(%arg0: i32, %arg1: i32, %arg2: memref<1x1x4x16x128xbf16, #tpu.memory_space<vmem>>, %arg3: memref<9x128x128xbf16, #tpu.memory_space<vmem>>, %arg4: memref<1x128xf32, #tpu.memory_space<vmem>>, %arg5: memref<1x1x1x1x128xf32, #tpu.memory_space<vmem>>) attributes {dimension_semantics = [#tpu.dimension_semantics<parallel>, #tpu.dimension_semantics<parallel>], iteration_bounds = array<i64: 2, 1>, scalar_prefetch = 0 : i64, scratch_operands = 0 : i64, tpu.core_type = #tpu.core_type<tc>, window_params = [{transform_indices = @transform_0, window_bounds = array<i64: 1, 1, 4, 16, 128>}, {pipeline_mode = #tpu.pipeline_mode<synchronous>, transform_indices = @transform_1, window_bounds = array<i64: 9, 128, 128>}, {pipeline_mode = #tpu.pipeline_mode<synchronous>, transform_indices = @transform_2, window_bounds = array<i64: 1, 128>}, {transform_indices = @transform_3, window_bounds = array<i64: 1, 1, 1, 1, 128>}]} {
    %c0 = arith.constant 0 : index
    %c0_0 = arith.constant 0 : index
    %c0_1 = arith.constant 0 : index
    %c0_2 = arith.constant 0 : index
    %c0_3 = arith.constant 0 : index
    %0 = vector.load %arg2[%c0, %c0_0, %c0_1, %c0_2, %c0_3] : memref<1x1x4x16x128xbf16, #tpu.memory_space<vmem>>, vector<1x1x1x8x128xbf16>
    %1 = vector.shape_cast %0 : vector<1x1x1x8x128xbf16> to vector<8x128xbf16>
    %c0_4 = arith.constant 0 : index
    %c0_5 = arith.constant 0 : index
    %c0_6 = arith.constant 0 : index
    %2 = vector.load %arg3[%c0_4, %c0_5, %c0_6] : memref<9x128x128xbf16, #tpu.memory_space<vmem>>, vector<1x128x128xbf16>
    %3 = vector.shape_cast %2 : vector<1x128x128xbf16> to vector<128x128xbf16>
    %cst = arith.constant dense<0.000000e+00> : vector<8x128xf32>
    %4 = tpu.matmul %1, %3, %cst {dimension_numbers = #tpu.dot_dimension_numbers<[1], [0], [0], [1], [0, 0, 1, 1], [], []>} : vector<8x128xbf16>, vector<128x128xbf16>, vector<8x128xf32> -> vector<8x128xf32>
    %c0_7 = arith.constant 0 : index
    %c0_8 = arith.constant 0 : index
    %c1 = arith.constant 1 : index
    %c0_9 = arith.constant 0 : index
    %c0_10 = arith.constant 0 : index
    %5 = vector.load %arg2[%c0_7, %c0_8, %c1, %c0_9, %c0_10] : memref<1x1x4x16x128xbf16, #tpu.memory_space<vmem>>, vector<1x1x1x8x128xbf16>
    %6 = vector.shape_cast %5 : vector<1x1x1x8x128xbf16> to vector<8x128xbf16>
    %c1_11 = arith.constant 1 : index
    %c0_12 = arith.constant 0 : index
    %c0_13 = arith.constant 0 : index
    %7 = vector.load %arg3[%c1_11, %c0_12, %c0_13] : memref<9x128x128xbf16, #tpu.memory_space<vmem>>, vector<1x128x128xbf16>
    %8 = vector.shape_cast %7 : vector<1x128x128xbf16> to vector<128x128xbf16>
    %cst_14 = arith.constant dense<0.000000e+00> : vector<8x128xf32>
    %9 = tpu.matmul %6, %8, %cst_14 {dimension_numbers = #tpu.dot_dimension_numbers<[1], [0], [0], [1], [0, 0, 1, 1], [], []>} : vector<8x128xbf16>, vector<128x128xbf16>, vector<8x128xf32> -> vector<8x128xf32>
    %10 = arith.addf %4, %9 : vector<8x128xf32>
    %c0_15 = arith.constant 0 : index
    %c0_16 = arith.constant 0 : index
    %c0_17 = arith.constant 0 : index
    %c0_18 = arith.constant 0 : index
    %c0_19 = arith.constant 0 : index
    %11 = vector.load %arg2[%c0_15, %c0_16, %c0_17, %c0_18, %c0_19] : memref<1x1x4x16x128xbf16, #tpu.memory_space<vmem>>, vector<1x1x1x8x128xbf16>
    %12 = vector.shape_cast %11 : vector<1x1x1x8x128xbf16> to vector<8x128xbf16>
    %c2 = arith.constant 2 : index
    %c0_20 = arith.constant 0 : index
    %c0_21 = arith.constant 0 : index
    %13 = vector.load %arg3[%c2, %c0_20, %c0_21] : memref<9x128x128xbf16, #tpu.memory_space<vmem>>, vector<1x128x128xbf16>
    %14 = vector.shape_cast %13 : vector<1x128x128xbf16> to vector<128x128xbf16>
    %cst_22 = arith.constant dense<0.000000e+00> : vector<8x128xf32>
    %15 = tpu.matmul %12, %14, %cst_22 {dimension_numbers = #tpu.dot_dimension_numbers<[1], [0], [0], [1], [0, 0, 1, 1], [], []>} : vector<8x128xbf16>, vector<128x128xbf16>, vector<8x128xf32> -> vector<8x128xf32>
    %c0_23 = arith.constant 0 : index
    %c0_24 = arith.constant 0 : index
    %c2_25 = arith.constant 2 : index
    %c0_26 = arith.constant 0 : index
    %c0_27 = arith.constant 0 : index
    %16 = vector.load %arg2[%c0_23, %c0_24, %c2_25, %c0_26, %c0_27] : memref<1x1x4x16x128xbf16, #tpu.memory_space<vmem>>, vector<1x1x1x8x128xbf16>
    %17 = vector.shape_cast %16 : vector<1x1x1x8x128xbf16> to vector<8x128xbf16>
    %c3 = arith.constant 3 : index
    %c0_28 = arith.constant 0 : index
    %c0_29 = arith.constant 0 : index
    %18 = vector.load %arg3[%c3, %c0_28, %c0_29] : memref<9x128x128xbf16, #tpu.memory_space<vmem>>, vector<1x128x128xbf16>
    %19 = vector.shape_cast %18 : vector<1x128x128xbf16> to vector<128x128xbf16>
    %cst_30 = arith.constant dense<0.000000e+00> : vector<8x128xf32>
    %20 = tpu.matmul %17, %19, %cst_30 {dimension_numbers = #tpu.dot_dimension_numbers<[1], [0], [0], [1], [0, 0, 1, 1], [], []>} : vector<8x128xbf16>, vector<128x128xbf16>, vector<8x128xf32> -> vector<8x128xf32>
    %21 = arith.addf %10, %20 : vector<8x128xf32>
    %c0_31 = arith.constant 0 : index
    %c0_32 = arith.constant 0 : index
    %c3_33 = arith.constant 3 : index
    %c0_34 = arith.constant 0 : index
    %c0_35 = arith.constant 0 : index
    %22 = vector.load %arg2[%c0_31, %c0_32, %c3_33, %c0_34, %c0_35] : memref<1x1x4x16x128xbf16, #tpu.memory_space<vmem>>, vector<1x1x1x8x128xbf16>
    %23 = vector.shape_cast %22 : vector<1x1x1x8x128xbf16> to vector<8x128xbf16>
    %c4 = arith.constant 4 : index
    %c0_36 = arith.constant 0 : index
    %c0_37 = arith.constant 0 : index
    %24 = vector.load %arg3[%c4, %c0_36, %c0_37] : memref<9x128x128xbf16, #tpu.memory_space<vmem>>, vector<1x128x128xbf16>
    %25 = vector.shape_cast %24 : vector<1x128x128xbf16> to vector<128x128xbf16>
    %cst_38 = arith.constant dense<0.000000e+00> : vector<8x128xf32>
    %26 = tpu.matmul %23, %25, %cst_38 {dimension_numbers = #tpu.dot_dimension_numbers<[1], [0], [0], [1], [0, 0, 1, 1], [], []>} : vector<8x128xbf16>, vector<128x128xbf16>, vector<8x128xf32> -> vector<8x128xf32>
    %27 = arith.addf %21, %26 : vector<8x128xf32>
    %c0_39 = arith.constant 0 : index
    %c0_40 = arith.constant 0 : index
    %c2_41 = arith.constant 2 : index
    %c0_42 = arith.constant 0 : index
    %c0_43 = arith.constant 0 : index
    %28 = vector.load %arg2[%c0_39, %c0_40, %c2_41, %c0_42, %c0_43] : memref<1x1x4x16x128xbf16, #tpu.memory_space<vmem>>, vector<1x1x1x8x128xbf16>
    %29 = vector.shape_cast %28 : vector<1x1x1x8x128xbf16> to vector<8x128xbf16>
    %c5 = arith.constant 5 : index
    %c0_44 = arith.constant 0 : index
    %c0_45 = arith.constant 0 : index
    %30 = vector.load %arg3[%c5, %c0_44, %c0_45] : memref<9x128x128xbf16, #tpu.memory_space<vmem>>, vector<1x128x128xbf16>
    %31 = vector.shape_cast %30 : vector<1x128x128xbf16> to vector<128x128xbf16>
    %cst_46 = arith.constant dense<0.000000e+00> : vector<8x128xf32>
    %32 = tpu.matmul %29, %31, %cst_46 {dimension_numbers = #tpu.dot_dimension_numbers<[1], [0], [0], [1], [0, 0, 1, 1], [], []>} : vector<8x128xbf16>, vector<128x128xbf16>, vector<8x128xf32> -> vector<8x128xf32>
    %33 = arith.addf %15, %32 : vector<8x128xf32>
    %c0_47 = arith.constant 0 : index
    %c0_48 = arith.constant 0 : index
    %c0_49 = arith.constant 0 : index
    %c8 = arith.constant 8 : index
    %c0_50 = arith.constant 0 : index
    %34 = vector.load %arg2[%c0_47, %c0_48, %c0_49, %c8, %c0_50] : memref<1x1x4x16x128xbf16, #tpu.memory_space<vmem>>, vector<1x1x1x8x128xbf16>
    %35 = vector.shape_cast %34 : vector<1x1x1x8x128xbf16> to vector<8x128xbf16>
    %c6 = arith.constant 6 : index
    %c0_51 = arith.constant 0 : index
    %c0_52 = arith.constant 0 : index
    %36 = vector.load %arg3[%c6, %c0_51, %c0_52] : memref<9x128x128xbf16, #tpu.memory_space<vmem>>, vector<1x128x128xbf16>
    %37 = vector.shape_cast %36 : vector<1x128x128xbf16> to vector<128x128xbf16>
    %cst_53 = arith.constant dense<0.000000e+00> : vector<8x128xf32>
    %38 = tpu.matmul %35, %37, %cst_53 {dimension_numbers = #tpu.dot_dimension_numbers<[1], [0], [0], [1], [0, 0, 1, 1], [], []>} : vector<8x128xbf16>, vector<128x128xbf16>, vector<8x128xf32> -> vector<8x128xf32>
    %39 = arith.addf %27, %38 : vector<8x128xf32>
    %c0_54 = arith.constant 0 : index
    %c0_55 = arith.constant 0 : index
    %c1_56 = arith.constant 1 : index
    %c8_57 = arith.constant 8 : index
    %c0_58 = arith.constant 0 : index
    %40 = vector.load %arg2[%c0_54, %c0_55, %c1_56, %c8_57, %c0_58] : memref<1x1x4x16x128xbf16, #tpu.memory_space<vmem>>, vector<1x1x1x8x128xbf16>
    %41 = vector.shape_cast %40 : vector<1x1x1x8x128xbf16> to vector<8x128xbf16>
    %c7 = arith.constant 7 : index
    %c0_59 = arith.constant 0 : index
    %c0_60 = arith.constant 0 : index
    %42 = vector.load %arg3[%c7, %c0_59, %c0_60] : memref<9x128x128xbf16, #tpu.memory_space<vmem>>, vector<1x128x128xbf16>
    %43 = vector.shape_cast %42 : vector<1x128x128xbf16> to vector<128x128xbf16>
    %cst_61 = arith.constant dense<0.000000e+00> : vector<8x128xf32>
    %44 = tpu.matmul %41, %43, %cst_61 {dimension_numbers = #tpu.dot_dimension_numbers<[1], [0], [0], [1], [0, 0, 1, 1], [], []>} : vector<8x128xbf16>, vector<128x128xbf16>, vector<8x128xf32> -> vector<8x128xf32>
    %45 = arith.addf %39, %44 : vector<8x128xf32>
    %c0_62 = arith.constant 0 : index
    %c0_63 = arith.constant 0 : index
    %c0_64 = arith.constant 0 : index
    %c8_65 = arith.constant 8 : index
    %c0_66 = arith.constant 0 : index
    %46 = vector.load %arg2[%c0_62, %c0_63, %c0_64, %c8_65, %c0_66] : memref<1x1x4x16x128xbf16, #tpu.memory_space<vmem>>, vector<1x1x1x8x128xbf16>
    %47 = vector.shape_cast %46 : vector<1x1x1x8x128xbf16> to vector<8x128xbf16>
    %c8_67 = arith.constant 8 : index
    %c0_68 = arith.constant 0 : index
    %c0_69 = arith.constant 0 : index
    %48 = vector.load %arg3[%c8_67, %c0_68, %c0_69] : memref<9x128x128xbf16, #tpu.memory_space<vmem>>, vector<1x128x128xbf16>
    %49 = vector.shape_cast %48 : vector<1x128x128xbf16> to vector<128x128xbf16>
    %cst_70 = arith.constant dense<0.000000e+00> : vector<8x128xf32>
    %50 = tpu.matmul %47, %49, %cst_70 {dimension_numbers = #tpu.dot_dimension_numbers<[1], [0], [0], [1], [0, 0, 1, 1], [], []>} : vector<8x128xbf16>, vector<128x128xbf16>, vector<8x128xf32> -> vector<8x128xf32>
    %51 = arith.addf %33, %50 : vector<8x128xf32>
    %52 = vector.shape_cast %45 : vector<8x128xf32> to vector<1x8x128xf32>
    %53 = vector.extract_strided_slice %52 {offsets = [0, 0, 0], sizes = [1, 1, 128], strides = [1, 1, 1]} : vector<1x8x128xf32> to vector<1x1x128xf32>
    %54 = vector.shape_cast %51 : vector<8x128xf32> to vector<1x8x128xf32>
    %55 = vector.extract_strided_slice %54 {offsets = [0, 1, 0], sizes = [1, 1, 128], strides = [1, 1, 1]} : vector<1x8x128xf32> to vector<1x1x128xf32>
    %56 = arith.addf %53, %55 : vector<1x1x128xf32>
    %c0_71 = arith.constant 0 : index
    %c0_72 = arith.constant 0 : index
    %57 = vector.load %arg4[%c0_71, %c0_72] : memref<1x128xf32, #tpu.memory_space<vmem>>, vector<1x128xf32>
    %58 = vector.shape_cast %57 : vector<1x128xf32> to vector<1x1x128xf32>
    %59 = arith.addf %56, %58 : vector<1x1x128xf32>
    %c0_73 = arith.constant 0 : index
    %c0_74 = arith.constant 0 : index
    %c0_75 = arith.constant 0 : index
    %c0_76 = arith.constant 0 : index
    %c0_77 = arith.constant 0 : index
    %60 = vector.load %arg5[%c0_73, %c0_74, %c0_75, %c0_76, %c0_77] : memref<1x1x1x1x128xf32, #tpu.memory_space<vmem>>, vector<1x1x1x1x128xf32>
    %61 = vector.shape_cast %60 : vector<1x1x1x1x128xf32> to vector<1x1x128xf32>
    %62 = vector.shape_cast %59 : vector<1x1x128xf32> to vector<1x1x1x1x128xf32>
    tpu.vector_store %arg5[%c0_73, %c0_74, %c0_75, %c0_76, %c0_77], %62 {strides = array<i32>} : memref<1x1x1x1x128xf32, #tpu.memory_space<vmem>>, vector<1x1x1x1x128xf32>,
    return
  }
  func.func @transform_0(%arg0: i32, %arg1: i32) -> (i32, i32, i32, i32, i32) {
    %c0_i32 = arith.constant 0 : i32
    %c0_i32_0 = arith.constant 0 : i32
    %c0_i32_1 = arith.constant 0 : i32
    %c0_i32_2 = arith.constant 0 : i32
    return %arg0, %arg1, %c0_i32, %c0_i32_0, %c0_i32_1 : i32, i32, i32, i32, i32
  }
  func.func @transform_1(%arg0: i32, %arg1: i32) -> (i32, i32, i32) {
    %c0_i32 = arith.constant 0 : i32
    %c0_i32_0 = arith.constant 0 : i32
    %c0_i32_1 = arith.constant 0 : i32
    %c0_i32_2 = arith.constant 0 : i32
    return %c0_i32, %c0_i32_0, %c0_i32_1 : i32, i32, i32
  }
  func.func @transform_2(%arg0: i32, %arg1: i32) -> (i32, i32) {
    %c0_i32 = arith.constant 0 : i32
    %c0_i32_0 = arith.constant 0 : i32
    %c0_i32_1 = arith.constant 0 : i32
    return %c0_i32, %c0_i32_0 : i32, i32
  }
  func.func @transform_3(%arg0: i32, %arg1: i32) -> (i32, i32, i32, i32, i32) {
    %c0_i32 = arith.constant 0 : i32
    %c0_i32_0 = arith.constant 0 : i32
    %c0_i32_1 = arith.constant 0 : i32
    %c0_i32_2 = arith.constant 0 : i32
    return %arg0, %arg1, %c0_i32, %c0_i32_0, %c0_i32_1 : i32, i32, i32, i32, i32
  }
}

module attributes {stable_mosaic.version = 11 : i64} {
  func.func @_pointwise_kernel(%arg0: i32, %arg1: i32, %arg2: memref<1x4x256xf32, #tpu.memory_space<vmem>>, %arg3: memref<128x4xbf16, #tpu.memory_space<vmem>>, %arg4: memref<128x1xf32, #tpu.memory_space<vmem>>, %arg5: memref<1x128x256xf32, #tpu.memory_space<vmem>>) attributes {dimension_semantics = [#tpu.dimension_semantics<parallel>, #tpu.dimension_semantics<parallel>], iteration_bounds = array<i64: 2, 1>, scalar_prefetch = 0 : i64, scratch_operands = 0 : i64, tpu.core_type = #tpu.core_type<tc>, window_params = [{transform_indices = @transform_0, window_bounds = array<i64: 1, 4, 256>}, {pipeline_mode = #tpu.pipeline_mode<synchronous>, transform_indices = @transform_1, window_bounds = array<i64: 128, 4>}, {pipeline_mode = #tpu.pipeline_mode<synchronous>, transform_indices = @transform_2, window_bounds = array<i64: 128, 1>}, {transform_indices = @transform_3, window_bounds = array<i64: 1, 128, 256>}]} {
    %c0 = arith.constant 0 : index
    %c0_0 = arith.constant 0 : index
    %c0_1 = arith.constant 0 : index
    %0 = vector.load %arg2[%c0, %c0_0, %c0_1] : memref<1x4x256xf32, #tpu.memory_space<vmem>>, vector<1x4x256xf32>
    %1 = vector.shape_cast %0 : vector<1x4x256xf32> to vector<4x256xf32>
    %2 = arith.truncf %1 : vector<4x256xf32> to vector<4x256xbf16>
    %c0_2 = arith.constant 0 : index
    %c0_3 = arith.constant 0 : index
    %3 = vector.load %arg3[%c0_2, %c0_3] : memref<128x4xbf16, #tpu.memory_space<vmem>>, vector<128x4xbf16>
    %cst = arith.constant dense<0.000000e+00> : vector<128x256xf32>
    %4 = tpu.matmul %3, %2, %cst {dimension_numbers = #tpu.dot_dimension_numbers<[1], [0], [0], [1], [0, 0, 1, 1], [], []>} : vector<128x4xbf16>, vector<4x256xbf16>, vector<128x256xf32> -> vector<128x256xf32>
    %c0_4 = arith.constant 0 : index
    %c0_5 = arith.constant 0 : index
    %5 = vector.load %arg4[%c0_4, %c0_5] : memref<128x1xf32, #tpu.memory_space<vmem>>, vector<128x1xf32>
    %6 = vector.broadcast %5 : vector<128x1xf32> to vector<128x256xf32>
    %7 = arith.addf %4, %6 : vector<128x256xf32>
    %c0_6 = arith.constant 0 : index
    %c0_7 = arith.constant 0 : index
    %c0_8 = arith.constant 0 : index
    %8 = vector.load %arg5[%c0_6, %c0_7, %c0_8] : memref<1x128x256xf32, #tpu.memory_space<vmem>>, vector<1x128x256xf32>
    %9 = vector.shape_cast %8 : vector<1x128x256xf32> to vector<128x256xf32>
    %10 = vector.shape_cast %7 : vector<128x256xf32> to vector<1x128x256xf32>
    tpu.vector_store %arg5[%c0_6, %c0_7, %c0_8], %10 {strides = array<i32>} : memref<1x128x256xf32, #tpu.memory_space<vmem>>, vector<1x128x256xf32>,
    return
  }
  func.func @transform_0(%arg0: i32, %arg1: i32) -> (i32, i32, i32) {
    %c0_i32 = arith.constant 0 : i32
    %c0_i32_0 = arith.constant 0 : i32
    return %arg0, %c0_i32, %arg1 : i32, i32, i32
  }
  func.func @transform_1(%arg0: i32, %arg1: i32) -> (i32, i32) {
    %c0_i32 = arith.constant 0 : i32
    %c0_i32_0 = arith.constant 0 : i32
    %c0_i32_1 = arith.constant 0 : i32
    return %c0_i32, %c0_i32_0 : i32, i32
  }
  func.func @transform_2(%arg0: i32, %arg1: i32) -> (i32, i32) {
    %c0_i32 = arith.constant 0 : i32
    %c0_i32_0 = arith.constant 0 : i32
    %c0_i32_1 = arith.constant 0 : i32
    return %c0_i32, %c0_i32_0 : i32, i32
  }
  func.func @transform_3(%arg0: i32, %arg1: i32) -> (i32, i32, i32) {
    %c0_i32 = arith.constant 0 : i32
    %c0_i32_0 = arith.constant 0 : i32
    return %arg0, %c0_i32, %arg1 : i32, i32, i32
  }
}

module attributes {stable_mosaic.version = 11 : i64} {
  func.func @_pointwise_kernel(%arg0: i32, %arg1: i32, %arg2: memref<1x8x64xf32, #tpu.memory_space<vmem>>, %arg3: memref<128x8xbf16, #tpu.memory_space<vmem>>, %arg4: memref<128x1xf32, #tpu.memory_space<vmem>>, %arg5: memref<1x128x64xf32, #tpu.memory_space<vmem>>) attributes {dimension_semantics = [#tpu.dimension_semantics<parallel>, #tpu.dimension_semantics<parallel>], iteration_bounds = array<i64: 2, 1>, scalar_prefetch = 0 : i64, scratch_operands = 0 : i64, tpu.core_type = #tpu.core_type<tc>, window_params = [{transform_indices = @transform_0, window_bounds = array<i64: 1, 8, 64>}, {pipeline_mode = #tpu.pipeline_mode<synchronous>, transform_indices = @transform_1, window_bounds = array<i64: 128, 8>}, {pipeline_mode = #tpu.pipeline_mode<synchronous>, transform_indices = @transform_2, window_bounds = array<i64: 128, 1>}, {transform_indices = @transform_3, window_bounds = array<i64: 1, 128, 64>}]} {
    %c0 = arith.constant 0 : index
    %c0_0 = arith.constant 0 : index
    %c0_1 = arith.constant 0 : index
    %0 = vector.load %arg2[%c0, %c0_0, %c0_1] : memref<1x8x64xf32, #tpu.memory_space<vmem>>, vector<1x8x64xf32>
    %1 = vector.shape_cast %0 : vector<1x8x64xf32> to vector<8x64xf32>
    %2 = arith.truncf %1 : vector<8x64xf32> to vector<8x64xbf16>
    %c0_2 = arith.constant 0 : index
    %c0_3 = arith.constant 0 : index
    %3 = vector.load %arg3[%c0_2, %c0_3] : memref<128x8xbf16, #tpu.memory_space<vmem>>, vector<128x8xbf16>
    %cst = arith.constant dense<0.000000e+00> : vector<128x64xf32>
    %4 = tpu.matmul %3, %2, %cst {dimension_numbers = #tpu.dot_dimension_numbers<[1], [0], [0], [1], [0, 0, 1, 1], [], []>} : vector<128x8xbf16>, vector<8x64xbf16>, vector<128x64xf32> -> vector<128x64xf32>
    %c0_4 = arith.constant 0 : index
    %c0_5 = arith.constant 0 : index
    %5 = vector.load %arg4[%c0_4, %c0_5] : memref<128x1xf32, #tpu.memory_space<vmem>>, vector<128x1xf32>
    %6 = vector.broadcast %5 : vector<128x1xf32> to vector<128x64xf32>
    %7 = arith.addf %4, %6 : vector<128x64xf32>
    %c0_6 = arith.constant 0 : index
    %c0_7 = arith.constant 0 : index
    %c0_8 = arith.constant 0 : index
    %8 = vector.load %arg5[%c0_6, %c0_7, %c0_8] : memref<1x128x64xf32, #tpu.memory_space<vmem>>, vector<1x128x64xf32>
    %9 = vector.shape_cast %8 : vector<1x128x64xf32> to vector<128x64xf32>
    %10 = vector.shape_cast %7 : vector<128x64xf32> to vector<1x128x64xf32>
    tpu.vector_store %arg5[%c0_6, %c0_7, %c0_8], %10 {strides = array<i32>} : memref<1x128x64xf32, #tpu.memory_space<vmem>>, vector<1x128x64xf32>,
    return
  }
  func.func @transform_0(%arg0: i32, %arg1: i32) -> (i32, i32, i32) {
    %c0_i32 = arith.constant 0 : i32
    %c0_i32_0 = arith.constant 0 : i32
    return %arg0, %c0_i32, %arg1 : i32, i32, i32
  }
  func.func @transform_1(%arg0: i32, %arg1: i32) -> (i32, i32) {
    %c0_i32 = arith.constant 0 : i32
    %c0_i32_0 = arith.constant 0 : i32
    %c0_i32_1 = arith.constant 0 : i32
    return %c0_i32, %c0_i32_0 : i32, i32
  }
  func.func @transform_2(%arg0: i32, %arg1: i32) -> (i32, i32) {
    %c0_i32 = arith.constant 0 : i32
    %c0_i32_0 = arith.constant 0 : i32
    %c0_i32_1 = arith.constant 0 : i32
    return %c0_i32, %c0_i32_0 : i32, i32
  }
  func.func @transform_3(%arg0: i32, %arg1: i32) -> (i32, i32, i32) {
    %c0_i32 = arith.constant 0 : i32
    %c0_i32_0 = arith.constant 0 : i32
    return %arg0, %c0_i32, %arg1 : i32, i32, i32
  }
}

module attributes {stable_mosaic.version = 11 : i64} {
  func.func @_pointwise_kernel(%arg0: i32, %arg1: i32, %arg2: memref<1x16x16xf32, #tpu.memory_space<vmem>>, %arg3: memref<128x16xbf16, #tpu.memory_space<vmem>>, %arg4: memref<128x1xf32, #tpu.memory_space<vmem>>, %arg5: memref<1x128x16xf32, #tpu.memory_space<vmem>>) attributes {dimension_semantics = [#tpu.dimension_semantics<parallel>, #tpu.dimension_semantics<parallel>], iteration_bounds = array<i64: 2, 1>, scalar_prefetch = 0 : i64, scratch_operands = 0 : i64, tpu.core_type = #tpu.core_type<tc>, window_params = [{transform_indices = @transform_0, window_bounds = array<i64: 1, 16, 16>}, {pipeline_mode = #tpu.pipeline_mode<synchronous>, transform_indices = @transform_1, window_bounds = array<i64: 128, 16>}, {pipeline_mode = #tpu.pipeline_mode<synchronous>, transform_indices = @transform_2, window_bounds = array<i64: 128, 1>}, {transform_indices = @transform_3, window_bounds = array<i64: 1, 128, 16>}]} {
    %c0 = arith.constant 0 : index
    %c0_0 = arith.constant 0 : index
    %c0_1 = arith.constant 0 : index
    %0 = vector.load %arg2[%c0, %c0_0, %c0_1] : memref<1x16x16xf32, #tpu.memory_space<vmem>>, vector<1x16x16xf32>
    %1 = vector.shape_cast %0 : vector<1x16x16xf32> to vector<16x16xf32>
    %2 = arith.truncf %1 : vector<16x16xf32> to vector<16x16xbf16>
    %c0_2 = arith.constant 0 : index
    %c0_3 = arith.constant 0 : index
    %3 = vector.load %arg3[%c0_2, %c0_3] : memref<128x16xbf16, #tpu.memory_space<vmem>>, vector<128x16xbf16>
    %cst = arith.constant dense<0.000000e+00> : vector<128x16xf32>
    %4 = tpu.matmul %3, %2, %cst {dimension_numbers = #tpu.dot_dimension_numbers<[1], [0], [0], [1], [0, 0, 1, 1], [], []>} : vector<128x16xbf16>, vector<16x16xbf16>, vector<128x16xf32> -> vector<128x16xf32>
    %c0_4 = arith.constant 0 : index
    %c0_5 = arith.constant 0 : index
    %5 = vector.load %arg4[%c0_4, %c0_5] : memref<128x1xf32, #tpu.memory_space<vmem>>, vector<128x1xf32>
    %6 = vector.broadcast %5 : vector<128x1xf32> to vector<128x16xf32>
    %7 = arith.addf %4, %6 : vector<128x16xf32>
    %c0_6 = arith.constant 0 : index
    %c0_7 = arith.constant 0 : index
    %c0_8 = arith.constant 0 : index
    %8 = vector.load %arg5[%c0_6, %c0_7, %c0_8] : memref<1x128x16xf32, #tpu.memory_space<vmem>>, vector<1x128x16xf32>
    %9 = vector.shape_cast %8 : vector<1x128x16xf32> to vector<128x16xf32>
    %10 = vector.shape_cast %7 : vector<128x16xf32> to vector<1x128x16xf32>
    tpu.vector_store %arg5[%c0_6, %c0_7, %c0_8], %10 {strides = array<i32>} : memref<1x128x16xf32, #tpu.memory_space<vmem>>, vector<1x128x16xf32>,
    return
  }
  func.func @transform_0(%arg0: i32, %arg1: i32) -> (i32, i32, i32) {
    %c0_i32 = arith.constant 0 : i32
    %c0_i32_0 = arith.constant 0 : i32
    return %arg0, %c0_i32, %arg1 : i32, i32, i32
  }
  func.func @transform_1(%arg0: i32, %arg1: i32) -> (i32, i32) {
    %c0_i32 = arith.constant 0 : i32
    %c0_i32_0 = arith.constant 0 : i32
    %c0_i32_1 = arith.constant 0 : i32
    return %c0_i32, %c0_i32_0 : i32, i32
  }
  func.func @transform_2(%arg0: i32, %arg1: i32) -> (i32, i32) {
    %c0_i32 = arith.constant 0 : i32
    %c0_i32_0 = arith.constant 0 : i32
    %c0_i32_1 = arith.constant 0 : i32
    return %c0_i32, %c0_i32_0 : i32, i32
  }
  func.func @transform_3(%arg0: i32, %arg1: i32) -> (i32, i32, i32) {
    %c0_i32 = arith.constant 0 : i32
    %c0_i32_0 = arith.constant 0 : i32
    return %arg0, %c0_i32, %arg1 : i32, i32, i32
  }
}

</mosaic_0001>

<bundles_post_ra>
// kernel: fpn_forward.8
= control target key start
LH: loop header
LB: loop body
LE: loop exit
PB: predicated region body
PF: predicated region fallthrough
CT: control target
= control target key end

     0   :  { %8 = vsyncpa [#allocation3], 0  ;;  %s1132_s12 = smov 0   ;;  %s1134_s13 = smov 0   ;;  %s1248_s0 = inlined_call_operand.vmem [shape: bf16[2,1,4,24,16], index: 0, kind: input, shape index: {}]   ;;  %s1249_s1 = inlined_call_operand.vmem [shape: bf16[9,16,128], index: 1, kind: input, shape index: {}]   ;;  %s1250_s2 = inlined_call_operand.hbm [shape: f32[1,128], index: 2, kind: input, shape index: {}]   ;;  %s1251_s3 = inlined_call_operand.vmem [shape: f32[2,1,2,2,128], index: 3, kind: output, shape index: {}]  }
   0x1   :  { %s1136_s14 = smov 0  }
   0x2 LB: > { %s868_s15 = sadd.s32 4294967295, %s1107_s14   ;;  %s26_s16 = sadd.s32 1, %s1103_s13  ;;  %s1107_s14 = sphi %s1136_s14, %s14_s14   ;;  %s1103_s13 = sphi %s1134_s13, %s1255_s13   ;;  %s1099_s12 = sphi %s1132_s12, %s1254_s12  }
   0x3   : > { %p28_p0 = scmp.ge.s32.totalorder %s26_s16, 2  ;;  %p870_p1 = scmp.ge.s32.totalorder %s1107_s14, 1 }
   0x4   : > { %p129_p2 = scmp.lt.s32.totalorder %s1107_s14, 3  ;;  %p1157_p4 = scmp.eq.s32.totalorder %s868_s15, 0 }
   0x5   : > { %s1257_s16 = smov (%p28_p0, %s26_s16), 0  ;;  %s1109_s19 = smov [#allocation2]  }
   0x6   : > { %p1153_p3 = pnand %p870_p1, %p129_p2  ;;  %s145_s20 = sshll.u32 %s1109_s19, 4  ;;  %s146_s20 = int_to_ptr.vmem [resolvable:$true] %s145_s20 }
   0x7   : > { %s1066_s21 = scalar_lea.vmem %s146_s20, 16  ;;  %s1073_s22 = scalar_lea.vmem %s146_s20, 32 }
   0x8   : > { %p1007_p5 = pneg %p1153_p3  ;;  %p1067_p8 = scmp.ne.s32.totalorder %s146_s20, %s1066_s21 }
   0x9   : > { %p1074_p11 = scmp.lt.s32.totalorder %s146_s20, %s146_s20  ;;  %p1075_p12 = scmp.lt.s32.totalorder %s1073_s22, %s1066_s21 }
   0xa   : > { %p1008_p6 = pnand %p1157_p4, %p1007_p5 }
   0xb   : > { %p1076_p13 = por %p1075_p12, %p1074_p11 }
   0xc   : > { %p1057_p7 = pneg %p1008_p6 }
   0xe   : > { %p1069_p9 = pnand %p1067_p8, %p1057_p7 }
  0x10   : > { %p1070_p10 = pneg %p1069_p9 }
  0x12   : > { %p1077_p0 = pnand %p1076_p13, %p1070_p10 }
  0x14   : > { %1080 = shalt.err (!%p1077_p0)
}
  0x15   : > { %1010 = dma.hbm_to_vmem [thread:$0]  (!%p1008_p6), %s1250_s2, 16, %s146_s20, [#allocation3]  }
  0x16   : > { %170 = sbr.rel (%p1153_p3) target bundleno = 273 (0x111), region = 32 }
  0x1b   : > { %1094 = dma.done.wait (%p1157_p4), [#allocation3], 16  }
  0x1c   : > { %1096 = vsyncadd (%p1157_p4), [#allocation3], 4294967280  ;;  %p202_p1 = scmp.lt.s32.totalorder %s1099_s12, 1  ;;  %v1110_v0 = vmov 0.0   ;;  %vm1111_vm0 = vmmov 0   ;;  %v1040_v1 = vld [vmem:[%s1249_s1 + $0x8] sm:$0xff]  }
  0x1d   : > { %948 = vmatprep.subr.bf16.mxu0 %v1110_v0  ;;  %954 = vmatprep.subr.bf16.mxu1 %v1110_v0  ;;  %v1041_v2 = vld [vmem:[%s1249_s1] sm:$0xff]   ;;  %vm242_vm1 = vcmask 130048   ;;  %v1044_v5 = vld [vmem:[%s1249_s1 + $0x18] sm:$0xff]   ;;  %v1048_v9 = vld [vmem:[%s1249_s1 + $0x28] sm:$0xff]  }
  0x1e   : > { %950 = vmatprep.mubr.msk.bf16.mxu0 %vm1111_vm0, %v1110_v0  ;;  %956 = vmatprep.mubr.msk.bf16.mxu1 %vm1111_vm0, %v1110_v0  ;;  %s1259_s12 = smov (!%p202_p1, %s1099_s12), 1  ;;  %v1045_v6 = vld [vmem:[%s1249_s1 + $0x20] sm:$0xff]   ;;  %v1049_v10 = vld [vmem:[%s1249_s1 + $0x10] sm:$0xff]   ;;  %v1051_v12 = vld [vmem:[%s1249_s1 + $0x38] sm:$0xff]  }
  0x1f   : > { %s1002_s25 = smul.u32 48, %s1259_s12  ;;  %949 = vmatpush3.bf16.msra.mxu0 %v1040_v1  ;;  %955 = vmatpush3.bf16.msra.mxu1 %v1041_v2  ;;  %v1050_v11 = vld [vmem:[%s1249_s1 + $0x30] sm:$0xff]   ;;  %v1053_v14 = vld [vmem:[%s1249_s1 + $0x40] sm:$0xff]   ;;  %s929_s24 = sshll.u32 %s1259_s12, 2 }
  0x20   : > { %960 = vmatprep.subr.bf16.mxu0 %v1110_v0  ;;  %966 = vmatprep.subr.bf16.mxu1 %v1110_v0  ;;  %v926_v63 = vld [vmem:[#allocation2] ss:$0 sm:$0xff]  ;;  %s219_s27 = scalar_lea.vmem %s1251_s3, %s929_s24 }
  0x21   : > { %s1184_s28 = scalar_lea.vmem %s1248_s0, %s1002_s25 }
  0x22   : > { %v1042_v3 = vld [vmem:[%s1184_s28 + $0xc] sm:$0xff]   ;;  %v1043_v4 = vld [vmem:[%s1184_s28] sm:$0xff]   ;;  %v1046_v7 = vld [vmem:[%s1184_s28 + $0x18] sm:$0xff]  }
  0x23   : > { %951 = vmatmul.mubr.msk.bf16.vlgmr.msra.gmra.mxu0 %vm242_vm1, %v1042_v3  ;;  %957 = vmatmul.mubr.msk.bf16.vlgmr.msra.gmra.mxu1 %vm242_vm1, %v1043_v4  ;;  %v1047_v8 = vld [vmem:[%s1184_s28 + $0x24] sm:$0xff]   ;;  %v1054_v15 = vld [vmem:[%s1184_s28 + $0x10] sm:$0xff]  }
  0x24   : > { %961 = vmatpush3.bf16.msra.mxu0 %v1044_v5  ;;  %967 = vmatpush3.bf16.msra.mxu1 %v1045_v6  ;;  %v1052_v13 = vld [vmem:[%s1184_s28 + $0x4] sm:$0xff]  }
  0x25   : > { %962 = vmatprep.mubr.msk.bf16.mxu0 %vm1111_vm0, %v1110_v0  ;;  %968 = vmatprep.mubr.msk.bf16.mxu1 %vm1111_vm0, %v1110_v0 }
  0x26   : > { %972 = vmatprep.subr.bf16.mxu0 %v1110_v0  ;;  %978 = vmatprep.subr.bf16.mxu1 %v1110_v0 }
  0x2b   : > { %963 = vmatmul.mubr.msk.bf16.vlgmr.msra.gmra.mxu0 %vm242_vm1, %v1046_v7  ;;  %969 = vmatmul.mubr.msk.bf16.vlgmr.msra.gmra.mxu1 %vm242_vm1, %v1047_v8 }
  0x2c   : > { %973 = vmatpush3.bf16.msra.mxu0 %v1048_v9  ;;  %979 = vmatpush3.bf16.msra.mxu1 %v1049_v10 }
  0x2d   : > { %974 = vmatprep.mubr.msk.bf16.mxu0 %vm1111_vm0, %v1110_v0  ;;  %980 = vmatprep.mubr.msk.bf16.mxu1 %vm1111_vm0, %v1110_v0 }
  0x2e   : > { %984 = vmatprep.subr.bf16.mxu0 %v1110_v0  ;;  %990 = vmatprep.subr.bf16.mxu1 %v1110_v0 }
  0x33   : > { %975 = vmatmul.mubr.msk.bf16.vlgmr.msra.gmra.mxu0 %vm242_vm1, %v1046_v7  ;;  %981 = vmatmul.mubr.msk.bf16.vlgmr.msra.gmra.mxu1 %vm242_vm1, %v1043_v4 }
  0x34   : > { %985 = vmatpush3.bf16.msra.mxu0 %v1050_v11  ;;  %986 = vmatprep.mubr.msk.bf16.mxu0 %vm1111_vm0, %v1110_v0 }
  0x35   : > { %991 = vmatpush3.bf16.msra.mxu1 %v1051_v12  ;;  %996 = vmatprep.subr.bf16.mxu0 %v1110_v0 }
  0x36   : > { %992 = vmatprep.mubr.msk.bf16.mxu1 %vm1111_vm0, %v1110_v0 }
  0x3b   : > { %987 = vmatmul.mubr.msk.bf16.vlgmr.msra.gmra.mxu0 %vm242_vm1, %v1052_v13  ;;  %993 = vmatmul.mubr.msk.bf16.vlgmr.msra.gmra.mxu1 %vm242_vm1, %v1054_v15 }
  0x3c   : > { %997 = vmatpush3.bf16.msra.mxu0 %v1053_v14  ;;  %998 = vmatprep.mubr.msk.bf16.mxu0 %vm1111_vm0, %v1110_v0 }
  0x43   : > { %999 = vmatmul.mubr.msk.bf16.vlgmr.msra.gmra.mxu0 %vm242_vm1, %v1052_v13 }
  0xe3   : > { %v280_v16 = vpop.f32.mrf.mxu0  ;;  %v335_v17 = vpop.f32.mrf.mxu1 }
  0xe4   : > { %v336_v39 = vadd.f32 %v335_v17, %v280_v16 }
  0xe5   : > { %v952_v18 = vpop.f32.mrf.mxu0  ;;  %v958_v19 = vpop.f32.mrf.mxu1 }
  0xe7   : > { %v283_v20 = vpop.f32.mrf.mxu0  ;;  %v338_v21 = vpop.f32.mrf.mxu1 }
  0xe8   : > { %v339_v45 = vadd.f32 %v338_v21, %v283_v20 }
  0xe9   : > { %v953_v22 = vpop.f32.mrf.mxu0  ;;  %v959_v23 = vpop.f32.mrf.mxu1 }
  0xeb   : > { %v399_v24 = vpop.f32.mrf.mxu0  ;;  %v462_v25 = vpop.f32.mrf.mxu1 }
  0xec   : > { %v406_v42 = vadd.f32 %v399_v24, %v336_v39 }
  0xed   : > { %v964_v26 = vpop.f32.mrf.mxu0  ;;  %v970_v27 = vpop.f32.mrf.mxu1 }
  0xee   : > { %v469_v48 = vadd.f32 %v462_v25, %v406_v42 }
  0xef   : > { %v402_v28 = vpop.f32.mrf.mxu0  ;;  %v465_v29 = vpop.f32.mrf.mxu1 }
  0xf0   : > { %v407_v49 = vadd.f32 %v402_v28, %v339_v45 }
  0xf1   : > { %v965_v30 = vpop.f32.mrf.mxu0  ;;  %v971_v31 = vpop.f32.mrf.mxu1 }
  0xf2   : > { %v470_v56 = vadd.f32 %v465_v29, %v407_v49 }
  0xf3   : > { %v514_v32 = vpop.f32.mrf.mxu0  ;;  %v561_v33 = vpop.f32.mrf.mxu1 }
  0xf4   : > { %v562_v52 = vadd.f32 %v561_v33, %v514_v32 }
  0xf5   : > { %v976_v34 = vpop.f32.mrf.mxu0  ;;  %v982_v35 = vpop.f32.mrf.mxu1 }
  0xf7   : > { %v517_v36 = vpop.f32.mrf.mxu0  ;;  %v564_v37 = vpop.f32.mrf.mxu1 }
  0xf8   : > { %v565_v59 = vadd.f32 %v564_v37, %v517_v36 }
  0xf9   : > { %v977_v38 = vpop.f32.mrf.mxu0  ;;  %v983_v40 = vpop.f32.mrf.mxu1 }
  0xfb   : > { %v621_v41 = vpop.f32.mrf.mxu0  ;;  %v683_v43 = vpop.f32.mrf.mxu1 }
  0xfc   : > { %v628_v53 = vadd.f32 %v621_v41, %v469_v48 }
  0xfd   : > { %v988_v44 = vpop.f32.mrf.mxu0  ;;  %v994_v46 = vpop.f32.mrf.mxu1 }
  0xfe   : > { %v690_v60 = vadd.f32 %v683_v43, %v628_v53 }
  0xff   : > { %v624_v47 = vpop.f32.mrf.mxu0  ;;  %v686_v50 = vpop.f32.mrf.mxu1 }
 0x100   : > { %v629_v61 = vadd.f32 %v624_v47, %v470_v56 }
 0x101   : > { %v989_v51 = vpop.f32.mrf.mxu0  ;;  %v995_v54 = vpop.f32.mrf.mxu1 }
 0x102   : > { %v691_v4 = vadd.f32 %v686_v50, %v629_v61 }
 0x103   : > { %v735_v55 = vpop.f32.mrf.mxu0 }
 0x104   : > { %v742_v57 = vadd.f32 %v735_v55, %v562_v52 }
 0x105   : > { %v1000_v58 = vpop.f32.mrf.mxu0 }
 0x106   : > { %v746_v62 = vrot.slane %v742_v57, 1 }
 0x107   : > { %v738_v0 = vpop.f32.mrf.mxu0 }
 0x108   : > { %v750_v1 = vadd.f32 %v746_v62, %v690_v60  ;;  %v743_v2 = vadd.f32 %v738_v0, %v565_v59 }
 0x109   : > { %v1001_v3 = vpop.f32.mrf.mxu0 }
 0x10a   : > { %v759_v5 = vadd.f32 %v926_v63, %v750_v1  ;;  %v747_v6 = vrot.slane %v743_v2, 1 }
 0x10c   : > { %761 = vst [vmem:[%s219_s27] sm:$0x3] %v759_v5  ;;  %v751_v7 = vadd.f32 %v747_v6, %v691_v4 }
 0x10e   : > { %v760_v8 = vadd.f32 %v926_v63, %v751_v7 }
 0x110   : > { %762 = vst [vmem:[%s219_s27 + $0x2] sm:$0x3] %v760_v8 }
 0x111 PF: > { %s14_s14 = sadd.s32 1, %s1107_s14   ;;  %s1254_s12 = smov %s1103_s13 }
 0x112   : > { %p11_p2 = scmp.ge.s32.totalorder %s14_s14, 4   ;;  %s1255_s13 = smov %s1257_s16 }
 0x114   :  { %13 = sbr.rel (!%p11_p2) target bundleno = 2 (0x2), region = 78 }
 0x119   :  { %792 = vsyncpa [#allocation3], 1 }
 0x11a   :  { %794 = vsyncpa [#allocation3 + $0x1], 1 }

// kernel: fpn_forward.9
= control target key start
LH: loop header
LB: loop body
LE: loop exit
PB: predicated region body
PF: predicated region fallthrough
CT: control target
= control target key end

     0   :  { %8 = vsyncpa [#allocation3], 0  ;;  %s2375_s0 = inlined_call_operand.vmem [shape: bf16[2,1,4,16,128], index: 0, kind: input, shape index: {}]   ;;  %s2376_s1 = inlined_call_operand.vmem [shape: bf16[9,128,128], index: 1, kind: input, shape index: {}]   ;;  %s2377_s2 = inlined_call_operand.vmem [shape: f32[1,128], index: 2, kind: input, shape index: {}]   ;;  %s2378_s3 = inlined_call_operand.hbm [shape: f32[2,1,1,1,128], index: 3, kind: output, shape index: {}]  }
   0x1   :  { %10 = vsyncpa [#allocation3 + $0x1], 0  ;;  %s1955_s12 = smov 0   ;;  %s1957_s13 = smov 0  }
   0x2   :  { %s1959_s14 = smov 0   ;;  %s1961_s15 = smov 0  }
   0x3   :  { %s1963_s16 = smov 0   ;;  %s1965_s17 = smov 0  }
   0x4 LB: > { %s1249_s18 = sadd.s32 4294967295, %s1930_s17   ;;  %s1250_s19 = sadd.s32 4294967294, %s1930_s17   ;;  %s1930_s17 = sphi %s1965_s17, %s16_s17   ;;  %s1926_s16 = sphi %s1963_s16, %s2385_s16   ;;  %s1922_s15 = sphi %s1961_s15, %s2384_s15   ;;  %s1918_s14 = sphi %s1959_s14, %s2383_s14   ;;  %s1914_s13 = sphi %s1957_s13, %s2382_s13   ;;  %s1910_s12 = sphi %s1955_s12, %s2381_s12  }
   0x5   : > { %s28_s20 = sadd.s32 1, %s1926_s16  ;;  %s107_s21 = sadd.s32 1, %s1918_s14 }
   0x6   : > { %p30_p0 = scmp.ge.s32.totalorder %s28_s20, 2  ;;  %p117_p1 = scmp.ne.s32.totalorder %s1918_s14, %s1914_s13 }
   0x7   : > { %p118_p2 = scmp.eq.s32.totalorder %s1249_s18, 1  ;;  %p123_p3 = scmp.ne.s32.totalorder %s1914_s13, %s1910_s12 }
   0x8   : > { %s2387_s20 = smov (%p30_p0, %s28_s20), 0  ;;  %p124_p5 = scmp.eq.s32.totalorder %s1250_s19, 1 }
   0x9   : > { %p1995_p4 = por %p118_p2, %p117_p1  ;;  %s102_s23 = ssub.s32 %s1926_s16, %s2387_s20 }
   0xa   : > { %p1253_p6 = scmp.ge.s32.totalorder %s1930_s17, 1  ;;  %p105_p7 = scmp.eq.s32.totalorder %s102_s23, 0 }
   0xb   : > { %p2002_p8 = por %p124_p5, %p123_p3  ;;  %p160_p9 = scmp.lt.s32.totalorder %s1930_s17, 3 }
   0xc   : > { %s2008_s25 = scalar_select %p105_p7, %s1918_s14, %s107_s21  }
   0xd   : > { %p161_p10 = pnand %p1253_p6, %p160_p9 }
   0xe   : > { %p187_p11 = scmp.lt.s32.totalorder (!%p161_p10), %s1922_s15, 1  ;;  %s185_s28 = sand.u32 (!%p161_p10), 1, %s1914_s13  }
   0xf   : > { %164 = sbr.rel (%p161_p10) target bundleno = 395 (0x18b), region = 32  ;;  %s186_s5 = scalar_lea.vmem (!%p161_p10), [#allocation2], %s185_s28 }
  0x10   : > { %s1176_s6 = sshll.u32 (!%p161_p10), %s186_s5, 4  ;;  %s1934_s11 = smov (!%p161_p10), [#allocation2]   ;;  %s1177_s6 = int_to_ptr.vmem [resolvable:$true] %s1176_s6 }
  0x11   : > { %s1854_s10 = scalar_lea.vmem (!%p161_p10), %s1177_s6, 16  ;;  %s1858_s18 = sshll.u32 (!%p161_p10), %s1934_s11, 4  ;;  %s1859_s18 = int_to_ptr.vmem [resolvable:$false] %s1858_s18 }
  0x12   : > { %p1855_p12 = scmp.ne.s32.totalorder (!%p161_p10), %s1177_s6, %s1854_s10  ;;  %p1861_p1 = scmp.lt.s32.totalorder (!%p161_p10), %s1177_s6, %s1859_s18 }
  0x14   : > { %v1782_v0 = vld [vmem:[%s2376_s1 + $0x78] sm:$0xff]   ;;  %v1932_v1 = vmov 0.0   ;;  %v1784_v3 = vld [vmem:[%s2376_s1 + $0x70] sm:$0xff]   ;;  %vm1933_vm0 = vmmov 0   ;;  %v1786_v5 = vld [vmem:[%s2376_s1 + $0x68] sm:$0xff]   ;;  %s188_s4 = scalar_select %p187_p11, %s1922_s15, 1 }
  0x15   : > { %1545 = vmatprep.subr.bf16.mxu0 %v1932_v1  ;;  %1565 = vmatprep.subr.bf16.mxu1 %v1932_v1  ;;  %v1783_v2 = vld [vmem:[%s2376_s1 + $0x38] sm:$0xff]   ;;  %v1785_v4 = vld [vmem:[%s2376_s1 + $0x30] sm:$0xff]   ;;  %v1787_v6 = vld [vmem:[%s2376_s1 + $0x28] sm:$0xff]   ;;  %p1856_p13 = pnand %p1855_p12, %p1995_p4 }
  0x16   : > { %1546 = vmatpush3.bf16.msra.mxu0 %v1782_v0  ;;  %1561 = vmatprep.mubr.msk.bf16.mxu0 %vm1933_vm0, %v1932_v1  ;;  %v1788_v7 = vld [vmem:[%s2376_s1 + $0x60] sm:$0xff]   ;;  %v1790_v9 = vld [vmem:[%s2376_s1 + $0x58] sm:$0xff]   ;;  %v1792_v11 = vld [vmem:[%s2376_s1 + $0x50] sm:$0xff]   ;;  %s1463_s9 = sshll.u32 %s188_s4, 5  ;;  %s1460_s4 = sshll.u32 %s1922_s15, 4 }
  0x17   : > { %1566 = vmatpush3.bf16.msra.mxu1 %v1783_v2  ;;  %1547 = vmatprep.subr.bf16.mxu0 %v1932_v1  ;;  %v1789_v8 = vld [vmem:[%s2376_s1 + $0x20] sm:$0xff]   ;;  %v1791_v10 = vld [vmem:[%s2376_s1 + $0x18] sm:$0xff]   ;;  %v1793_v12 = vld [vmem:[%s2376_s1 + $0x10] sm:$0xff]   ;;  %s2075_s21 = scalar_lea.vmem %s2375_s0, %s1463_s9  ;;  %s1174_s8 = scalar_lea.hbm %s2378_s3, %s1460_s4 }
  0x18   : > { %1567 = vmatprep.subr.bf16.mxu1 %v1932_v1  ;;  %1581 = vmatprep.mubr.msk.bf16.mxu1 %vm1933_vm0, %v1932_v1  ;;  %v1794_v13 = vld [vmem:[%s2376_s1 + $0x48] sm:$0xff]   ;;  %v1796_v15 = vld [vmem:[%s2376_s1 + $0x40] sm:$0xff]   ;;  %v1798_v19 = vld [vmem:[%s2376_s1 + $0xf8] sm:$0xff]   ;;  %s1163_s9 = scalar_lea.sflag [#allocation3], %s185_s28  ;;  %p1857_p0 = pneg %p1856_p13 }
  0x19   : > { %v1795_v14 = vld [vmem:[%s2376_s1 + $0x8] sm:$0xff]   ;;  %v1797_v16 = vld [vmem:[%s2376_s1] sm:$0xff]   ;;  %v1799_v20 = vld [vmem:[%s2376_s1 + $0x138] sm:$0xff]   ;;  %s1860_s15 = scalar_lea.vmem %s1859_s18, 32 }
  0x1a   : > { %1548 = vmatpush3.bf16.msra.mxu0 %v1784_v3  ;;  %v1256_v17 = vld [vmem:[%s2075_s21 + $0x8] sm:$0xf]  ;;  %v2087_v18 = vld [vmem:[%s2075_s21] sm:$0xf]  ;;  %v1800_v21 = vld [vmem:[%s2376_s1 + $0xf0] sm:$0xff]   ;;  %p1862_p2 = scmp.lt.s32.totalorder %s1860_s15, %s1854_s10 }
  0x1b   : > { %1568 = vmatpush3.bf16.msra.mxu1 %v1785_v4  ;;  %1549 = vmatprep.subr.bf16.mxu0 %v1932_v1  ;;  %v1801_v22 = vld [vmem:[%s2376_s1 + $0x130] sm:$0xff]   ;;  %v1802_v23 = vld [vmem:[%s2376_s1 + $0xe8] sm:$0xff]   ;;  %v1804_v25 = vld [vmem:[%s2376_s1 + $0xe0] sm:$0xff]  }
  0x1c   : > { %1569 = vmatprep.subr.bf16.mxu1 %v1932_v1  ;;  %v1803_v24 = vld [vmem:[%s2376_s1 + $0x128] sm:$0xff]   ;;  %v1805_v26 = vld [vmem:[%s2376_s1 + $0x120] sm:$0xff]   ;;  %v1806_v27 = vld [vmem:[%s2376_s1 + $0xd8] sm:$0xff]   ;;  %p1863_p3 = por %p1862_p2, %p1861_p1 }
  0x1d   : > { %v1807_v28 = vld [vmem:[%s2376_s1 + $0x118] sm:$0xff]   ;;  %v1808_v29 = vld [vmem:[%s2376_s1 + $0xd0] sm:$0xff]   ;;  %v1810_v31 = vld [vmem:[%s2376_s1 + $0xc8] sm:$0xff]  }
  0x1e   : > { %1550 = vmatpush3.bf16.msra.mxu0 %v1786_v5  ;;  %v1809_v30 = vld [vmem:[%s2376_s1 + $0x110] sm:$0xff]   ;;  %v1811_v32 = vld [vmem:[%s2376_s1 + $0x108] sm:$0xff]   ;;  %v1812_v33 = vld [vmem:[%s2376_s1 + $0xc0] sm:$0xff]   ;;  %p1864_p5 = pnand %p1863_p3, %p1857_p0 }
  0x1f   : > { %1570 = vmatpush3.bf16.msra.mxu1 %v1787_v6  ;;  %1551 = vmatprep.subr.bf16.mxu0 %v1932_v1  ;;  %v1813_v34 = vld [vmem:[%s2376_s1 + $0x100] sm:$0xff]   ;;  %v1305_v35 = vld [vmem:[%s2075_s21 + $0x10] sm:$0xf]  ;;  %v1814_v36 = vld [vmem:[%s2376_s1 + $0x178] sm:$0xff]  }
  0x20   : > { %1571 = vmatprep.subr.bf16.mxu1 %v1932_v1  ;;  %v1330_v37 = vld [vmem:[%s2075_s21 + $0x18] sm:$0xf]  ;;  %v1816_v39 = vld [vmem:[%s2376_s1 + $0x170] sm:$0xff]   ;;  %v1818_v41 = vld [vmem:[%s2376_s1 + $0x168] sm:$0xff]  }
  0x21   : > { %v1815_v38 = vld [vmem:[%s2376_s1 + $0xb8] sm:$0xff]   ;;  %v1817_v40 = vld [vmem:[%s2376_s1 + $0xb0] sm:$0xff]   ;;  %v1819_v42 = vld [vmem:[%s2376_s1 + $0xa8] sm:$0xff]  }
  0x22   : > { %1552 = vmatpush3.bf16.msra.mxu0 %v1788_v7  ;;  %v1820_v43 = vld [vmem:[%s2376_s1 + $0x160] sm:$0xff]   ;;  %v1822_v45 = vld [vmem:[%s2376_s1 + $0x158] sm:$0xff]   ;;  %v1824_v47 = vld [vmem:[%s2376_s1 + $0x150] sm:$0xff]  }
  0x23   : > { %1572 = vmatpush3.bf16.msra.mxu1 %v1789_v8  ;;  %1553 = vmatprep.subr.bf16.mxu0 %v1932_v1  ;;  %v1821_v44 = vld [vmem:[%s2376_s1 + $0xa0] sm:$0xff]   ;;  %v1823_v46 = vld [vmem:[%s2376_s1 + $0x98] sm:$0xff]   ;;  %v1825_v48 = vld [vmem:[%s2376_s1 + $0x90] sm:$0xff]  }
  0x24   : > { %1573 = vmatprep.subr.bf16.mxu1 %v1932_v1  ;;  %v1826_v49 = vld [vmem:[%s2376_s1 + $0x148] sm:$0xff]   ;;  %v1828_v51 = vld [vmem:[%s2376_s1 + $0x140] sm:$0xff]   ;;  %v1830_v53 = vld [vmem:[%s2376_s1 + $0x1b8] sm:$0xff]  }
  0x25   : > { %v1827_v50 = vld [vmem:[%s2376_s1 + $0x88] sm:$0xff]   ;;  %v1829_v52 = vld [vmem:[%s2376_s1 + $0x80] sm:$0xff]   ;;  %v1831_v54 = vld [vmem:[%s2376_s1 + $0x1f8] sm:$0xff]  }
  0x26   : > { %1554 = vmatpush3.bf16.msra.mxu0 %v1790_v9  ;;  %v1832_v55 = vld [vmem:[%s2376_s1 + $0x1b0] sm:$0xff]   ;;  %v1834_v57 = vld [vmem:[%s2376_s1 + $0x1a8] sm:$0xff]   ;;  %v1836_v59 = vld [vmem:[%s2376_s1 + $0x1a0] sm:$0xff]  }
  0x27   : > { %1574 = vmatpush3.bf16.msra.mxu1 %v1791_v10  ;;  %1555 = vmatprep.subr.bf16.mxu0 %v1932_v1  ;;  %v1833_v56 = vld [vmem:[%s2376_s1 + $0x1f0] sm:$0xff]   ;;  %v1835_v58 = vld [vmem:[%s2376_s1 + $0x1e8] sm:$0xff]   ;;  %v1837_v60 = vld [vmem:[%s2376_s1 + $0x1e0] sm:$0xff]  }
  0x28   : > { %1575 = vmatprep.subr.bf16.mxu1 %v1932_v1  ;;  %v1838_v61 = vld [vmem:[%s2376_s1 + $0x198] sm:$0xff]   ;;  %v1840_v63 = vld [vmem:[%s2376_s1 + $0x190] sm:$0xff]   ;;  %v1842_v2 = vld [vmem:[%s2376_s1 + $0x188] sm:$0xff]  }
  0x29   : > { %v1839_v62 = vld [vmem:[%s2376_s1 + $0x1d8] sm:$0xff]   ;;  %v1841_v0 = vld [vmem:[%s2376_s1 + $0x1d0] sm:$0xff]   ;;  %v1843_v3 = vld [vmem:[%s2376_s1 + $0x1c8] sm:$0xff]  }
  0x2a   : > { %1556 = vmatpush3.bf16.msra.mxu0 %v1792_v11  ;;  %v1844_v4 = vld [vmem:[%s2376_s1 + $0x180] sm:$0xff]   ;;  %v1846_v7 = vld [vmem:[%s2376_s1 + $0x238] sm:$0xff]   ;;  %v1411_v8 = vld [vmem:[%s2075_s21 + $0xc] sm:$0xf] }
  0x2b   : > { %1576 = vmatpush3.bf16.msra.mxu1 %v1793_v12  ;;  %1557 = vmatprep.subr.bf16.mxu0 %v1932_v1  ;;  %v1845_v5 = vld [vmem:[%s2376_s1 + $0x1c0] sm:$0xff]   ;;  %v1847_v9 = vld [vmem:[%s2376_s1 + $0x230] sm:$0xff]   ;;  %v1848_v10 = vld [vmem:[%s2376_s1 + $0x228] sm:$0xff]  }
  0x2c   : > { %1577 = vmatprep.subr.bf16.mxu1 %v1932_v1  ;;  %v835_v6 = vld [vmem:[%s2075_s21 + $0x4] sm:$0xf]  ;;  %v1850_v12 = vld [vmem:[%s2376_s1 + $0x218] sm:$0xff]  }
  0x2d   : > { %v1849_v11 = vld [vmem:[%s2376_s1 + $0x220] sm:$0xff]  }
  0x2e   : > { %1558 = vmatpush3.bf16.msra.mxu0 %v1794_v13  ;;  %v1851_v13 = vld [vmem:[%s2376_s1 + $0x210] sm:$0xff]  }
  0x2f   : > { %1578 = vmatpush3.bf16.msra.mxu1 %v1795_v14  ;;  %1559 = vmatprep.subr.bf16.mxu0 %v1932_v1  ;;  %v1852_v14 = vld [vmem:[%s2376_s1 + $0x208] sm:$0xff]  }
  0x30   : > { %1579 = vmatprep.subr.bf16.mxu1 %v1932_v1 }
  0x32   : > { %1560 = vmatpush3.bf16.msra.mxu0 %v1796_v15  ;;  %v1853_v15 = vld [vmem:[%s2376_s1 + $0x200] sm:$0xff]  }
  0x33   : > { %1580 = vmatpush3.bf16.msra.mxu1 %v1797_v16  ;;  %1585 = vmatprep.subr.bf16.mxu0 %v1932_v1 }
  0x34   : > { %1605 = vmatprep.subr.bf16.mxu1 %v1932_v1 }
  0x35   : > { %1562 = vmatmul.mubr.bf16.vlgmr.msra.gmra.mxu0 %v1256_v17 }
  0x36   : > { %1582 = vmatmul.mubr.bf16.vlgmr.msra.gmra.mxu1 %v2087_v18  ;;  %1586 = vmatpush3.bf16.msra.mxu0 %v1798_v19 }
  0x37   : > { %1606 = vmatpush3.bf16.msra.mxu1 %v1799_v20  ;;  %1587 = vmatprep.subr.bf16.mxu0 %v1932_v1 }
  0x38   : > { %1607 = vmatprep.subr.bf16.mxu1 %v1932_v1  ;;  %1601 = vmatprep.mubr.msk.bf16.mxu0 %vm1933_vm0, %v1932_v1 }
  0x39   : > { %1621 = vmatprep.mubr.msk.bf16.mxu1 %vm1933_vm0, %v1932_v1 }
  0x3a   : > { %1588 = vmatpush3.bf16.msra.mxu0 %v1800_v21 }
  0x3b   : > { %1608 = vmatpush3.bf16.msra.mxu1 %v1801_v22  ;;  %1589 = vmatprep.subr.bf16.mxu0 %v1932_v1 }
  0x3c   : > { %1609 = vmatprep.subr.bf16.mxu1 %v1932_v1 }
  0x3e   : > { %1590 = vmatpush3.bf16.msra.mxu0 %v1802_v23 }
  0x3f   : > { %1610 = vmatpush3.bf16.msra.mxu1 %v1803_v24  ;;  %1591 = vmatprep.subr.bf16.mxu0 %v1932_v1 }
  0x40   : > { %1611 = vmatprep.subr.bf16.mxu1 %v1932_v1 }
  0x42   : > { %1592 = vmatpush3.bf16.msra.mxu0 %v1804_v25 }
  0x43   : > { %1612 = vmatpush3.bf16.msra.mxu1 %v1805_v26  ;;  %1593 = vmatprep.subr.bf16.mxu0 %v1932_v1 }
  0x44   : > { %1613 = vmatprep.subr.bf16.mxu1 %v1932_v1 }
  0x46   : > { %1594 = vmatpush3.bf16.msra.mxu0 %v1806_v27 }
  0x47   : > { %1614 = vmatpush3.bf16.msra.mxu1 %v1807_v28  ;;  %1595 = vmatprep.subr.bf16.mxu0 %v1932_v1 }
  0x48   : > { %1615 = vmatprep.subr.bf16.mxu1 %v1932_v1 }
  0x4a   : > { %1596 = vmatpush3.bf16.msra.mxu0 %v1808_v29 }
  0x4b   : > { %1616 = vmatpush3.bf16.msra.mxu1 %v1809_v30  ;;  %1597 = vmatprep.subr.bf16.mxu0 %v1932_v1 }
  0x4c   : > { %1617 = vmatprep.subr.bf16.mxu1 %v1932_v1 }
  0x4e   : > { %1598 = vmatpush3.bf16.msra.mxu0 %v1810_v31 }
  0x4f   : > { %1618 = vmatpush3.bf16.msra.mxu1 %v1811_v32  ;;  %1599 = vmatprep.subr.bf16.mxu0 %v1932_v1 }
  0x50   : > { %1619 = vmatprep.subr.bf16.mxu1 %v1932_v1 }
  0x52   : > { %1600 = vmatpush3.bf16.msra.mxu0 %v1812_v33 }
  0x53   : > { %1620 = vmatpush3.bf16.msra.mxu1 %v1813_v34  ;;  %1625 = vmatprep.subr.bf16.mxu0 %v1932_v1 }
  0x54   : > { %1645 = vmatprep.subr.bf16.mxu1 %v1932_v1 }
  0x55   : > { %1602 = vmatmul.mubr.bf16.vlgmr.msra.gmra.mxu0 %v1305_v35 }
  0x56   : > { %1626 = vmatpush3.bf16.msra.mxu0 %v1814_v36  ;;  %1622 = vmatmul.mubr.bf16.vlgmr.msra.gmra.mxu1 %v1330_v37 }
  0x57   : > { %1646 = vmatpush3.bf16.msra.mxu1 %v1815_v38  ;;  %1627 = vmatprep.subr.bf16.mxu0 %v1932_v1 }
  0x58   : > { %1647 = vmatprep.subr.bf16.mxu1 %v1932_v1  ;;  %1641 = vmatprep.mubr.msk.bf16.mxu0 %vm1933_vm0, %v1932_v1 }
  0x59   : > { %1661 = vmatprep.mubr.msk.bf16.mxu1 %vm1933_vm0, %v1932_v1 }
  0x5a   : > { %1628 = vmatpush3.bf16.msra.mxu0 %v1816_v39 }
  0x5b   : > { %1648 = vmatpush3.bf16.msra.mxu1 %v1817_v40  ;;  %1629 = vmatprep.subr.bf16.mxu0 %v1932_v1 }
  0x5c   : > { %1649 = vmatprep.subr.bf16.mxu1 %v1932_v1 }
  0x5e   : > { %1630 = vmatpush3.bf16.msra.mxu0 %v1818_v41 }
  0x5f   : > { %1650 = vmatpush3.bf16.msra.mxu1 %v1819_v42  ;;  %1631 = vmatprep.subr.bf16.mxu0 %v1932_v1 }
  0x60   : > { %1651 = vmatprep.subr.bf16.mxu1 %v1932_v1 }
  0x62   : > { %1632 = vmatpush3.bf16.msra.mxu0 %v1820_v43 }
  0x63   : > { %1652 = vmatpush3.bf16.msra.mxu1 %v1821_v44  ;;  %1633 = vmatprep.subr.bf16.mxu0 %v1932_v1 }
  0x64   : > { %1653 = vmatprep.subr.bf16.mxu1 %v1932_v1 }
  0x66   : > { %1634 = vmatpush3.bf16.msra.mxu0 %v1822_v45 }
  0x67   : > { %1654 = vmatpush3.bf16.msra.mxu1 %v1823_v46  ;;  %1635 = vmatprep.subr.bf16.mxu0 %v1932_v1 }
  0x68   : > { %1655 = vmatprep.subr.bf16.mxu1 %v1932_v1 }
  0x6a   : > { %1636 = vmatpush3.bf16.msra.mxu0 %v1824_v47 }
  0x6b   : > { %1656 = vmatpush3.bf16.msra.mxu1 %v1825_v48  ;;  %1637 = vmatprep.subr.bf16.mxu0 %v1932_v1 }
  0x6c   : > { %1657 = vmatprep.subr.bf16.mxu1 %v1932_v1 }
  0x6e   : > { %1638 = vmatpush3.bf16.msra.mxu0 %v1826_v49 }
  0x6f   : > { %1658 = vmatpush3.bf16.msra.mxu1 %v1827_v50  ;;  %1639 = vmatprep.subr.bf16.mxu0 %v1932_v1 }
  0x70   : > { %1659 = vmatprep.subr.bf16.mxu1 %v1932_v1 }
  0x72   : > { %1640 = vmatpush3.bf16.msra.mxu0 %v1828_v51 }
  0x73   : > { %1660 = vmatpush3.bf16.msra.mxu1 %v1829_v52  ;;  %1665 = vmatprep.subr.bf16.mxu0 %v1932_v1 }
  0x74   : > { %1685 = vmatprep.subr.bf16.mxu1 %v1932_v1 }
  0x75   : > { %1642 = vmatmul.mubr.bf16.vlgmr.msra.gmra.mxu0 %v1305_v35 }
  0x76   : > { %1662 = vmatmul.mubr.bf16.vlgmr.msra.gmra.mxu1 %v2087_v18  ;;  %1666 = vmatpush3.bf16.msra.mxu0 %v1830_v53 }
  0x77   : > { %1686 = vmatpush3.bf16.msra.mxu1 %v1831_v54  ;;  %1667 = vmatprep.subr.bf16.mxu0 %v1932_v1 }
  0x78   : > { %1687 = vmatprep.subr.bf16.mxu1 %v1932_v1  ;;  %1681 = vmatprep.mubr.msk.bf16.mxu0 %vm1933_vm0, %v1932_v1 }
  0x79   : > { %1701 = vmatprep.mubr.msk.bf16.mxu1 %vm1933_vm0, %v1932_v1 }
  0x7a   : > { %1668 = vmatpush3.bf16.msra.mxu0 %v1832_v55 }
  0x7b   : > { %1688 = vmatpush3.bf16.msra.mxu1 %v1833_v56  ;;  %1669 = vmatprep.subr.bf16.mxu0 %v1932_v1 }
  0x7c   : > { %1689 = vmatprep.subr.bf16.mxu1 %v1932_v1 }
  0x7e   : > { %1670 = vmatpush3.bf16.msra.mxu0 %v1834_v57  ;;  %v1159_v57 = vld [vmem:[%s2377_s2] sm:$0x1] }
  0x7f   : > { %1690 = vmatpush3.bf16.msra.mxu1 %v1835_v58  ;;  %1671 = vmatprep.subr.bf16.mxu0 %v1932_v1 }
  0x80   : > { %1691 = vmatprep.subr.bf16.mxu1 %v1932_v1 }
  0x82   : > { %1672 = vmatpush3.bf16.msra.mxu0 %v1836_v59 }
  0x83   : > { %1692 = vmatpush3.bf16.msra.mxu1 %v1837_v60  ;;  %1673 = vmatprep.subr.bf16.mxu0 %v1932_v1 }
  0x84   : > { %1693 = vmatprep.subr.bf16.mxu1 %v1932_v1 }
  0x86   : > { %1674 = vmatpush3.bf16.msra.mxu0 %v1838_v61 }
  0x87   : > { %1694 = vmatpush3.bf16.msra.mxu1 %v1839_v62  ;;  %1675 = vmatprep.subr.bf16.mxu0 %v1932_v1 }
  0x88   : > { %1695 = vmatprep.subr.bf16.mxu1 %v1932_v1 }
  0x8a   : > { %1676 = vmatpush3.bf16.msra.mxu0 %v1840_v63 }
  0x8b   : > { %1696 = vmatpush3.bf16.msra.mxu1 %v1841_v0  ;;  %1677 = vmatprep.subr.bf16.mxu0 %v1932_v1 }
  0x8c   : > { %1697 = vmatprep.subr.bf16.mxu1 %v1932_v1 }
  0x8e   : > { %1678 = vmatpush3.bf16.msra.mxu0 %v1842_v2 }
  0x8f   : > { %1698 = vmatpush3.bf16.msra.mxu1 %v1843_v3  ;;  %1679 = vmatprep.subr.bf16.mxu0 %v1932_v1 }
  0x90   : > { %1699 = vmatprep.subr.bf16.mxu1 %v1932_v1 }
  0x92   : > { %1680 = vmatpush3.bf16.msra.mxu0 %v1844_v4 }
  0x93   : > { %1700 = vmatpush3.bf16.msra.mxu1 %v1845_v5  ;;  %1705 = vmatprep.subr.bf16.mxu0 %v1932_v1 }
  0x95   : > { %1682 = vmatmul.mubr.bf16.vlgmr.msra.gmra.mxu0 %v835_v6 }
  0x96   : > { %1706 = vmatpush3.bf16.msra.mxu0 %v1846_v7  ;;  %1702 = vmatmul.mubr.bf16.vlgmr.msra.gmra.mxu1 %v1411_v8 }
  0x97   : > { %1707 = vmatprep.subr.bf16.mxu0 %v1932_v1  ;;  %1721 = vmatprep.mubr.msk.bf16.mxu0 %vm1933_vm0, %v1932_v1 }
  0x9a   : > { %1708 = vmatpush3.bf16.msra.mxu0 %v1847_v9 }
  0x9b   : > { %1709 = vmatprep.subr.bf16.mxu0 %v1932_v1 }
  0x9e   : > { %1710 = vmatpush3.bf16.msra.mxu0 %v1848_v10 }
  0x9f   : > { %1711 = vmatprep.subr.bf16.mxu0 %v1932_v1 }
  0xa2   : > { %1712 = vmatpush3.bf16.msra.mxu0 %v1849_v11 }
  0xa3   : > { %1713 = vmatprep.subr.bf16.mxu0 %v1932_v1 }
  0xa6   : > { %1714 = vmatpush3.bf16.msra.mxu0 %v1850_v12 }
  0xa7   : > { %1715 = vmatprep.subr.bf16.mxu0 %v1932_v1 }
  0xaa   : > { %1716 = vmatpush3.bf16.msra.mxu0 %v1851_v13 }
  0xab   : > { %1717 = vmatprep.subr.bf16.mxu0 %v1932_v1 }
  0xae   : > { %1718 = vmatpush3.bf16.msra.mxu0 %v1852_v14 }
  0xaf   : > { %1719 = vmatprep.subr.bf16.mxu0 %v1932_v1 }
  0xb2   : > { %1720 = vmatpush3.bf16.msra.mxu0 %v1853_v15 }
  0xb5   : > { %1722 = vmatmul.mubr.bf16.vlgmr.msra.gmra.mxu0 %v835_v6 }
  0xf5   : > { %v315_v16 = vpop.f32.mrf.mxu0 }
  0xf6   : > { %v403_v17 = vpop.f32.mrf.mxu1 }
  0xf7   : > { %v404_v18 = vadd.f32 %v403_v17, %v315_v16  ;;  %v1563_v19 = vpop.f32.mrf.mxu0 }
  0xf8   : > { %v1583_v20 = vpop.f32.mrf.mxu1 }
  0xf9   : > { %v318_v21 = vpop.f32.mrf.mxu0 }
  0xfa   : > { %v406_v22 = vpop.f32.mrf.mxu1 }
  0xfb   : > { %v1564_v23 = vpop.f32.mrf.mxu0 }
  0xfc   : > { %v1584_v24 = vpop.f32.mrf.mxu1 }
 0x115   : > { %v527_v25 = vpop.f32.mrf.mxu0 }
 0x116   : > { %v533_v26 = vadd.f32 %v527_v25, %v404_v18  ;;  %v635_v27 = vpop.f32.mrf.mxu1 }
 0x117   : > { %v1603_v28 = vpop.f32.mrf.mxu0 }
 0x118   : > { %v641_v29 = vadd.f32 %v635_v27, %v533_v26  ;;  %v1623_v30 = vpop.f32.mrf.mxu1 }
 0x119   : > { %v530_v31 = vpop.f32.mrf.mxu0 }
 0x11a   : > { %v638_v32 = vpop.f32.mrf.mxu1 }
 0x11b   : > { %v1604_v1 = vpop.f32.mrf.mxu0 }
 0x11c   : > { %v1624_v33 = vpop.f32.mrf.mxu1 }
 0x135   : > { %v741_v34 = vpop.f32.mrf.mxu0 }
 0x136   : > { %v829_v35 = vpop.f32.mrf.mxu1 }
 0x137   : > { %v1643_v36 = vpop.f32.mrf.mxu0  ;;  %v830_v50 = vadd.f32 %v829_v35, %v741_v34 }
 0x138   : > { %v1663_v37 = vpop.f32.mrf.mxu1 }
 0x139   : > { %v744_v38 = vpop.f32.mrf.mxu0 }
 0x13a   : > { %v832_v39 = vpop.f32.mrf.mxu1 }
 0x13b   : > { %v1644_v40 = vpop.f32.mrf.mxu0 }
 0x13c   : > { %v1664_v41 = vpop.f32.mrf.mxu1 }
 0x155   : > { %v935_v42 = vpop.f32.mrf.mxu0 }
 0x156   : > { %v1042_v43 = vpop.f32.mrf.mxu1  ;;  %v941_v51 = vadd.f32 %v935_v42, %v641_v29 }
 0x157   : > { %v1683_v44 = vpop.f32.mrf.mxu0 }
 0x158   : > { %v1703_v45 = vpop.f32.mrf.mxu1  ;;  %v1048_v55 = vadd.f32 %v1042_v43, %v941_v51 }
 0x159   : > { %v938_v46 = vpop.f32.mrf.mxu0 }
 0x15a   : > { %v1045_v47 = vpop.f32.mrf.mxu1 }
 0x15b   : > { %v1684_v48 = vpop.f32.mrf.mxu0 }
 0x15c   : > { %v1704_v49 = vpop.f32.mrf.mxu1 }
 0x175   : > { %v1148_v52 = vpop.f32.mrf.mxu0 }
 0x176   : > { %v1154_v53 = vadd.f32 %v1148_v52, %v830_v50 }
 0x177   : > { %v1723_v54 = vpop.f32.mrf.mxu0 }
 0x178   : > { %v1156_v56 = vrot.slane %v1154_v53, 1 }
 0x179   : > { %v1151_v58 = vpop.f32.mrf.mxu0 }
 0x17a   : > { %v1158_v59 = vadd.f32 %v1156_v56, %v1048_v55 }
 0x17b   : > { %v1724_v60 = vpop.f32.mrf.mxu0 }
 0x17c   : > { %v1160_v61 = vadd.f32 %v1159_v57, %v1158_v59 }
 0x17e   : > { %1161 = vst [vmem:[%s186_s5] sm:$0x1] %v1160_v61 }
 0x17f   : > { %1867 = shalt.err (!%p1864_p5)
}
 0x180   : > { %s1868_s19 = scalar_lea.hbm %s1174_s8, 16  ;;  %s1872_s27 = scalar_lea.hbm %s2378_s3, 32 }
 0x181   : > { %p1869_p6 = scmp.ne.s32.totalorder %s1174_s8, %s1868_s19  ;;  %p1873_p10 = scmp.lt.s32.totalorder %s1174_s8, %s2378_s3 }
 0x182   : > { %p1874_p11 = scmp.lt.s32.totalorder %s1872_s27, %s1868_s19 }
 0x183   : > { %p1870_p7 = pnand %p1869_p6, %p1995_p4 }
 0x184   : > { %p1875_p12 = por %p1874_p11, %p1873_p10 }
 0x185   : > { %p1871_p9 = pneg %p1870_p7 }
 0x187   : > { %p1876_p13 = pnand %p1875_p12, %p1871_p9 }
 0x189   : > { %1879 = shalt.err (!%p1876_p13)
}
 0x18a   : > { %1725 = dma.vmem_to_hbm [thread:$0]  (%p1995_p4), %s1177_s6, 16, %s1174_s8, %s1163_s9  }
 0x18b PF: > { %p1731_p0 = scmp.ge.s32.totalorder %s1930_s17, 2  ;;  %s1188_s30 = sand.u32 1, %s1910_s12  }
 0x18c   : > { %s1189_s4 = scalar_lea.sflag [#allocation3], %s1188_s30 }
 0x18d   : > { %p1728_p1 = pnand %p1731_p0, %p2002_p8 }
 0x18f   : > { %p1729_p2 = pneg %p1728_p1 }
 0x191   : > { %1905 = dma.done.wait (%p1729_p2), %s1189_s4, 16  }
 0x192   : > { %1907 = vsyncadd (%p1729_p2), %s1189_s4, 4294967280  ;;  %s16_s17 = sadd.s32 1, %s1930_s17   ;;  %s2381_s12 = smov %s1914_s13 }
 0x193   : > { %p13_p3 = scmp.ge.s32.totalorder %s16_s17, 4   ;;  %s2382_s13 = smov %s1918_s14 }
 0x194   : > { %s2383_s14 = smov %s2008_s25  ;;  %s2384_s15 = smov %s1926_s16 }
 0x195   : > { %s2385_s16 = smov %s2387_s20  ;;  %15 = sbr.rel (!%p13_p3) target bundleno = 4 (0x4), region = 78 }
 0x19a   :  { %1193 = vsyncpa [#allocation3], 1 }
 0x19b   :  { %1195 = vsyncpa [#allocation3 + $0x1], 1 }

// kernel: fpn_forward.5
= control target key start
LH: loop header
LB: loop body
LE: loop exit
PB: predicated region body
PF: predicated region fallthrough
CT: control target
= control target key end

     0   :  { %s746_s12 = smov 0   ;;  %s748_s13 = smov 0   ;;  %s913_s0 = inlined_call_operand.vmem [shape: f32[2,4,256], index: 0, kind: input, shape index: {}]   ;;  %s914_s1 = inlined_call_operand.vmem [shape: bf16[128,4], index: 1, kind: input, shape index: {}]   ;;  %s915_s2 = inlined_call_operand.vmem [shape: f32[128,1], index: 2, kind: input, shape index: {}]   ;;  %s916_s3 = inlined_call_operand.vmem [shape: f32[2,128,256], index: 3, kind: output, shape index: {}]  }
   0x1   :  { %s750_s14 = smov 0  }
   0x2 LB: > { %s25_s15 = sadd.s32 1, %s719_s13  ;;  %p637_p0 = scmp.ge.s32.totalorder %s723_s14, 1  ;;  %s723_s14 = sphi %s750_s14, %s13_s14   ;;  %s719_s13 = sphi %s748_s13, %s918_s13   ;;  %s715_s12 = sphi %s746_s12, %s917_s12  }
   0x3   : > { %p27_p1 = scmp.ge.s32.totalorder %s25_s15, 2  ;;  %p158_p2 = scmp.lt.s32.totalorder %s723_s14, 3 }
   0x5   : > { %s920_s15 = smov (%p27_p1, %s25_s15), 0  ;;  %p159_p3 = pnand %p637_p0, %p158_p2 }
   0x6   : > { %p191_p4 = scmp.lt.s32.totalorder (!%p159_p3), %s715_s12, 1 }
   0x7   : > { %162 = sbr.rel (%p159_p3) target bundleno = 250 (0xfa), region = 32 }
   0xc   : > { %v725_v0 = vmov 0   ;;  %s922_s12 = smov (!%p191_p4, %s715_s12), 1  ;;  %vm394_vm0 = vcmask 1041408   ;;  %v235_v4 = vld [vmem:[%s915_s2 + $0x10] sm:$0xff]  ;;  %v233_v7 = vld [vmem:[%s915_s2] sm:$0xff]  ;;  %v236_v8 = vld [vmem:[%s915_s2 + $0x18] sm:$0xff] }
   0xd   : > { %433 = vmatprep.mubr.bf16.mxu0 %v725_v0  ;;  %473 = vmatprep.mubr.bf16.mxu1 %v725_v0  ;;  %s661_s16 = sshll.u32 %s922_s12, 3  ;;  %v693_v9 = vld [vmem:[%s914_s1] sm:$0xff]   ;;  %v234_v11 = vld [vmem:[%s915_s2 + $0x8] sm:$0xff]  ;;  %vm369_vm1 = vcmask 31744   ;;  %v240_v14 = vld [vmem:[%s915_s2 + $0x38] sm:$0xff]  ;;  %s662_s22 = sshll.u32 %s922_s12, 8 }
   0xe   : > { %691 = vset.pattern.permute.xlu1 %v725_v0  ;;  %690 = vset.pattern.permute.xlu0 %v725_v0  ;;  %s198_s19 = scalar_lea.vmem %s913_s0, %s661_s16  ;;  %v694_v10 = vld [vmem:[%s914_s1 + $0x20] sm:$0xff]   ;;  %v238_v12 = vld [vmem:[%s915_s2 + $0x28] sm:$0xff]  ;;  %v239_v17 = vld [vmem:[%s915_s2 + $0x30] sm:$0xff]  ;;  %s862_s25 = scalar_lea.vmem %s916_s3, %s662_s22 }
   0xf   : > { %v211_v1 = vld [vmem:[%s198_s19] sm:$0xff]  ;;  %261 = vperm.xlu1 %691, %v235_v4   ;;  %251 = vperm.xlu0 %690, %v233_v7   ;;  %v695_v15 = vld [vmem:[%s914_s1 + $0x8] sm:$0xff]   ;;  %v244_v20 = vld [vmem:[%s915_s2 + $0x58] sm:$0xff] }
  0x10   : > { %v213_v2 = vcombine.high %v211_v1, %v211_v1  ;;  %v215_v3 = vpack.c.bf16 %v211_v1, %v211_v1  ;;  %v237_v13 = vld [vmem:[%s915_s2 + $0x20] sm:$0xff]  ;;  %v696_v16 = vld [vmem:[%s914_s1 + $0x28] sm:$0xff]   ;;  %v697_v21 = vld [vmem:[%s914_s1 + $0x10] sm:$0xff]  }
  0x11   : > { %v242_v18 = vld [vmem:[%s915_s2 + $0x48] sm:$0xff]  ;;  %v241_v19 = vld [vmem:[%s915_s2 + $0x40] sm:$0xff]  ;;  %v698_v22 = vld [vmem:[%s914_s1 + $0x30] sm:$0xff]  }
  0x12   : > { %v216_v5 = vpack.c.bf16 %v213_v2, %v213_v2  ;;  %v396_v6 = vsel %vm394_vm0, %v215_v3, 0  ;;  %v243_v23 = vld [vmem:[%s915_s2 + $0x50] sm:$0xff]  ;;  %v246_v24 = vld [vmem:[%s915_s2 + $0x68] sm:$0xff]  ;;  %v245_v25 = vld [vmem:[%s915_s2 + $0x60] sm:$0xff] }
  0x13   : > { %266 = vperm.xlu1 %691, %v236_v8   ;;  %256 = vperm.xlu0 %690, %v234_v11   ;;  %v248_v26 = vld [vmem:[%s915_s2 + $0x78] sm:$0xff]  ;;  %v247_v29 = vld [vmem:[%s915_s2 + $0x70] sm:$0xff] }
  0x14   : > { %650 = vmatprep.subr.msk.bf16.mxu0 %vm394_vm0, %v216_v5  ;;  %663 = vmatprep.subr.msk.bf16.mxu1 %vm394_vm0, %v216_v5  ;;  %v699_v27 = vld [vmem:[%s914_s1 + $0x18] sm:$0xff]  }
  0x15   : > { %416 = vmatpush1.bf16.msra.mxu0 %v396_v6  ;;  %664 = vmatpush1.bf16.msra.mxu1 %v396_v6  ;;  %v700_v28 = vld [vmem:[%s914_s1 + $0x38] sm:$0xff]  }
  0x17   : > { %276 = vperm.xlu1 %691, %v238_v12   ;;  %271 = vperm.xlu0 %690, %v237_v13  }
  0x18   : > { %651 = vmatmul.mubr.msk.bf16.vlgmr.msra.gmra.mxu0 %vm369_vm1, %v693_v9  ;;  %655 = vmatmul.mubr.msk.bf16.vlgmr.msra.gmra.mxu1 %vm369_vm1, %v694_v10 }
  0x19   : > { %443 = vmatprep.mubr.bf16.mxu0 %v725_v0  ;;  %483 = vmatprep.mubr.bf16.mxu1 %v725_v0 }
  0x1b   : > { %286 = vperm.xlu1 %691, %v240_v14   ;;  %281 = vperm.xlu0 %690, %v239_v17  }
  0x1f   : > { %296 = vperm.xlu1 %691, %v242_v18   ;;  %291 = vperm.xlu0 %690, %v241_v19  }
  0x20   : > { %652 = vmatmul.mubr.msk.bf16.gmra.mxu0 %vm369_vm1, %v695_v15  ;;  %656 = vmatmul.mubr.msk.bf16.gmra.mxu1 %vm369_vm1, %v696_v16 }
  0x21   : > { %453 = vmatprep.mubr.bf16.mxu0 %v725_v0  ;;  %493 = vmatprep.mubr.bf16.mxu1 %v725_v0 }
  0x23   : > { %306 = vperm.xlu1 %691, %v244_v20   ;;  %301 = vperm.xlu0 %690, %v243_v23  }
  0x27   : > { %316 = vperm.xlu1 %691, %v246_v24   ;;  %311 = vperm.xlu0 %690, %v245_v25  }
  0x28   : > { %653 = vmatmul.mubr.msk.bf16.gmra.mxu0 %vm369_vm1, %v697_v21  ;;  %657 = vmatmul.mubr.msk.bf16.gmra.mxu1 %vm369_vm1, %v698_v22 }
  0x29   : > { %463 = vmatprep.mubr.bf16.mxu0 %v725_v0  ;;  %503 = vmatprep.mubr.bf16.mxu1 %v725_v0 }
  0x2b   : > { %326 = vperm.xlu1 %691, %v248_v26   ;;  %321 = vperm.xlu0 %690, %v247_v29  }
  0x30   : > { %654 = vmatmul.mubr.msk.bf16.gmra.mxu0 %vm369_vm1, %v699_v27  ;;  %658 = vmatmul.mubr.msk.bf16.gmra.mxu1 %vm369_vm1, %v700_v28 }
  0x8a   : > { %v252_v30 = vpop.permute.xlu0 %251  ;;  %v262_v31 = vpop.permute.xlu1 %261 }
  0x8e   : > { %v257_v32 = vpop.permute.xlu0 %256  ;;  %v267_v33 = vpop.permute.xlu1 %266 }
  0x92   : > { %v850_v34 = vpop.permute.xlu0 %271  ;;  %v852_v35 = vpop.permute.xlu1 %276 }
  0x96   : > { %v854_v36 = vpop.permute.xlu0 %281  ;;  %v857_v37 = vpop.permute.xlu1 %286 }
  0x9a   : > { %v292_v38 = vpop.permute.xlu0 %291  ;;  %v297_v45 = vpop.permute.xlu1 %296 }
  0x9e   : > { %v302_v54 = vpop.permute.xlu0 %301  ;;  %v307_v63 = vpop.permute.xlu1 %306 }
  0xa2   : > { %v312_v8 = vpop.permute.xlu0 %311  ;;  %v317_v17 = vpop.permute.xlu1 %316 }
  0xa6   : > { %v322_v26 = vpop.permute.xlu0 %321 }
  0xd8   : > { %v435_v39 = vpop.f32.mrf.mxu0  ;;  %v475_v40 = vpop.f32.mrf.mxu1 }
  0xd9   : > { %v436_v41 = vadd.f32 %v435_v39, %v252_v30  ;;  %v476_v42 = vadd.f32 %v475_v40, %v292_v38 }
  0xda   : > { %v437_v43 = vpop.f32.mrf.mxu0  ;;  %v477_v44 = vpop.f32.mrf.mxu1 }
  0xdb   : > { %514 = vst [vmem:[%s862_s25] sm:$0xff] %v436_v41  ;;  %530 = vst [vmem:[%s862_s25 + $0x80] sm:$0xff] %v476_v42  ;;  %v438_v46 = vadd.f32 %v437_v43, %v252_v30  ;;  %v478_v47 = vadd.f32 %v477_v44, %v292_v38  ;;  %v327_v38 = vpop.permute.xlu1 %326 }
  0xdc   : > { %v439_v48 = vpop.f32.mrf.mxu0  ;;  %v479_v49 = vpop.f32.mrf.mxu1 }
  0xdd   : > { %515 = vst [vmem:[%s862_s25 + $0x8] sm:$0xff] %v438_v46  ;;  %531 = vst [vmem:[%s862_s25 + $0x88] sm:$0xff] %v478_v47  ;;  %v440_v50 = vadd.f32 %v439_v48, %v257_v32  ;;  %v480_v51 = vadd.f32 %v479_v49, %v297_v45 }
  0xde   : > { %v441_v52 = vpop.f32.mrf.mxu0  ;;  %v481_v53 = vpop.f32.mrf.mxu1 }
  0xdf   : > { %516 = vst [vmem:[%s862_s25 + $0x10] sm:$0xff] %v440_v50  ;;  %532 = vst [vmem:[%s862_s25 + $0x90] sm:$0xff] %v480_v51  ;;  %v442_v55 = vadd.f32 %v441_v52, %v257_v32  ;;  %v482_v56 = vadd.f32 %v481_v53, %v297_v45 }
  0xe0   : > { %v445_v57 = vpop.f32.mrf.mxu0  ;;  %v485_v58 = vpop.f32.mrf.mxu1 }
  0xe1   : > { %517 = vst [vmem:[%s862_s25 + $0x18] sm:$0xff] %v442_v55  ;;  %533 = vst [vmem:[%s862_s25 + $0x98] sm:$0xff] %v482_v56  ;;  %v446_v59 = vadd.f32 %v445_v57, %v262_v31  ;;  %v486_v60 = vadd.f32 %v485_v58, %v302_v54 }
  0xe2   : > { %v447_v61 = vpop.f32.mrf.mxu0  ;;  %v487_v62 = vpop.f32.mrf.mxu1 }
  0xe3   : > { %518 = vst [vmem:[%s862_s25 + $0x20] sm:$0xff] %v446_v59  ;;  %534 = vst [vmem:[%s862_s25 + $0xa0] sm:$0xff] %v486_v60  ;;  %v448_v0 = vadd.f32 %v447_v61, %v262_v31  ;;  %v488_v1 = vadd.f32 %v487_v62, %v302_v54 }
  0xe4   : > { %v449_v2 = vpop.f32.mrf.mxu0  ;;  %v489_v3 = vpop.f32.mrf.mxu1 }
  0xe5   : > { %519 = vst [vmem:[%s862_s25 + $0x28] sm:$0xff] %v448_v0  ;;  %535 = vst [vmem:[%s862_s25 + $0xa8] sm:$0xff] %v488_v1  ;;  %v450_v4 = vadd.f32 %v449_v2, %v267_v33  ;;  %v490_v5 = vadd.f32 %v489_v3, %v307_v63 }
  0xe6   : > { %v451_v6 = vpop.f32.mrf.mxu0  ;;  %v491_v7 = vpop.f32.mrf.mxu1 }
  0xe7   : > { %520 = vst [vmem:[%s862_s25 + $0x30] sm:$0xff] %v450_v4  ;;  %536 = vst [vmem:[%s862_s25 + $0xb0] sm:$0xff] %v490_v5  ;;  %v452_v9 = vadd.f32 %v451_v6, %v267_v33  ;;  %v492_v10 = vadd.f32 %v491_v7, %v307_v63 }
  0xe8   : > { %v455_v11 = vpop.f32.mrf.mxu0  ;;  %v495_v12 = vpop.f32.mrf.mxu1 }
  0xe9   : > { %521 = vst [vmem:[%s862_s25 + $0x38] sm:$0xff] %v452_v9  ;;  %537 = vst [vmem:[%s862_s25 + $0xb8] sm:$0xff] %v492_v10  ;;  %v456_v13 = vadd.f32 %v455_v11, %v850_v34  ;;  %v496_v14 = vadd.f32 %v495_v12, %v312_v8 }
  0xea   : > { %v457_v15 = vpop.f32.mrf.mxu0  ;;  %v497_v16 = vpop.f32.mrf.mxu1 }
  0xeb   : > { %522 = vst [vmem:[%s862_s25 + $0x40] sm:$0xff] %v456_v13  ;;  %538 = vst [vmem:[%s862_s25 + $0xc0] sm:$0xff] %v496_v14  ;;  %v458_v18 = vadd.f32 %v457_v15, %v850_v34  ;;  %v498_v19 = vadd.f32 %v497_v16, %v312_v8 }
  0xec   : > { %v459_v20 = vpop.f32.mrf.mxu0  ;;  %v499_v21 = vpop.f32.mrf.mxu1 }
  0xed   : > { %523 = vst [vmem:[%s862_s25 + $0x48] sm:$0xff] %v458_v18  ;;  %539 = vst [vmem:[%s862_s25 + $0xc8] sm:$0xff] %v498_v19  ;;  %v460_v22 = vadd.f32 %v459_v20, %v852_v35  ;;  %v500_v23 = vadd.f32 %v499_v21, %v317_v17 }
  0xee   : > { %v461_v24 = vpop.f32.mrf.mxu0  ;;  %v501_v25 = vpop.f32.mrf.mxu1 }
  0xef   : > { %524 = vst [vmem:[%s862_s25 + $0x50] sm:$0xff] %v460_v22  ;;  %540 = vst [vmem:[%s862_s25 + $0xd0] sm:$0xff] %v500_v23  ;;  %v462_v27 = vadd.f32 %v461_v24, %v852_v35  ;;  %v502_v28 = vadd.f32 %v501_v25, %v317_v17 }
  0xf0   : > { %v465_v29 = vpop.f32.mrf.mxu0  ;;  %v505_v30 = vpop.f32.mrf.mxu1 }
  0xf1   : > { %525 = vst [vmem:[%s862_s25 + $0x58] sm:$0xff] %v462_v27  ;;  %541 = vst [vmem:[%s862_s25 + $0xd8] sm:$0xff] %v502_v28  ;;  %v466_v31 = vadd.f32 %v465_v29, %v854_v36  ;;  %v506_v32 = vadd.f32 %v505_v30, %v322_v26 }
  0xf2   : > { %v467_v33 = vpop.f32.mrf.mxu0  ;;  %v507_v34 = vpop.f32.mrf.mxu1 }
  0xf3   : > { %526 = vst [vmem:[%s862_s25 + $0x60] sm:$0xff] %v466_v31  ;;  %542 = vst [vmem:[%s862_s25 + $0xe0] sm:$0xff] %v506_v32  ;;  %v468_v35 = vadd.f32 %v467_v33, %v854_v36  ;;  %v508_v39 = vadd.f32 %v507_v34, %v322_v26 }
  0xf4   : > { %v469_v40 = vpop.f32.mrf.mxu0  ;;  %v509_v41 = vpop.f32.mrf.mxu1 }
  0xf5   : > { %527 = vst [vmem:[%s862_s25 + $0x68] sm:$0xff] %v468_v35  ;;  %543 = vst [vmem:[%s862_s25 + $0xe8] sm:$0xff] %v508_v39  ;;  %v470_v42 = vadd.f32 %v469_v40, %v857_v37  ;;  %v510_v43 = vadd.f32 %v509_v41, %v327_v38 }
  0xf6   : > { %v471_v44 = vpop.f32.mrf.mxu0  ;;  %v511_v45 = vpop.f32.mrf.mxu1 }
  0xf7   : > { %528 = vst [vmem:[%s862_s25 + $0x70] sm:$0xff] %v470_v42  ;;  %544 = vst [vmem:[%s862_s25 + $0xf0] sm:$0xff] %v510_v43  ;;  %v472_v46 = vadd.f32 %v471_v44, %v857_v37  ;;  %v512_v47 = vadd.f32 %v511_v45, %v327_v38 }
  0xf9   : > { %529 = vst [vmem:[%s862_s25 + $0x78] sm:$0xff] %v472_v46  ;;  %545 = vst [vmem:[%s862_s25 + $0xf8] sm:$0xff] %v512_v47 }
  0xfa PF: > { %s13_s14 = sadd.s32 1, %s723_s14   ;;  %s917_s12 = smov %s719_s13 }
  0xfb   : > { %p10_p5 = scmp.ge.s32.totalorder %s13_s14, 4   ;;  %s918_s13 = smov %s920_s15 }
  0xfd   :  { %12 = sbr.rel (!%p10_p5) target bundleno = 2 (0x2), region = 62 }

// kernel: fpn_forward.6
= control target key start
LH: loop header
LB: loop body
LE: loop exit
PB: predicated region body
PF: predicated region fallthrough
CT: control target
= control target key end

     0   :  { %s715_s12 = smov 0   ;;  %s717_s13 = smov 0   ;;  %s866_s0 = inlined_call_operand.vmem [shape: f32[2,8,64], index: 0, kind: input, shape index: {}]   ;;  %s867_s1 = inlined_call_operand.vmem [shape: bf16[128,8], index: 1, kind: input, shape index: {}]   ;;  %s868_s2 = inlined_call_operand.vmem [shape: f32[128,1], index: 2, kind: input, shape index: {}]   ;;  %s869_s3 = inlined_call_operand.vmem [shape: f32[2,128,64], index: 3, kind: output, shape index: {}]  }
   0x1   :  { %s719_s14 = smov 0  }
   0x2 LB: > { %s25_s15 = sadd.s32 1, %s688_s13  ;;  %p581_p0 = scmp.ge.s32.totalorder %s692_s14, 1  ;;  %s692_s14 = sphi %s719_s14, %s13_s14   ;;  %s688_s13 = sphi %s717_s13, %s871_s13   ;;  %s684_s12 = sphi %s715_s12, %s870_s12  }
   0x3   : > { %p27_p1 = scmp.ge.s32.totalorder %s25_s15, 2  ;;  %p155_p2 = scmp.lt.s32.totalorder %s692_s14, 3 }
   0x5   : > { %s873_s15 = smov (%p27_p1, %s25_s15), 0  ;;  %p156_p3 = pnand %p581_p0, %p155_p2 }
   0x6   : > { %p184_p4 = scmp.lt.s32.totalorder (!%p156_p3), %s684_s12, 1 }
   0x7   : > { %159 = sbr.rel (%p156_p3) target bundleno = 232 (0xe8), region = 32 }
   0xc   : > { %v662_v0 = vld [vmem:[%s867_s1] sm:$0xff]   ;;  %vm354_vm0 = vcmask 64512   ;;  %s875_s12 = smov (!%p184_p4, %s684_s12), 1  ;;  %v694_v2 = vmov 0   ;;  %vm379_vm1 = vcmask 1043456   ;;  %v220_v5 = vld [vmem:[%s868_s2 + $0x10] sm:$0xff] }
   0xd   : > { %v663_v1 = vld [vmem:[%s867_s1 + $0x20] sm:$0xff]   ;;  %615 = vmatprep.mubr.msk.bf16.mxu0 %vm354_vm0, %v662_v0  ;;  %s582_s20 = sshll.u32 %s875_s12, 3  ;;  %661 = vset.pattern.permute.xlu1 %v694_v2  ;;  %v664_v7 = vld [vmem:[%s867_s1 + $0x8] sm:$0xff]   ;;  %v666_v10 = vld [vmem:[%s867_s1 + $0x10] sm:$0xff]   ;;  %s603_s22 = sshll.u32 %s875_s12, 7  ;;  %vm480_vm2 = vcmask 523264  }
   0xe   : > { %623 = vmatprep.mubr.msk.bf16.mxu1 %vm354_vm0, %v663_v1  ;;  %s190_s23 = scalar_lea.vmem %s866_s0, %s582_s20  ;;  %660 = vset.pattern.permute.xlu0 %v694_v2  ;;  %v665_v8 = vld [vmem:[%s867_s1 + $0x28] sm:$0xff]   ;;  %v218_v9 = vld [vmem:[%s868_s2] sm:$0xff]  ;;  %v667_v11 = vld [vmem:[%s867_s1 + $0x30] sm:$0xff]   ;;  %s823_s25 = scalar_lea.vmem %s869_s3, %s603_s22 }
   0xf   : > { %v200_v3 = vld [vmem:[%s190_s23] sm:$0xff]  ;;  %246 = vperm.xlu1 %661, %v220_v5   ;;  %236 = vperm.xlu0 %660, %v218_v9   ;;  %v221_v12 = vld [vmem:[%s868_s2 + $0x18] sm:$0xff]  ;;  %v219_v13 = vld [vmem:[%s868_s2 + $0x8] sm:$0xff] }
  0x10   : > { %v201_v4 = vpack.c.bf16 %v200_v3, %v200_v3  ;;  %v223_v14 = vld [vmem:[%s868_s2 + $0x28] sm:$0xff]  ;;  %v222_v15 = vld [vmem:[%s868_s2 + $0x20] sm:$0xff]  ;;  %v668_v16 = vld [vmem:[%s867_s1 + $0x18] sm:$0xff]  }
  0x11   : > { %v669_v17 = vld [vmem:[%s867_s1 + $0x38] sm:$0xff]   ;;  %v224_v19 = vld [vmem:[%s868_s2 + $0x30] sm:$0xff]  ;;  %v227_v20 = vld [vmem:[%s868_s2 + $0x48] sm:$0xff] }
  0x12   : > { %633 = vmatprep.subr.msk.bf16.mxu0 %vm379_vm1, %v201_v4  ;;  %634 = vmatprep.subr.msk.bf16.mxu1 %vm379_vm1, %v201_v4  ;;  %v381_v6 = vsel %vm379_vm1, %v201_v4, 0  ;;  %v225_v18 = vld [vmem:[%s868_s2 + $0x38] sm:$0xff]  ;;  %v226_v21 = vld [vmem:[%s868_s2 + $0x40] sm:$0xff]  ;;  %v228_v23 = vld [vmem:[%s868_s2 + $0x50] sm:$0xff] }
  0x13   : > { %614 = vmatpush3.bf16.msra.mxu0 %v381_v6  ;;  %632 = vmatpush3.bf16.msra.mxu1 %v381_v6  ;;  %v229_v22 = vld [vmem:[%s868_s2 + $0x58] sm:$0xff]  ;;  %v231_v24 = vld [vmem:[%s868_s2 + $0x68] sm:$0xff]  ;;  %v230_v25 = vld [vmem:[%s868_s2 + $0x60] sm:$0xff] }
  0x14   : > { %251 = vperm.xlu1 %661, %v221_v12   ;;  %241 = vperm.xlu0 %660, %v219_v13   ;;  %v233_v26 = vld [vmem:[%s868_s2 + $0x78] sm:$0xff]  ;;  %v232_v27 = vld [vmem:[%s868_s2 + $0x70] sm:$0xff] }
  0x16   : > { %616 = vmatmul.mubr.msk.bf16.vlgmr.msra.gmra.mxu0 %vm354_vm0, %v664_v7  ;;  %624 = vmatmul.mubr.msk.bf16.vlgmr.msra.gmra.mxu1 %vm354_vm0, %v665_v8 }
  0x17   : > { %619 = vmatprep.mubr.msk.bf16.mxu0 %vm354_vm0, %v666_v10  ;;  %627 = vmatprep.mubr.msk.bf16.mxu1 %vm354_vm0, %v667_v11 }
  0x18   : > { %261 = vperm.xlu1 %661, %v223_v14   ;;  %256 = vperm.xlu0 %660, %v222_v15  }
  0x1c   : > { %271 = vperm.xlu1 %661, %v225_v18   ;;  %266 = vperm.xlu0 %660, %v224_v19  }
  0x1e   : > { %620 = vmatmul.mubr.msk.bf16.gmra.mxu0 %vm354_vm0, %v668_v16  ;;  %628 = vmatmul.mubr.msk.bf16.gmra.mxu1 %vm354_vm0, %v669_v17 }
  0x20   : > { %281 = vperm.xlu1 %661, %v227_v20   ;;  %276 = vperm.xlu0 %660, %v226_v21  }
  0x24   : > { %291 = vperm.xlu1 %661, %v229_v22   ;;  %286 = vperm.xlu0 %660, %v228_v23  }
  0x28   : > { %301 = vperm.xlu1 %661, %v231_v24   ;;  %296 = vperm.xlu0 %660, %v230_v25  }
  0x2c   : > { %311 = vperm.xlu1 %661, %v233_v26   ;;  %306 = vperm.xlu0 %660, %v232_v27  }
  0x8a   : > { %v237_v28 = vpop.permute.xlu0 %236  ;;  %v247_v29 = vpop.permute.xlu1 %246 }
  0x8f   : > { %v242_v30 = vpop.permute.xlu0 %241  ;;  %v252_v31 = vpop.permute.xlu1 %251 }
  0x93   : > { %v257_v32 = vpop.permute.xlu0 %256  ;;  %v262_v33 = vpop.permute.xlu1 %261 }
  0x97   : > { %v267_v34 = vpop.permute.xlu0 %266  ;;  %v272_v35 = vpop.permute.xlu1 %271 }
  0x9b   : > { %v277_v36 = vpop.permute.xlu0 %276  ;;  %v282_v37 = vpop.permute.xlu1 %281 }
  0x9f   : > { %v287_v38 = vpop.permute.xlu0 %286  ;;  %v292_v39 = vpop.permute.xlu1 %291 }
  0xa3   : > { %v297_v42 = vpop.permute.xlu0 %296  ;;  %v302_v51 = vpop.permute.xlu1 %301 }
  0xa7   : > { %v307_v56 = vpop.permute.xlu0 %306  ;;  %v312_v1 = vpop.permute.xlu1 %311 }
  0xd6   : > { %v617_v40 = vpop.f32.mrf.mxu0  ;;  %v625_v41 = vpop.f32.mrf.mxu1 }
  0xd7   : > { %v426_v43 = vadd.f32 %v617_v40, %v247_v29  ;;  %v458_v44 = vadd.f32 %v625_v41, %v287_v38 }
  0xd8   : > { %v417_v45 = vpop.f32.mrf.mxu0  ;;  %v449_v46 = vpop.f32.mrf.mxu1 }
  0xd9   : > { %483 = vst.msk [vmem:[%s823_s25 + $0x10] sm:$0xff] %vm480_vm2, %v426_v43  ;;  %491 = vst.msk [vmem:[%s823_s25 + $0x50] sm:$0xff] %vm480_vm2, %v458_v44  ;;  %v418_v47 = vadd.f32 %v417_v45, %v237_v28  ;;  %v450_v48 = vadd.f32 %v449_v46, %v277_v36 }
  0xda   : > { %v618_v49 = vpop.f32.mrf.mxu0  ;;  %v626_v50 = vpop.f32.mrf.mxu1 }
  0xdb   : > { %481 = vst.msk [vmem:[%s823_s25] sm:$0xff] %vm480_vm2, %v418_v47  ;;  %489 = vst.msk [vmem:[%s823_s25 + $0x40] sm:$0xff] %vm480_vm2, %v450_v48  ;;  %v429_v52 = vadd.f32 %v618_v49, %v252_v31  ;;  %v461_v53 = vadd.f32 %v626_v50, %v292_v39 }
  0xdc   : > { %v420_v54 = vpop.f32.mrf.mxu0  ;;  %v452_v55 = vpop.f32.mrf.mxu1 }
  0xdd   : > { %484 = vst.msk [vmem:[%s823_s25 + $0x18] sm:$0xff] %vm480_vm2, %v429_v52  ;;  %492 = vst.msk [vmem:[%s823_s25 + $0x58] sm:$0xff] %vm480_vm2, %v461_v53  ;;  %v421_v57 = vadd.f32 %v420_v54, %v242_v30  ;;  %v453_v58 = vadd.f32 %v452_v55, %v282_v37 }
  0xde   : > { %v621_v59 = vpop.f32.mrf.mxu0  ;;  %v629_v60 = vpop.f32.mrf.mxu1 }
  0xdf   : > { %482 = vst.msk [vmem:[%s823_s25 + $0x8] sm:$0xff] %vm480_vm2, %v421_v57  ;;  %490 = vst.msk [vmem:[%s823_s25 + $0x48] sm:$0xff] %vm480_vm2, %v453_v58  ;;  %v442_v61 = vadd.f32 %v621_v59, %v267_v34  ;;  %v474_v62 = vadd.f32 %v629_v60, %v307_v56 }
  0xe0   : > { %v433_v63 = vpop.f32.mrf.mxu0  ;;  %v465_v0 = vpop.f32.mrf.mxu1 }
  0xe1   : > { %487 = vst.msk [vmem:[%s823_s25 + $0x30] sm:$0xff] %vm480_vm2, %v442_v61  ;;  %495 = vst.msk [vmem:[%s823_s25 + $0x70] sm:$0xff] %vm480_vm2, %v474_v62  ;;  %v434_v2 = vadd.f32 %v433_v63, %v257_v32  ;;  %v466_v3 = vadd.f32 %v465_v0, %v297_v42 }
  0xe2   : > { %v622_v4 = vpop.f32.mrf.mxu0  ;;  %v630_v5 = vpop.f32.mrf.mxu1 }
  0xe3   : > { %485 = vst.msk [vmem:[%s823_s25 + $0x20] sm:$0xff] %vm480_vm2, %v434_v2  ;;  %493 = vst.msk [vmem:[%s823_s25 + $0x60] sm:$0xff] %vm480_vm2, %v466_v3  ;;  %v445_v6 = vadd.f32 %v622_v4, %v272_v35  ;;  %v477_v7 = vadd.f32 %v630_v5, %v312_v1 }
  0xe4   : > { %v436_v8 = vpop.f32.mrf.mxu0  ;;  %v468_v9 = vpop.f32.mrf.mxu1 }
  0xe5   : > { %488 = vst.msk [vmem:[%s823_s25 + $0x38] sm:$0xff] %vm480_vm2, %v445_v6  ;;  %496 = vst.msk [vmem:[%s823_s25 + $0x78] sm:$0xff] %vm480_vm2, %v477_v7  ;;  %v437_v10 = vadd.f32 %v436_v8, %v262_v33  ;;  %v469_v11 = vadd.f32 %v468_v9, %v302_v51 }
  0xe7   : > { %486 = vst.msk [vmem:[%s823_s25 + $0x28] sm:$0xff] %vm480_vm2, %v437_v10  ;;  %494 = vst.msk [vmem:[%s823_s25 + $0x68] sm:$0xff] %vm480_vm2, %v469_v11 }
  0xe8 PF: > { %s13_s14 = sadd.s32 1, %s692_s14   ;;  %s870_s12 = smov %s688_s13 }
  0xe9   : > { %p10_p5 = scmp.ge.s32.totalorder %s13_s14, 4   ;;  %s871_s13 = smov %s873_s15 }
  0xeb   :  { %12 = sbr.rel (!%p10_p5) target bundleno = 2 (0x2), region = 62 }

// kernel: fpn_forward.7
= control target key start
LH: loop header
LB: loop body
LE: loop exit
PB: predicated region body
PF: predicated region fallthrough
CT: control target
= control target key end

     0   :  { %s717_s12 = smov 0   ;;  %s719_s13 = smov 0   ;;  %s868_s0 = inlined_call_operand.vmem [shape: f32[2,16,16], index: 0, kind: input, shape index: {}]   ;;  %s869_s1 = inlined_call_operand.vmem [shape: bf16[128,16], index: 1, kind: input, shape index: {}]   ;;  %s870_s2 = inlined_call_operand.vmem [shape: f32[128,1], index: 2, kind: input, shape index: {}]   ;;  %s871_s3 = inlined_call_operand.vmem [shape: f32[2,128,16], index: 3, kind: output, shape index: {}]  }
   0x1   :  { %s721_s14 = smov 0  }
   0x2 LB: > { %s25_s15 = sadd.s32 1, %s690_s13  ;;  %p583_p0 = scmp.ge.s32.totalorder %s694_s14, 1  ;;  %s694_s14 = sphi %s721_s14, %s13_s14   ;;  %s690_s13 = sphi %s719_s13, %s873_s13   ;;  %s686_s12 = sphi %s717_s12, %s872_s12  }
   0x3   : > { %p27_p1 = scmp.ge.s32.totalorder %s25_s15, 2  ;;  %p156_p2 = scmp.lt.s32.totalorder %s694_s14, 3 }
   0x5   : > { %s875_s15 = smov (%p27_p1, %s25_s15), 0  ;;  %p157_p3 = pnand %p583_p0, %p156_p2 }
   0x6   : > { %p186_p4 = scmp.lt.s32.totalorder (!%p157_p3), %s686_s12, 1 }
   0x7   : > { %160 = sbr.rel (%p157_p3) target bundleno = 232 (0xe8), region = 32 }
   0xc   : > { %v664_v0 = vld [vmem:[%s869_s1] sm:$0xff]   ;;  %vm358_vm0 = vcmask 130048   ;;  %s877_s12 = smov (!%p186_p4, %s686_s12), 1  ;;  %v696_v2 = vmov 0   ;;  %v666_v6 = vld [vmem:[%s869_s1 + $0x8] sm:$0xff]   ;;  %v224_v8 = vld [vmem:[%s870_s2 + $0x10] sm:$0xff] }
   0xd   : > { %v665_v1 = vld [vmem:[%s869_s1 + $0x20] sm:$0xff]   ;;  %619 = vmatprep.mubr.msk.bf16.mxu0 %vm358_vm0, %v664_v0  ;;  %s606_s20 = sshll.u32 %s877_s12, 4  ;;  %663 = vset.pattern.permute.xlu1 %v696_v2  ;;  %v667_v7 = vld [vmem:[%s869_s1 + $0x28] sm:$0xff]   ;;  %v668_v10 = vld [vmem:[%s869_s1 + $0x10] sm:$0xff]   ;;  %s607_s22 = sshll.u32 %s877_s12, 7 }
   0xe   : > { %627 = vmatprep.mubr.msk.bf16.mxu1 %vm358_vm0, %v665_v1  ;;  %662 = vset.pattern.permute.xlu0 %v696_v2  ;;  %s193_s23 = scalar_lea.vmem %s868_s0, %s606_s20  ;;  %v222_v9 = vld [vmem:[%s870_s2] sm:$0xff]  ;;  %v669_v11 = vld [vmem:[%s869_s1 + $0x30] sm:$0xff]   ;;  %v225_v12 = vld [vmem:[%s870_s2 + $0x18] sm:$0xff]  ;;  %s825_s25 = scalar_lea.vmem %s871_s3, %s607_s22 }
   0xf   : > { %v203_v3 = vld [vmem:[%s193_s23] sm:$0xff]  ;;  %v204_v4 = vld [vmem:[%s193_s23 + $0x8] sm:$0xff]  ;;  %250 = vperm.xlu1 %663, %v224_v8   ;;  %240 = vperm.xlu0 %662, %v222_v9   ;;  %v670_v16 = vld [vmem:[%s869_s1 + $0x18] sm:$0xff]  }
  0x10   : > { %v205_v5 = vpack.c.bf16 %v204_v4, %v203_v3  ;;  %v223_v13 = vld [vmem:[%s870_s2 + $0x8] sm:$0xff]  ;;  %v226_v15 = vld [vmem:[%s870_s2 + $0x20] sm:$0xff]  ;;  %v671_v17 = vld [vmem:[%s869_s1 + $0x38] sm:$0xff]  }
  0x11   : > { %v227_v14 = vld [vmem:[%s870_s2 + $0x28] sm:$0xff]  ;;  %v229_v18 = vld [vmem:[%s870_s2 + $0x38] sm:$0xff]  ;;  %v228_v19 = vld [vmem:[%s870_s2 + $0x30] sm:$0xff] }
  0x12   : > { %617 = vmatprep.subr.bf16.mxu0 %v205_v5  ;;  %635 = vmatprep.subr.bf16.mxu1 %v205_v5  ;;  %v231_v20 = vld [vmem:[%s870_s2 + $0x48] sm:$0xff]  ;;  %v230_v21 = vld [vmem:[%s870_s2 + $0x40] sm:$0xff]  ;;  %v233_v22 = vld [vmem:[%s870_s2 + $0x58] sm:$0xff] }
  0x13   : > { %618 = vmatpush3.bf16.msra.mxu0 %v205_v5  ;;  %636 = vmatpush3.bf16.msra.mxu1 %v205_v5  ;;  %v232_v23 = vld [vmem:[%s870_s2 + $0x50] sm:$0xff]  ;;  %v235_v24 = vld [vmem:[%s870_s2 + $0x68] sm:$0xff]  ;;  %v234_v25 = vld [vmem:[%s870_s2 + $0x60] sm:$0xff] }
  0x14   : > { %255 = vperm.xlu1 %663, %v225_v12   ;;  %245 = vperm.xlu0 %662, %v223_v13   ;;  %v237_v26 = vld [vmem:[%s870_s2 + $0x78] sm:$0xff]  ;;  %v236_v27 = vld [vmem:[%s870_s2 + $0x70] sm:$0xff] }
  0x16   : > { %620 = vmatmul.mubr.msk.bf16.vlgmr.msra.gmra.mxu0 %vm358_vm0, %v666_v6  ;;  %628 = vmatmul.mubr.msk.bf16.vlgmr.msra.gmra.mxu1 %vm358_vm0, %v667_v7 }
  0x17   : > { %623 = vmatprep.mubr.msk.bf16.mxu0 %vm358_vm0, %v668_v10  ;;  %631 = vmatprep.mubr.msk.bf16.mxu1 %vm358_vm0, %v669_v11 }
  0x18   : > { %265 = vperm.xlu1 %663, %v227_v14   ;;  %260 = vperm.xlu0 %662, %v226_v15  }
  0x1c   : > { %275 = vperm.xlu1 %663, %v229_v18   ;;  %270 = vperm.xlu0 %662, %v228_v19  }
  0x1e   : > { %624 = vmatmul.mubr.msk.bf16.gmra.mxu0 %vm358_vm0, %v670_v16  ;;  %632 = vmatmul.mubr.msk.bf16.gmra.mxu1 %vm358_vm0, %v671_v17 }
  0x20   : > { %285 = vperm.xlu1 %663, %v231_v20   ;;  %280 = vperm.xlu0 %662, %v230_v21  }
  0x24   : > { %295 = vperm.xlu1 %663, %v233_v22   ;;  %290 = vperm.xlu0 %662, %v232_v23  }
  0x28   : > { %305 = vperm.xlu1 %663, %v235_v24   ;;  %300 = vperm.xlu0 %662, %v234_v25  }
  0x2c   : > { %315 = vperm.xlu1 %663, %v237_v26   ;;  %310 = vperm.xlu0 %662, %v236_v27  }
  0x8a   : > { %v241_v28 = vpop.permute.xlu0 %240  ;;  %v251_v29 = vpop.permute.xlu1 %250 }
  0x8f   : > { %v246_v30 = vpop.permute.xlu0 %245  ;;  %v256_v31 = vpop.permute.xlu1 %255 }
  0x93   : > { %v261_v32 = vpop.permute.xlu0 %260  ;;  %v266_v33 = vpop.permute.xlu1 %265 }
  0x97   : > { %v271_v34 = vpop.permute.xlu0 %270  ;;  %v276_v35 = vpop.permute.xlu1 %275 }
  0x9b   : > { %v281_v36 = vpop.permute.xlu0 %280  ;;  %v286_v37 = vpop.permute.xlu1 %285 }
  0x9f   : > { %v291_v38 = vpop.permute.xlu0 %290  ;;  %v296_v39 = vpop.permute.xlu1 %295 }
  0xa3   : > { %v301_v42 = vpop.permute.xlu0 %300  ;;  %v306_v51 = vpop.permute.xlu1 %305 }
  0xa7   : > { %v311_v56 = vpop.permute.xlu0 %310  ;;  %v316_v1 = vpop.permute.xlu1 %315 }
  0xd6   : > { %v621_v40 = vpop.f32.mrf.mxu0  ;;  %v629_v41 = vpop.f32.mrf.mxu1 }
  0xd7   : > { %v426_v43 = vadd.f32 %v621_v40, %v251_v29  ;;  %v458_v44 = vadd.f32 %v629_v41, %v291_v38 }
  0xd8   : > { %v417_v45 = vpop.f32.mrf.mxu0  ;;  %v449_v46 = vpop.f32.mrf.mxu1 }
  0xd9   : > { %482 = vst.msk [vmem:[%s825_s25 + $0x10] sm:$0xff] %vm358_vm0, %v426_v43  ;;  %490 = vst.msk [vmem:[%s825_s25 + $0x50] sm:$0xff] %vm358_vm0, %v458_v44  ;;  %v418_v47 = vadd.f32 %v417_v45, %v241_v28  ;;  %v450_v48 = vadd.f32 %v449_v46, %v281_v36 }
  0xda   : > { %v622_v49 = vpop.f32.mrf.mxu0  ;;  %v630_v50 = vpop.f32.mrf.mxu1 }
  0xdb   : > { %480 = vst.msk [vmem:[%s825_s25] sm:$0xff] %vm358_vm0, %v418_v47  ;;  %488 = vst.msk [vmem:[%s825_s25 + $0x40] sm:$0xff] %vm358_vm0, %v450_v48  ;;  %v429_v52 = vadd.f32 %v622_v49, %v256_v31  ;;  %v461_v53 = vadd.f32 %v630_v50, %v296_v39 }
  0xdc   : > { %v420_v54 = vpop.f32.mrf.mxu0  ;;  %v452_v55 = vpop.f32.mrf.mxu1 }
  0xdd   : > { %483 = vst.msk [vmem:[%s825_s25 + $0x18] sm:$0xff] %vm358_vm0, %v429_v52  ;;  %491 = vst.msk [vmem:[%s825_s25 + $0x58] sm:$0xff] %vm358_vm0, %v461_v53  ;;  %v421_v57 = vadd.f32 %v420_v54, %v246_v30  ;;  %v453_v58 = vadd.f32 %v452_v55, %v286_v37 }
  0xde   : > { %v625_v59 = vpop.f32.mrf.mxu0  ;;  %v633_v60 = vpop.f32.mrf.mxu1 }
  0xdf   : > { %481 = vst.msk [vmem:[%s825_s25 + $0x8] sm:$0xff] %vm358_vm0, %v421_v57  ;;  %489 = vst.msk [vmem:[%s825_s25 + $0x48] sm:$0xff] %vm358_vm0, %v453_v58  ;;  %v442_v61 = vadd.f32 %v625_v59, %v271_v34  ;;  %v474_v62 = vadd.f32 %v633_v60, %v311_v56 }
  0xe0   : > { %v433_v63 = vpop.f32.mrf.mxu0  ;;  %v465_v0 = vpop.f32.mrf.mxu1 }
  0xe1   : > { %486 = vst.msk [vmem:[%s825_s25 + $0x30] sm:$0xff] %vm358_vm0, %v442_v61  ;;  %494 = vst.msk [vmem:[%s825_s25 + $0x70] sm:$0xff] %vm358_vm0, %v474_v62  ;;  %v434_v2 = vadd.f32 %v433_v63, %v261_v32  ;;  %v466_v3 = vadd.f32 %v465_v0, %v301_v42 }
  0xe2   : > { %v626_v4 = vpop.f32.mrf.mxu0  ;;  %v634_v5 = vpop.f32.mrf.mxu1 }
  0xe3   : > { %484 = vst.msk [vmem:[%s825_s25 + $0x20] sm:$0xff] %vm358_vm0, %v434_v2  ;;  %492 = vst.msk [vmem:[%s825_s25 + $0x60] sm:$0xff] %vm358_vm0, %v466_v3  ;;  %v445_v6 = vadd.f32 %v626_v4, %v276_v35  ;;  %v477_v7 = vadd.f32 %v634_v5, %v316_v1 }
  0xe4   : > { %v436_v8 = vpop.f32.mrf.mxu0  ;;  %v468_v9 = vpop.f32.mrf.mxu1 }
  0xe5   : > { %487 = vst.msk [vmem:[%s825_s25 + $0x38] sm:$0xff] %vm358_vm0, %v445_v6  ;;  %495 = vst.msk [vmem:[%s825_s25 + $0x78] sm:$0xff] %vm358_vm0, %v477_v7  ;;  %v437_v10 = vadd.f32 %v436_v8, %v266_v33  ;;  %v469_v11 = vadd.f32 %v468_v9, %v306_v51 }
  0xe7   : > { %485 = vst.msk [vmem:[%s825_s25 + $0x28] sm:$0xff] %vm358_vm0, %v437_v10  ;;  %493 = vst.msk [vmem:[%s825_s25 + $0x68] sm:$0xff] %vm358_vm0, %v469_v11 }
  0xe8 PF: > { %s13_s14 = sadd.s32 1, %s694_s14   ;;  %s872_s12 = smov %s690_s13 }
  0xe9   : > { %p10_p5 = scmp.ge.s32.totalorder %s13_s14, 4   ;;  %s873_s13 = smov %s875_s15 }
  0xeb   :  { %12 = sbr.rel (!%p10_p5) target bundleno = 2 (0x2), region = 62 }

// kernel: fpn_forward.8
= control target key start
LH: loop header
LB: loop body
LE: loop exit
PB: predicated region body
PF: predicated region fallthrough
CT: control target
= control target key end

     0   :  { %8 = vsyncpa [#allocation3], 0  ;;  %s1132_s12 = smov 0   ;;  %s1134_s13 = smov 0   ;;  %s1248_s0 = inlined_call_operand.vmem [shape: bf16[2,1,4,24,16], index: 0, kind: input, shape index: {}]   ;;  %s1249_s1 = inlined_call_operand.vmem [shape: bf16[9,16,128], index: 1, kind: input, shape index: {}]   ;;  %s1250_s2 = inlined_call_operand.hbm [shape: f32[1,128], index: 2, kind: input, shape index: {}]   ;;  %s1251_s3 = inlined_call_operand.vmem [shape: f32[2,1,2,2,128], index: 3, kind: output, shape index: {}]  }
   0x1   :  { %s1136_s14 = smov 0  }
   0x2 LB: > { %s868_s15 = sadd.s32 4294967295, %s1107_s14   ;;  %s26_s16 = sadd.s32 1, %s1103_s13  ;;  %s1107_s14 = sphi %s1136_s14, %s14_s14   ;;  %s1103_s13 = sphi %s1134_s13, %s1255_s13   ;;  %s1099_s12 = sphi %s1132_s12, %s1254_s12  }
   0x3   : > { %p28_p0 = scmp.ge.s32.totalorder %s26_s16, 2  ;;  %p870_p1 = scmp.ge.s32.totalorder %s1107_s14, 1 }
   0x4   : > { %p129_p2 = scmp.lt.s32.totalorder %s1107_s14, 3  ;;  %p1157_p4 = scmp.eq.s32.totalorder %s868_s15, 0 }
   0x5   : > { %s1257_s16 = smov (%p28_p0, %s26_s16), 0  ;;  %s1109_s19 = smov [#allocation2]  }
   0x6   : > { %p1153_p3 = pnand %p870_p1, %p129_p2  ;;  %s145_s20 = sshll.u32 %s1109_s19, 4  ;;  %s146_s20 = int_to_ptr.vmem [resolvable:$true] %s145_s20 }
   0x7   : > { %s1066_s21 = scalar_lea.vmem %s146_s20, 16  ;;  %s1073_s22 = scalar_lea.vmem %s146_s20, 32 }
   0x8   : > { %p1007_p5 = pneg %p1153_p3  ;;  %p1067_p8 = scmp.ne.s32.totalorder %s146_s20, %s1066_s21 }
   0x9   : > { %p1074_p11 = scmp.lt.s32.totalorder %s146_s20, %s146_s20  ;;  %p1075_p12 = scmp.lt.s32.totalorder %s1073_s22, %s1066_s21 }
   0xa   : > { %p1008_p6 = pnand %p1157_p4, %p1007_p5 }
   0xb   : > { %p1076_p13 = por %p1075_p12, %p1074_p11 }
   0xc   : > { %p1057_p7 = pneg %p1008_p6 }
   0xe   : > { %p1069_p9 = pnand %p1067_p8, %p1057_p7 }
  0x10   : > { %p1070_p10 = pneg %p1069_p9 }
  0x12   : > { %p1077_p0 = pnand %p1076_p13, %p1070_p10 }
  0x14   : > { %1080 = shalt.err (!%p1077_p0)
}
  0x15   : > { %1010 = dma.hbm_to_vmem [thread:$0]  (!%p1008_p6), %s1250_s2, 16, %s146_s20, [#allocation3]  }
  0x16   : > { %170 = sbr.rel (%p1153_p3) target bundleno = 273 (0x111), region = 32 }
  0x1b   : > { %1094 = dma.done.wait (%p1157_p4), [#allocation3], 16  }
  0x1c   : > { %1096 = vsyncadd (%p1157_p4), [#allocation3], 4294967280  ;;  %p202_p1 = scmp.lt.s32.totalorder %s1099_s12, 1  ;;  %v1110_v0 = vmov 0.0   ;;  %vm1111_vm0 = vmmov 0   ;;  %v1040_v1 = vld [vmem:[%s1249_s1 + $0x8] sm:$0xff]  }
  0x1d   : > { %948 = vmatprep.subr.bf16.mxu0 %v1110_v0  ;;  %954 = vmatprep.subr.bf16.mxu1 %v1110_v0  ;;  %v1041_v2 = vld [vmem:[%s1249_s1] sm:$0xff]   ;;  %vm242_vm1 = vcmask 130048   ;;  %v1044_v5 = vld [vmem:[%s1249_s1 + $0x18] sm:$0xff]   ;;  %v1048_v9 = vld [vmem:[%s1249_s1 + $0x28] sm:$0xff]  }
  0x1e   : > { %950 = vmatprep.mubr.msk.bf16.mxu0 %vm1111_vm0, %v1110_v0  ;;  %956 = vmatprep.mubr.msk.bf16.mxu1 %vm1111_vm0, %v1110_v0  ;;  %s1259_s12 = smov (!%p202_p1, %s1099_s12), 1  ;;  %v1045_v6 = vld [vmem:[%s1249_s1 + $0x20] sm:$0xff]   ;;  %v1049_v10 = vld [vmem:[%s1249_s1 + $0x10] sm:$0xff]   ;;  %v1051_v12 = vld [vmem:[%s1249_s1 + $0x38] sm:$0xff]  }
  0x1f   : > { %s1002_s25 = smul.u32 48, %s1259_s12  ;;  %949 = vmatpush3.bf16.msra.mxu0 %v1040_v1  ;;  %955 = vmatpush3.bf16.msra.mxu1 %v1041_v2  ;;  %v1050_v11 = vld [vmem:[%s1249_s1 + $0x30] sm:$0xff]   ;;  %v1053_v14 = vld [vmem:[%s1249_s1 + $0x40] sm:$0xff]   ;;  %s929_s24 = sshll.u32 %s1259_s12, 2 }
  0x20   : > { %960 = vmatprep.subr.bf16.mxu0 %v1110_v0  ;;  %966 = vmatprep.subr.bf16.mxu1 %v1110_v0  ;;  %v926_v63 = vld [vmem:[#allocation2] ss:$0 sm:$0xff]  ;;  %s219_s27 = scalar_lea.vmem %s1251_s3, %s929_s24 }
  0x21   : > { %s1184_s28 = scalar_lea.vmem %s1248_s0, %s1002_s25 }
  0x22   : > { %v1042_v3 = vld [vmem:[%s1184_s28 + $0xc] sm:$0xff]   ;;  %v1043_v4 = vld [vmem:[%s1184_s28] sm:$0xff]   ;;  %v1046_v7 = vld [vmem:[%s1184_s28 + $0x18] sm:$0xff]  }
  0x23   : > { %951 = vmatmul.mubr.msk.bf16.vlgmr.msra.gmra.mxu0 %vm242_vm1, %v1042_v3  ;;  %957 = vmatmul.mubr.msk.bf16.vlgmr.msra.gmra.mxu1 %vm242_vm1, %v1043_v4  ;;  %v1047_v8 = vld [vmem:[%s1184_s28 + $0x24] sm:$0xff]   ;;  %v1054_v15 = vld [vmem:[%s1184_s28 + $0x10] sm:$0xff]  }
  0x24   : > { %961 = vmatpush3.bf16.msra.mxu0 %v1044_v5  ;;  %967 = vmatpush3.bf16.msra.mxu1 %v1045_v6  ;;  %v1052_v13 = vld [vmem:[%s1184_s28 + $0x4] sm:$0xff]  }
  0x25   : > { %962 = vmatprep.mubr.msk.bf16.mxu0 %vm1111_vm0, %v1110_v0  ;;  %968 = vmatprep.mubr.msk.bf16.mxu1 %vm1111_vm0, %v1110_v0 }
  0x26   : > { %972 = vmatprep.subr.bf16.mxu0 %v1110_v0  ;;  %978 = vmatprep.subr.bf16.mxu1 %v1110_v0 }
  0x2b   : > { %963 = vmatmul.mubr.msk.bf16.vlgmr.msra.gmra.mxu0 %vm242_vm1, %v1046_v7  ;;  %969 = vmatmul.mubr.msk.bf16.vlgmr.msra.gmra.mxu1 %vm242_vm1, %v1047_v8 }
  0x2c   : > { %973 = vmatpush3.bf16.msra.mxu0 %v1048_v9  ;;  %979 = vmatpush3.bf16.msra.mxu1 %v1049_v10 }
  0x2d   : > { %974 = vmatprep.mubr.msk.bf16.mxu0 %vm1111_vm0, %v1110_v0  ;;  %980 = vmatprep.mubr.msk.bf16.mxu1 %vm1111_vm0, %v1110_v0 }
  0x2e   : > { %984 = vmatprep.subr.bf16.mxu0 %v1110_v0  ;;  %990 = vmatprep.subr.bf16.mxu1 %v1110_v0 }
  0x33   : > { %975 = vmatmul.mubr.msk.bf16.vlgmr.msra.gmra.mxu0 %vm242_vm1, %v1046_v7  ;;  %981 = vmatmul.mubr.msk.bf16.vlgmr.msra.gmra.mxu1 %vm242_vm1, %v1043_v4 }
  0x34   : > { %985 = vmatpush3.bf16.msra.mxu0 %v1050_v11  ;;  %986 = vmatprep.mubr.msk.bf16.mxu0 %vm1111_vm0, %v1110_v0 }
  0x35   : > { %991 = vmatpush3.bf16.msra.mxu1 %v1051_v12  ;;  %996 = vmatprep.subr.bf16.mxu0 %v1110_v0 }
  0x36   : > { %992 = vmatprep.mubr.msk.bf16.mxu1 %vm1111_vm0, %v1110_v0 }
  0x3b   : > { %987 = vmatmul.mubr.msk.bf16.vlgmr.msra.gmra.mxu0 %vm242_vm1, %v1052_v13  ;;  %993 = vmatmul.mubr.msk.bf16.vlgmr.msra.gmra.mxu1 %vm242_vm1, %v1054_v15 }
  0x3c   : > { %997 = vmatpush3.bf16.msra.mxu0 %v1053_v14  ;;  %998 = vmatprep.mubr.msk.bf16.mxu0 %vm1111_vm0, %v1110_v0 }
  0x43   : > { %999 = vmatmul.mubr.msk.bf16.vlgmr.msra.gmra.mxu0 %vm242_vm1, %v1052_v13 }
  0xe3   : > { %v280_v16 = vpop.f32.mrf.mxu0  ;;  %v335_v17 = vpop.f32.mrf.mxu1 }
  0xe4   : > { %v336_v39 = vadd.f32 %v335_v17, %v280_v16 }
  0xe5   : > { %v952_v18 = vpop.f32.mrf.mxu0  ;;  %v958_v19 = vpop.f32.mrf.mxu1 }
  0xe7   : > { %v283_v20 = vpop.f32.mrf.mxu0  ;;  %v338_v21 = vpop.f32.mrf.mxu1 }
  0xe8   : > { %v339_v45 = vadd.f32 %v338_v21, %v283_v20 }
  0xe9   : > { %v953_v22 = vpop.f32.mrf.mxu0  ;;  %v959_v23 = vpop.f32.mrf.mxu1 }
  0xeb   : > { %v399_v24 = vpop.f32.mrf.mxu0  ;;  %v462_v25 = vpop.f32.mrf.mxu1 }
  0xec   : > { %v406_v42 = vadd.f32 %v399_v24, %v336_v39 }
  0xed   : > { %v964_v26 = vpop.f32.mrf.mxu0  ;;  %v970_v27 = vpop.f32.mrf.mxu1 }
  0xee   : > { %v469_v48 = vadd.f32 %v462_v25, %v406_v42 }
  0xef   : > { %v402_v28 = vpop.f32.mrf.mxu0  ;;  %v465_v29 = vpop.f32.mrf.mxu1 }
  0xf0   : > { %v407_v49 = vadd.f32 %v402_v28, %v339_v45 }
  0xf1   : > { %v965_v30 = vpop.f32.mrf.mxu0  ;;  %v971_v31 = vpop.f32.mrf.mxu1 }
  0xf2   : > { %v470_v56 = vadd.f32 %v465_v29, %v407_v49 }
  0xf3   : > { %v514_v32 = vpop.f32.mrf.mxu0  ;;  %v561_v33 = vpop.f32.mrf.mxu1 }
  0xf4   : > { %v562_v52 = vadd.f32 %v561_v33, %v514_v32 }
  0xf5   : > { %v976_v34 = vpop.f32.mrf.mxu0  ;;  %v982_v35 = vpop.f32.mrf.mxu1 }
  0xf7   : > { %v517_v36 = vpop.f32.mrf.mxu0  ;;  %v564_v37 = vpop.f32.mrf.mxu1 }
  0xf8   : > { %v565_v59 = vadd.f32 %v564_v37, %v517_v36 }
  0xf9   : > { %v977_v38 = vpop.f32.mrf.mxu0  ;;  %v983_v40 = vpop.f32.mrf.mxu1 }
  0xfb   : > { %v621_v41 = vpop.f32.mrf.mxu0  ;;  %v683_v43 = vpop.f32.mrf.mxu1 }
  0xfc   : > { %v628_v53 = vadd.f32 %v621_v41, %v469_v48 }
  0xfd   : > { %v988_v44 = vpop.f32.mrf.mxu0  ;;  %v994_v46 = vpop.f32.mrf.mxu1 }
  0xfe   : > { %v690_v60 = vadd.f32 %v683_v43, %v628_v53 }
  0xff   : > { %v624_v47 = vpop.f32.mrf.mxu0  ;;  %v686_v50 = vpop.f32.mrf.mxu1 }
 0x100   : > { %v629_v61 = vadd.f32 %v624_v47, %v470_v56 }
 0x101   : > { %v989_v51 = vpop.f32.mrf.mxu0  ;;  %v995_v54 = vpop.f32.mrf.mxu1 }
 0x102   : > { %v691_v4 = vadd.f32 %v686_v50, %v629_v61 }
 0x103   : > { %v735_v55 = vpop.f32.mrf.mxu0 }
 0x104   : > { %v742_v57 = vadd.f32 %v735_v55, %v562_v52 }
 0x105   : > { %v1000_v58 = vpop.f32.mrf.mxu0 }
 0x106   : > { %v746_v62 = vrot.slane %v742_v57, 1 }
 0x107   : > { %v738_v0 = vpop.f32.mrf.mxu0 }
 0x108   : > { %v750_v1 = vadd.f32 %v746_v62, %v690_v60  ;;  %v743_v2 = vadd.f32 %v738_v0, %v565_v59 }
 0x109   : > { %v1001_v3 = vpop.f32.mrf.mxu0 }
 0x10a   : > { %v759_v5 = vadd.f32 %v926_v63, %v750_v1  ;;  %v747_v6 = vrot.slane %v743_v2, 1 }
 0x10c   : > { %761 = vst [vmem:[%s219_s27] sm:$0x3] %v759_v5  ;;  %v751_v7 = vadd.f32 %v747_v6, %v691_v4 }
 0x10e   : > { %v760_v8 = vadd.f32 %v926_v63, %v751_v7 }
 0x110   : > { %762 = vst [vmem:[%s219_s27 + $0x2] sm:$0x3] %v760_v8 }
 0x111 PF: > { %s14_s14 = sadd.s32 1, %s1107_s14   ;;  %s1254_s12 = smov %s1103_s13 }
 0x112   : > { %p11_p2 = scmp.ge.s32.totalorder %s14_s14, 4   ;;  %s1255_s13 = smov %s1257_s16 }
 0x114   :  { %13 = sbr.rel (!%p11_p2) target bundleno = 2 (0x2), region = 78 }
 0x119   :  { %792 = vsyncpa [#allocation3], 1 }
 0x11a   :  { %794 = vsyncpa [#allocation3 + $0x1], 1 }

// kernel: fpn_forward.9
= control target key start
LH: loop header
LB: loop body
LE: loop exit
PB: predicated region body
PF: predicated region fallthrough
CT: control target
= control target key end

     0   :  { %8 = vsyncpa [#allocation3], 0  ;;  %s2375_s0 = inlined_call_operand.vmem [shape: bf16[2,1,4,16,128], index: 0, kind: input, shape index: {}]   ;;  %s2376_s1 = inlined_call_operand.vmem [shape: bf16[9,128,128], index: 1, kind: input, shape index: {}]   ;;  %s2377_s2 = inlined_call_operand.vmem [shape: f32[1,128], index: 2, kind: input, shape index: {}]   ;;  %s2378_s3 = inlined_call_operand.hbm [shape: f32[2,1,1,1,128], index: 3, kind: output, shape index: {}]  }
   0x1   :  { %10 = vsyncpa [#allocation3 + $0x1], 0  ;;  %s1955_s12 = smov 0   ;;  %s1957_s13 = smov 0  }
   0x2   :  { %s1959_s14 = smov 0   ;;  %s1961_s15 = smov 0  }
   0x3   :  { %s1963_s16 = smov 0   ;;  %s1965_s17 = smov 0  }
   0x4 LB: > { %s1249_s18 = sadd.s32 4294967295, %s1930_s17   ;;  %s1250_s19 = sadd.s32 4294967294, %s1930_s17   ;;  %s1930_s17 = sphi %s1965_s17, %s16_s17   ;;  %s1926_s16 = sphi %s1963_s16, %s2385_s16   ;;  %s1922_s15 = sphi %s1961_s15, %s2384_s15   ;;  %s1918_s14 = sphi %s1959_s14, %s2383_s14   ;;  %s1914_s13 = sphi %s1957_s13, %s2382_s13   ;;  %s1910_s12 = sphi %s1955_s12, %s2381_s12  }
   0x5   : > { %s28_s20 = sadd.s32 1, %s1926_s16  ;;  %s107_s21 = sadd.s32 1, %s1918_s14 }
   0x6   : > { %p30_p0 = scmp.ge.s32.totalorder %s28_s20, 2  ;;  %p117_p1 = scmp.ne.s32.totalorder %s1918_s14, %s1914_s13 }
   0x7   : > { %p118_p2 = scmp.eq.s32.totalorder %s1249_s18, 1  ;;  %p123_p3 = scmp.ne.s32.totalorder %s1914_s13, %s1910_s12 }
   0x8   : > { %s2387_s20 = smov (%p30_p0, %s28_s20), 0  ;;  %p124_p5 = scmp.eq.s32.totalorder %s1250_s19, 1 }
   0x9   : > { %p1995_p4 = por %p118_p2, %p117_p1  ;;  %s102_s23 = ssub.s32 %s1926_s16, %s2387_s20 }
   0xa   : > { %p1253_p6 = scmp.ge.s32.totalorder %s1930_s17, 1  ;;  %p105_p7 = scmp.eq.s32.totalorder %s102_s23, 0 }
   0xb   : > { %p2002_p8 = por %p124_p5, %p123_p3  ;;  %p160_p9 = scmp.lt.s32.totalorder %s1930_s17, 3 }
   0xc   : > { %s2008_s25 = scalar_select %p105_p7, %s1918_s14, %s107_s21  }
   0xd   : > { %p161_p10 = pnand %p1253_p6, %p160_p9 }
   0xe   : > { %p187_p11 = scmp.lt.s32.totalorder (!%p161_p10), %s1922_s15, 1  ;;  %s185_s28 = sand.u32 (!%p161_p10), 1, %s1914_s13  }
   0xf   : > { %164 = sbr.rel (%p161_p10) target bundleno = 395 (0x18b), region = 32  ;;  %s186_s5 = scalar_lea.vmem (!%p161_p10), [#allocation2], %s185_s28 }
  0x10   : > { %s1176_s6 = sshll.u32 (!%p161_p10), %s186_s5, 4  ;;  %s1934_s11 = smov (!%p161_p10), [#allocation2]   ;;  %s1177_s6 = int_to_ptr.vmem [resolvable:$true] %s1176_s6 }
  0x11   : > { %s1854_s10 = scalar_lea.vmem (!%p161_p10), %s1177_s6, 16  ;;  %s1858_s18 = sshll.u32 (!%p161_p10), %s1934_s11, 4  ;;  %s1859_s18 = int_to_ptr.vmem [resolvable:$false] %s1858_s18 }
  0x12   : > { %p1855_p12 = scmp.ne.s32.totalorder (!%p161_p10), %s1177_s6, %s1854_s10  ;;  %p1861_p1 = scmp.lt.s32.totalorder (!%p161_p10), %s1177_s6, %s1859_s18 }
  0x14   : > { %v1782_v0 = vld [vmem:[%s2376_s1 + $0x78] sm:$0xff]   ;;  %v1932_v1 = vmov 0.0   ;;  %v1784_v3 = vld [vmem:[%s2376_s1 + $0x70] sm:$0xff]   ;;  %vm1933_vm0 = vmmov 0   ;;  %v1786_v5 = vld [vmem:[%s2376_s1 + $0x68] sm:$0xff]   ;;  %s188_s4 = scalar_select %p187_p11, %s1922_s15, 1 }
  0x15   : > { %1545 = vmatprep.subr.bf16.mxu0 %v1932_v1  ;;  %1565 = vmatprep.subr.bf16.mxu1 %v1932_v1  ;;  %v1783_v2 = vld [vmem:[%s2376_s1 + $0x38] sm:$0xff]   ;;  %v1785_v4 = vld [vmem:[%s2376_s1 + $0x30] sm:$0xff]   ;;  %v1787_v6 = vld [vmem:[%s2376_s1 + $0x28] sm:$0xff]   ;;  %p1856_p13 = pnand %p1855_p12, %p1995_p4 }
  0x16   : > { %1546 = vmatpush3.bf16.msra.mxu0 %v1782_v0  ;;  %1561 = vmatprep.mubr.msk.bf16.mxu0 %vm1933_vm0, %v1932_v1  ;;  %v1788_v7 = vld [vmem:[%s2376_s1 + $0x60] sm:$0xff]   ;;  %v1790_v9 = vld [vmem:[%s2376_s1 + $0x58] sm:$0xff]   ;;  %v1792_v11 = vld [vmem:[%s2376_s1 + $0x50] sm:$0xff]   ;;  %s1463_s9 = sshll.u32 %s188_s4, 5  ;;  %s1460_s4 = sshll.u32 %s1922_s15, 4 }
  0x17   : > { %1566 = vmatpush3.bf16.msra.mxu1 %v1783_v2  ;;  %1547 = vmatprep.subr.bf16.mxu0 %v1932_v1  ;;  %v1789_v8 = vld [vmem:[%s2376_s1 + $0x20] sm:$0xff]   ;;  %v1791_v10 = vld [vmem:[%s2376_s1 + $0x18] sm:$0xff]   ;;  %v1793_v12 = vld [vmem:[%s2376_s1 + $0x10] sm:$0xff]   ;;  %s2075_s21 = scalar_lea.vmem %s2375_s0, %s1463_s9  ;;  %s1174_s8 = scalar_lea.hbm %s2378_s3, %s1460_s4 }
  0x18   : > { %1567 = vmatprep.subr.bf16.mxu1 %v1932_v1  ;;  %1581 = vmatprep.mubr.msk.bf16.mxu1 %vm1933_vm0, %v1932_v1  ;;  %v1794_v13 = vld [vmem:[%s2376_s1 + $0x48] sm:$0xff]   ;;  %v1796_v15 = vld [vmem:[%s2376_s1 + $0x40] sm:$0xff]   ;;  %v1798_v19 = vld [vmem:[%s2376_s1 + $0xf8] sm:$0xff]   ;;  %s1163_s9 = scalar_lea.sflag [#allocation3], %s185_s28  ;;  %p1857_p0 = pneg %p1856_p13 }
  0x19   : > { %v1795_v14 = vld [vmem:[%s2376_s1 + $0x8] sm:$0xff]   ;;  %v1797_v16 = vld [vmem:[%s2376_s1] sm:$0xff]   ;;  %v1799_v20 = vld [vmem:[%s2376_s1 + $0x138] sm:$0xff]   ;;  %s1860_s15 = scalar_lea.vmem %s1859_s18, 32 }
  0x1a   : > { %1548 = vmatpush3.bf16.msra.mxu0 %v1784_v3  ;;  %v1256_v17 = vld [vmem:[%s2075_s21 + $0x8] sm:$0xf]  ;;  %v2087_v18 = vld [vmem:[%s2075_s21] sm:$0xf]  ;;  %v1800_v21 = vld [vmem:[%s2376_s1 + $0xf0] sm:$0xff]   ;;  %p1862_p2 = scmp.lt.s32.totalorder %s1860_s15, %s1854_s10 }
  0x1b   : > { %1568 = vmatpush3.bf16.msra.mxu1 %v1785_v4  ;;  %1549 = vmatprep.subr.bf16.mxu0 %v1932_v1  ;;  %v1801_v22 = vld [vmem:[%s2376_s1 + $0x130] sm:$0xff]   ;;  %v1802_v23 = vld [vmem:[%s2376_s1 + $0xe8] sm:$0xff]   ;;  %v1804_v25 = vld [vmem:[%s2376_s1 + $0xe0] sm:$0xff]  }
  0x1c   : > { %1569 = vmatprep.subr.bf16.mxu1 %v1932_v1  ;;  %v1803_v24 = vld [vmem:[%s2376_s1 + $0x128] sm:$0xff]   ;;  %v1805_v26 = vld [vmem:[%s2376_s1 + $0x120] sm:$0xff]   ;;  %v1806_v27 = vld [vmem:[%s2376_s1 + $0xd8] sm:$0xff]   ;;  %p1863_p3 = por %p1862_p2, %p1861_p1 }
  0x1d   : > { %v1807_v28 = vld [vmem:[%s2376_s1 + $0x118] sm:$0xff]   ;;  %v1808_v29 = vld [vmem:[%s2376_s1 + $0xd0] sm:$0xff]   ;;  %v1810_v31 = vld [vmem:[%s2376_s1 + $0xc8] sm:$0xff]  }
  0x1e   : > { %1550 = vmatpush3.bf16.msra.mxu0 %v1786_v5  ;;  %v1809_v30 = vld [vmem:[%s2376_s1 + $0x110] sm:$0xff]   ;;  %v1811_v32 = vld [vmem:[%s2376_s1 + $0x108] sm:$0xff]   ;;  %v1812_v33 = vld [vmem:[%s2376_s1 + $0xc0] sm:$0xff]   ;;  %p1864_p5 = pnand %p1863_p3, %p1857_p0 }
  0x1f   : > { %1570 = vmatpush3.bf16.msra.mxu1 %v1787_v6  ;;  %1551 = vmatprep.subr.bf16.mxu0 %v1932_v1  ;;  %v1813_v34 = vld [vmem:[%s2376_s1 + $0x100] sm:$0xff]   ;;  %v1305_v35 = vld [vmem:[%s2075_s21 + $0x10] sm:$0xf]  ;;  %v1814_v36 = vld [vmem:[%s2376_s1 + $0x178] sm:$0xff]  }
  0x20   : > { %1571 = vmatprep.subr.bf16.mxu1 %v1932_v1  ;;  %v1330_v37 = vld [vmem:[%s2075_s21 + $0x18] sm:$0xf]  ;;  %v1816_v39 = vld [vmem:[%s2376_s1 + $0x170] sm:$0xff]   ;;  %v1818_v41 = vld [vmem:[%s2376_s1 + $0x168] sm:$0xff]  }
  0x21   : > { %v1815_v38 = vld [vmem:[%s2376_s1 + $0xb8] sm:$0xff]   ;;  %v1817_v40 = vld [vmem:[%s2376_s1 + $0xb0] sm:$0xff]   ;;  %v1819_v42 = vld [vmem:[%s2376_s1 + $0xa8] sm:$0xff]  }
  0x22   : > { %1552 = vmatpush3.bf16.msra.mxu0 %v1788_v7  ;;  %v1820_v43 = vld [vmem:[%s2376_s1 + $0x160] sm:$0xff]   ;;  %v1822_v45 = vld [vmem:[%s2376_s1 + $0x158] sm:$0xff]   ;;  %v1824_v47 = vld [vmem:[%s2376_s1 + $0x150] sm:$0xff]  }
  0x23   : > { %1572 = vmatpush3.bf16.msra.mxu1 %v1789_v8  ;;  %1553 = vmatprep.subr.bf16.mxu0 %v1932_v1  ;;  %v1821_v44 = vld [vmem:[%s2376_s1 + $0xa0] sm:$0xff]   ;;  %v1823_v46 = vld [vmem:[%s2376_s1 + $0x98] sm:$0xff]   ;;  %v1825_v48 = vld [vmem:[%s2376_s1 + $0x90] sm:$0xff]  }
  0x24   : > { %1573 = vmatprep.subr.bf16.mxu1 %v1932_v1  ;;  %v1826_v49 = vld [vmem:[%s2376_s1 + $0x148] sm:$0xff]   ;;  %v1828_v51 = vld [vmem:[%s2376_s1 + $0x140] sm:$0xff]   ;;  %v1830_v53 = vld [vmem:[%s2376_s1 + $0x1b8] sm:$0xff]  }
  0x25   : > { %v1827_v50 = vld [vmem:[%s2376_s1 + $0x88] sm:$0xff]   ;;  %v1829_v52 = vld [vmem:[%s2376_s1 + $0x80] sm:$0xff]   ;;  %v1831_v54 = vld [vmem:[%s2376_s1 + $0x1f8] sm:$0xff]  }
  0x26   : > { %1554 = vmatpush3.bf16.msra.mxu0 %v1790_v9  ;;  %v1832_v55 = vld [vmem:[%s2376_s1 + $0x1b0] sm:$0xff]   ;;  %v1834_v57 = vld [vmem:[%s2376_s1 + $0x1a8] sm:$0xff]   ;;  %v1836_v59 = vld [vmem:[%s2376_s1 + $0x1a0] sm:$0xff]  }
  0x27   : > { %1574 = vmatpush3.bf16.msra.mxu1 %v1791_v10  ;;  %1555 = vmatprep.subr.bf16.mxu0 %v1932_v1  ;;  %v1833_v56 = vld [vmem:[%s2376_s1 + $0x1f0] sm:$0xff]   ;;  %v1835_v58 = vld [vmem:[%s2376_s1 + $0x1e8] sm:$0xff]   ;;  %v1837_v60 = vld [vmem:[%s2376_s1 + $0x1e0] sm:$0xff]  }
  0x28   : > { %1575 = vmatprep.subr.bf16.mxu1 %v1932_v1  ;;  %v1838_v61 = vld [vmem:[%s2376_s1 + $0x198] sm:$0xff]   ;;  %v1840_v63 = vld [vmem:[%s2376_s1 + $0x190] sm:$0xff]   ;;  %v1842_v2 = vld [vmem:[%s2376_s1 + $0x188] sm:$0xff]  }
  0x29   : > { %v1839_v62 = vld [vmem:[%s2376_s1 + $0x1d8] sm:$0xff]   ;;  %v1841_v0 = vld [vmem:[%s2376_s1 + $0x1d0] sm:$0xff]   ;;  %v1843_v3 = vld [vmem:[%s2376_s1 + $0x1c8] sm:$0xff]  }
  0x2a   : > { %1556 = vmatpush3.bf16.msra.mxu0 %v1792_v11  ;;  %v1844_v4 = vld [vmem:[%s2376_s1 + $0x180] sm:$0xff]   ;;  %v1846_v7 = vld [vmem:[%s2376_s1 + $0x238] sm:$0xff]   ;;  %v1411_v8 = vld [vmem:[%s2075_s21 + $0xc] sm:$0xf] }
  0x2b   : > { %1576 = vmatpush3.bf16.msra.mxu1 %v1793_v12  ;;  %1557 = vmatprep.subr.bf16.mxu0 %v1932_v1  ;;  %v1845_v5 = vld [vmem:[%s2376_s1 + $0x1c0] sm:$0xff]   ;;  %v1847_v9 = vld [vmem:[%s2376_s1 + $0x230] sm:$0xff]   ;;  %v1848_v10 = vld [vmem:[%s2376_s1 + $0x228] sm:$0xff]  }
  0x2c   : > { %1577 = vmatprep.subr.bf16.mxu1 %v1932_v1  ;;  %v835_v6 = vld [vmem:[%s2075_s21 + $0x4] sm:$0xf]  ;;  %v1850_v12 = vld [vmem:[%s2376_s1 + $0x218] sm:$0xff]  }
  0x2d   : > { %v1849_v11 = vld [vmem:[%s2376_s1 + $0x220] sm:$0xff]  }
  0x2e   : > { %1558 = vmatpush3.bf16.msra.mxu0 %v1794_v13  ;;  %v1851_v13 = vld [vmem:[%s2376_s1 + $0x210] sm:$0xff]  }
  0x2f   : > { %1578 = vmatpush3.bf16.msra.mxu1 %v1795_v14  ;;  %1559 = vmatprep.subr.bf16.mxu0 %v1932_v1  ;;  %v1852_v14 = vld [vmem:[%s2376_s1 + $0x208] sm:$0xff]  }
  0x30   : > { %1579 = vmatprep.subr.bf16.mxu1 %v1932_v1 }
  0x32   : > { %1560 = vmatpush3.bf16.msra.mxu0 %v1796_v15  ;;  %v1853_v15 = vld [vmem:[%s2376_s1 + $0x200] sm:$0xff]  }
  0x33   : > { %1580 = vmatpush3.bf16.msra.mxu1 %v1797_v16  ;;  %1585 = vmatprep.subr.bf16.mxu0 %v1932_v1 }
  0x34   : > { %1605 = vmatprep.subr.bf16.mxu1 %v1932_v1 }
  0x35   : > { %1562 = vmatmul.mubr.bf16.vlgmr.msra.gmra.mxu0 %v1256_v17 }
  0x36   : > { %1582 = vmatmul.mubr.bf16.vlgmr.msra.gmra.mxu1 %v2087_v18  ;;  %1586 = vmatpush3.bf16.msra.mxu0 %v1798_v19 }
  0x37   : > { %1606 = vmatpush3.bf16.msra.mxu1 %v1799_v20  ;;  %1587 = vmatprep.subr.bf16.mxu0 %v1932_v1 }
  0x38   : > { %1607 = vmatprep.subr.bf16.mxu1 %v1932_v1  ;;  %1601 = vmatprep.mubr.msk.bf16.mxu0 %vm1933_vm0, %v1932_v1 }
  0x39   : > { %1621 = vmatprep.mubr.msk.bf16.mxu1 %vm1933_vm0, %v1932_v1 }
  0x3a   : > { %1588 = vmatpush3.bf16.msra.mxu0 %v1800_v21 }
  0x3b   : > { %1608 = vmatpush3.bf16.msra.mxu1 %v1801_v22  ;;  %1589 = vmatprep.subr.bf16.mxu0 %v1932_v1 }
  0x3c   : > { %1609 = vmatprep.subr.bf16.mxu1 %v1932_v1 }
  0x3e   : > { %1590 = vmatpush3.bf16.msra.mxu0 %v1802_v23 }
  0x3f   : > { %1610 = vmatpush3.bf16.msra.mxu1 %v1803_v24  ;;  %1591 = vmatprep.subr.bf16.mxu0 %v1932_v1 }
  0x40   : > { %1611 = vmatprep.subr.bf16.mxu1 %v1932_v1 }
  0x42   : > { %1592 = vmatpush3.bf16.msra.mxu0 %v1804_v25 }
  0x43   : > { %1612 = vmatpush3.bf16.msra.mxu1 %v1805_v26  ;;  %1593 = vmatprep.subr.bf16.mxu0 %v1932_v1 }
  0x44   : > { %1613 = vmatprep.subr.bf16.mxu1 %v1932_v1 }
  0x46   : > { %1594 = vmatpush3.bf16.msra.mxu0 %v1806_v27 }
  0x47   : > { %1614 = vmatpush3.bf16.msra.mxu1 %v1807_v28  ;;  %1595 = vmatprep.subr.bf16.mxu0 %v1932_v1 }
  0x48   : > { %1615 = vmatprep.subr.bf16.mxu1 %v1932_v1 }
  0x4a   : > { %1596 = vmatpush3.bf16.msra.mxu0 %v1808_v29 }
  0x4b   : > { %1616 = vmatpush3.bf16.msra.mxu1 %v1809_v30  ;;  %1597 = vmatprep.subr.bf16.mxu0 %v1932_v1 }
  0x4c   : > { %1617 = vmatprep.subr.bf16.mxu1 %v1932_v1 }
  0x4e   : > { %1598 = vmatpush3.bf16.msra.mxu0 %v1810_v31 }
  0x4f   : > { %1618 = vmatpush3.bf16.msra.mxu1 %v1811_v32  ;;  %1599 = vmatprep.subr.bf16.mxu0 %v1932_v1 }
  0x50   : > { %1619 = vmatprep.subr.bf16.mxu1 %v1932_v1 }
  0x52   : > { %1600 = vmatpush3.bf16.msra.mxu0 %v1812_v33 }
  0x53   : > { %1620 = vmatpush3.bf16.msra.mxu1 %v1813_v34  ;;  %1625 = vmatprep.subr.bf16.mxu0 %v1932_v1 }
  0x54   : > { %1645 = vmatprep.subr.bf16.mxu1 %v1932_v1 }
  0x55   : > { %1602 = vmatmul.mubr.bf16.vlgmr.msra.gmra.mxu0 %v1305_v35 }
  0x56   : > { %1626 = vmatpush3.bf16.msra.mxu0 %v1814_v36  ;;  %1622 = vmatmul.mubr.bf16.vlgmr.msra.gmra.mxu1 %v1330_v37 }
  0x57   : > { %1646 = vmatpush3.bf16.msra.mxu1 %v1815_v38  ;;  %1627 = vmatprep.subr.bf16.mxu0 %v1932_v1 }
  0x58   : > { %1647 = vmatprep.subr.bf16.mxu1 %v1932_v1  ;;  %1641 = vmatprep.mubr.msk.bf16.mxu0 %vm1933_vm0, %v1932_v1 }
  0x59   : > { %1661 = vmatprep.mubr.msk.bf16.mxu1 %vm1933_vm0, %v1932_v1 }
  0x5a   : > { %1628 = vmatpush3.bf16.msra.mxu0 %v1816_v39 }
  0x5b   : > { %1648 = vmatpush3.bf16.msra.mxu1 %v1817_v40  ;;  %1629 = vmatprep.subr.bf16.mxu0 %v1932_v1 }
  0x5c   : > { %1649 = vmatprep.subr.bf16.mxu1 %v1932_v1 }
  0x5e   : > { %1630 = vmatpush3.bf16.msra.mxu0 %v1818_v41 }
  0x5f   : > { %1650 = vmatpush3.bf16.msra.mxu1 %v1819_v42  ;;  %1631 = vmatprep.subr.bf16.mxu0 %v1932_v1 }
  0x60   : > { %1651 = vmatprep.subr.bf16.mxu1 %v1932_v1 }
  0x62   : > { %1632 = vmatpush3.bf16.msra.mxu0 %v1820_v43 }
  0x63   : > { %1652 = vmatpush3.bf16.msra.mxu1 %v1821_v44  ;;  %1633 = vmatprep.subr.bf16.mxu0 %v1932_v1 }
  0x64   : > { %1653 = vmatprep.subr.bf16.mxu1 %v1932_v1 }
  0x66   : > { %1634 = vmatpush3.bf16.msra.mxu0 %v1822_v45 }
  0x67   : > { %1654 = vmatpush3.bf16.msra.mxu1 %v1823_v46  ;;  %1635 = vmatprep.subr.bf16.mxu0 %v1932_v1 }
  0x68   : > { %1655 = vmatprep.subr.bf16.mxu1 %v1932_v1 }
  0x6a   : > { %1636 = vmatpush3.bf16.msra.mxu0 %v1824_v47 }
  0x6b   : > { %1656 = vmatpush3.bf16.msra.mxu1 %v1825_v48  ;;  %1637 = vmatprep.subr.bf16.mxu0 %v1932_v1 }
  0x6c   : > { %1657 = vmatprep.subr.bf16.mxu1 %v1932_v1 }
  0x6e   : > { %1638 = vmatpush3.bf16.msra.mxu0 %v1826_v49 }
  0x6f   : > { %1658 = vmatpush3.bf16.msra.mxu1 %v1827_v50  ;;  %1639 = vmatprep.subr.bf16.mxu0 %v1932_v1 }
  0x70   : > { %1659 = vmatprep.subr.bf16.mxu1 %v1932_v1 }
  0x72   : > { %1640 = vmatpush3.bf16.msra.mxu0 %v1828_v51 }
  0x73   : > { %1660 = vmatpush3.bf16.msra.mxu1 %v1829_v52  ;;  %1665 = vmatprep.subr.bf16.mxu0 %v1932_v1 }
  0x74   : > { %1685 = vmatprep.subr.bf16.mxu1 %v1932_v1 }
  0x75   : > { %1642 = vmatmul.mubr.bf16.vlgmr.msra.gmra.mxu0 %v1305_v35 }
  0x76   : > { %1662 = vmatmul.mubr.bf16.vlgmr.msra.gmra.mxu1 %v2087_v18  ;;  %1666 = vmatpush3.bf16.msra.mxu0 %v1830_v53 }
  0x77   : > { %1686 = vmatpush3.bf16.msra.mxu1 %v1831_v54  ;;  %1667 = vmatprep.subr.bf16.mxu0 %v1932_v1 }
  0x78   : > { %1687 = vmatprep.subr.bf16.mxu1 %v1932_v1  ;;  %1681 = vmatprep.mubr.msk.bf16.mxu0 %vm1933_vm0, %v1932_v1 }
  0x79   : > { %1701 = vmatprep.mubr.msk.bf16.mxu1 %vm1933_vm0, %v1932_v1 }
  0x7a   : > { %1668 = vmatpush3.bf16.msra.mxu0 %v1832_v55 }
  0x7b   : > { %1688 = vmatpush3.bf16.msra.mxu1 %v1833_v56  ;;  %1669 = vmatprep.subr.bf16.mxu0 %v1932_v1 }
  0x7c   : > { %1689 = vmatprep.subr.bf16.mxu1 %v1932_v1 }
  0x7e   : > { %1670 = vmatpush3.bf16.msra.mxu0 %v1834_v57  ;;  %v1159_v57 = vld [vmem:[%s2377_s2] sm:$0x1] }
  0x7f   : > { %1690 = vmatpush3.bf16.msra.mxu1 %v1835_v58  ;;  %1671 = vmatprep.subr.bf16.mxu0 %v1932_v1 }
  0x80   : > { %1691 = vmatprep.subr.bf16.mxu1 %v1932_v1 }
  0x82   : > { %1672 = vmatpush3.bf16.msra.mxu0 %v1836_v59 }
  0x83   : > { %1692 = vmatpush3.bf16.msra.mxu1 %v1837_v60  ;;  %1673 = vmatprep.subr.bf16.mxu0 %v1932_v1 }
  0x84   : > { %1693 = vmatprep.subr.bf16.mxu1 %v1932_v1 }
  0x86   : > { %1674 = vmatpush3.bf16.msra.mxu0 %v1838_v61 }
  0x87   : > { %1694 = vmatpush3.bf16.msra.mxu1 %v1839_v62  ;;  %1675 = vmatprep.subr.bf16.mxu0 %v1932_v1 }
  0x88   : > { %1695 = vmatprep.subr.bf16.mxu1 %v1932_v1 }
  0x8a   : > { %1676 = vmatpush3.bf16.msra.mxu0 %v1840_v63 }
  0x8b   : > { %1696 = vmatpush3.bf16.msra.mxu1 %v1841_v0  ;;  %1677 = vmatprep.subr.bf16.mxu0 %v1932_v1 }
  0x8c   : > { %1697 = vmatprep.subr.bf16.mxu1 %v1932_v1 }
  0x8e   : > { %1678 = vmatpush3.bf16.msra.mxu0 %v1842_v2 }
  0x8f   : > { %1698 = vmatpush3.bf16.msra.mxu1 %v1843_v3  ;;  %1679 = vmatprep.subr.bf16.mxu0 %v1932_v1 }
  0x90   : > { %1699 = vmatprep.subr.bf16.mxu1 %v1932_v1 }
  0x92   : > { %1680 = vmatpush3.bf16.msra.mxu0 %v1844_v4 }
  0x93   : > { %1700 = vmatpush3.bf16.msra.mxu1 %v1845_v5  ;;  %1705 = vmatprep.subr.bf16.mxu0 %v1932_v1 }
  0x95   : > { %1682 = vmatmul.mubr.bf16.vlgmr.msra.gmra.mxu0 %v835_v6 }
  0x96   : > { %1706 = vmatpush3.bf16.msra.mxu0 %v1846_v7  ;;  %1702 = vmatmul.mubr.bf16.vlgmr.msra.gmra.mxu1 %v1411_v8 }
  0x97   : > { %1707 = vmatprep.subr.bf16.mxu0 %v1932_v1  ;;  %1721 = vmatprep.mubr.msk.bf16.mxu0 %vm1933_vm0, %v1932_v1 }
  0x9a   : > { %1708 = vmatpush3.bf16.msra.mxu0 %v1847_v9 }
  0x9b   : > { %1709 = vmatprep.subr.bf16.mxu0 %v1932_v1 }
  0x9e   : > { %1710 = vmatpush3.bf16.msra.mxu0 %v1848_v10 }
  0x9f   : > { %1711 = vmatprep.subr.bf16.mxu0 %v1932_v1 }
  0xa2   : > { %1712 = vmatpush3.bf16.msra.mxu0 %v1849_v11 }
  0xa3   : > { %1713 = vmatprep.subr.bf16.mxu0 %v1932_v1 }
  0xa6   : > { %1714 = vmatpush3.bf16.msra.mxu0 %v1850_v12 }
  0xa7   : > { %1715 = vmatprep.subr.bf16.mxu0 %v1932_v1 }
  0xaa   : > { %1716 = vmatpush3.bf16.msra.mxu0 %v1851_v13 }
  0xab   : > { %1717 = vmatprep.subr.bf16.mxu0 %v1932_v1 }
  0xae   : > { %1718 = vmatpush3.bf16.msra.mxu0 %v1852_v14 }
  0xaf   : > { %1719 = vmatprep.subr.bf16.mxu0 %v1932_v1 }
  0xb2   : > { %1720 = vmatpush3.bf16.msra.mxu0 %v1853_v15 }
  0xb5   : > { %1722 = vmatmul.mubr.bf16.vlgmr.msra.gmra.mxu0 %v835_v6 }
  0xf5   : > { %v315_v16 = vpop.f32.mrf.mxu0 }
  0xf6   : > { %v403_v17 = vpop.f32.mrf.mxu1 }
  0xf7   : > { %v404_v18 = vadd.f32 %v403_v17, %v315_v16  ;;  %v1563_v19 = vpop.f32.mrf.mxu0 }
  0xf8   : > { %v1583_v20 = vpop.f32.mrf.mxu1 }
  0xf9   : > { %v318_v21 = vpop.f32.mrf.mxu0 }
  0xfa   : > { %v406_v22 = vpop.f32.mrf.mxu1 }
  0xfb   : > { %v1564_v23 = vpop.f32.mrf.mxu0 }
  0xfc   : > { %v1584_v24 = vpop.f32.mrf.mxu1 }
 0x115   : > { %v527_v25 = vpop.f32.mrf.mxu0 }
 0x116   : > { %v533_v26 = vadd.f32 %v527_v25, %v404_v18  ;;  %v635_v27 = vpop.f32.mrf.mxu1 }
 0x117   : > { %v1603_v28 = vpop.f32.mrf.mxu0 }
 0x118   : > { %v641_v29 = vadd.f32 %v635_v27, %v533_v26  ;;  %v1623_v30 = vpop.f32.mrf.mxu1 }
 0x119   : > { %v530_v31 = vpop.f32.mrf.mxu0 }
 0x11a   : > { %v638_v32 = vpop.f32.mrf.mxu1 }
 0x11b   : > { %v1604_v1 = vpop.f32.mrf.mxu0 }
 0x11c   : > { %v1624_v33 = vpop.f32.mrf.mxu1 }
 0x135   : > { %v741_v34 = vpop.f32.mrf.mxu0 }
 0x136   : > { %v829_v35 = vpop.f32.mrf.mxu1 }
 0x137   : > { %v1643_v36 = vpop.f32.mrf.mxu0  ;;  %v830_v50 = vadd.f32 %v829_v35, %v741_v34 }
 0x138   : > { %v1663_v37 = vpop.f32.mrf.mxu1 }
 0x139   : > { %v744_v38 = vpop.f32.mrf.mxu0 }
 0x13a   : > { %v832_v39 = vpop.f32.mrf.mxu1 }
 0x13b   : > { %v1644_v40 = vpop.f32.mrf.mxu0 }
 0x13c   : > { %v1664_v41 = vpop.f32.mrf.mxu1 }
 0x155   : > { %v935_v42 = vpop.f32.mrf.mxu0 }
 0x156   : > { %v1042_v43 = vpop.f32.mrf.mxu1  ;;  %v941_v51 = vadd.f32 %v935_v42, %v641_v29 }
 0x157   : > { %v1683_v44 = vpop.f32.mrf.mxu0 }
 0x158   : > { %v1703_v45 = vpop.f32.mrf.mxu1  ;;  %v1048_v55 = vadd.f32 %v1042_v43, %v941_v51 }
 0x159   : > { %v938_v46 = vpop.f32.mrf.mxu0 }
 0x15a   : > { %v1045_v47 = vpop.f32.mrf.mxu1 }
 0x15b   : > { %v1684_v48 = vpop.f32.mrf.mxu0 }
 0x15c   : > { %v1704_v49 = vpop.f32.mrf.mxu1 }
 0x175   : > { %v1148_v52 = vpop.f32.mrf.mxu0 }
 0x176   : > { %v1154_v53 = vadd.f32 %v1148_v52, %v830_v50 }
 0x177   : > { %v1723_v54 = vpop.f32.mrf.mxu0 }
 0x178   : > { %v1156_v56 = vrot.slane %v1154_v53, 1 }
 0x179   : > { %v1151_v58 = vpop.f32.mrf.mxu0 }
 0x17a   : > { %v1158_v59 = vadd.f32 %v1156_v56, %v1048_v55 }
 0x17b   : > { %v1724_v60 = vpop.f32.mrf.mxu0 }
 0x17c   : > { %v1160_v61 = vadd.f32 %v1159_v57, %v1158_v59 }
 0x17e   : > { %1161 = vst [vmem:[%s186_s5] sm:$0x1] %v1160_v61 }
 0x17f   : > { %1867 = shalt.err (!%p1864_p5)
}
 0x180   : > { %s1868_s19 = scalar_lea.hbm %s1174_s8, 16  ;;  %s1872_s27 = scalar_lea.hbm %s2378_s3, 32 }
 0x181   : > { %p1869_p6 = scmp.ne.s32.totalorder %s1174_s8, %s1868_s19  ;;  %p1873_p10 = scmp.lt.s32.totalorder %s1174_s8, %s2378_s3 }
 0x182   : > { %p1874_p11 = scmp.lt.s32.totalorder %s1872_s27, %s1868_s19 }
 0x183   : > { %p1870_p7 = pnand %p1869_p6, %p1995_p4 }
 0x184   : > { %p1875_p12 = por %p1874_p11, %p1873_p10 }
 0x185   : > { %p1871_p9 = pneg %p1870_p7 }
 0x187   : > { %p1876_p13 = pnand %p1875_p12, %p1871_p9 }
 0x189   : > { %1879 = shalt.err (!%p1876_p13)
}
 0x18a   : > { %1725 = dma.vmem_to_hbm [thread:$0]  (%p1995_p4), %s1177_s6, 16, %s1174_s8, %s1163_s9  }
 0x18b PF: > { %p1731_p0 = scmp.ge.s32.totalorder %s1930_s17, 2  ;;  %s1188_s30 = sand.u32 1, %s1910_s12  }
 0x18c   : > { %s1189_s4 = scalar_lea.sflag [#allocation3], %s1188_s30 }
 0x18d   : > { %p1728_p1 = pnand %p1731_p0, %p2002_p8 }
 0x18f   : > { %p1729_p2 = pneg %p1728_p1 }
 0x191   : > { %1905 = dma.done.wait (%p1729_p2), %s1189_s4, 16  }
 0x192   : > { %1907 = vsyncadd (%p1729_p2), %s1189_s4, 4294967280  ;;  %s16_s17 = sadd.s32 1, %s1930_s17   ;;  %s2381_s12 = smov %s1914_s13 }
 0x193   : > { %p13_p3 = scmp.ge.s32.totalorder %s16_s17, 4   ;;  %s2382_s13 = smov %s1918_s14 }
 0x194   : > { %s2383_s14 = smov %s2008_s25  ;;  %s2384_s15 = smov %s1926_s16 }
 0x195   : > { %s2385_s16 = smov %s2387_s20  ;;  %15 = sbr.rel (!%p13_p3) target bundleno = 4 (0x4), region = 78 }
 0x19a   :  { %1193 = vsyncpa [#allocation3], 1 }
 0x19b   :  { %1195 = vsyncpa [#allocation3 + $0x1], 1 }

// kernel: fpn_forward.5
= control target key start
LH: loop header
LB: loop body
LE: loop exit
PB: predicated region body
PF: predicated region fallthrough
CT: control target
= control target key end

     0   :  { %s746_s12 = smov 0   ;;  %s748_s13 = smov 0   ;;  %s913_s0 = inlined_call_operand.vmem [shape: f32[2,4,256], index: 0, kind: input, shape index: {}]   ;;  %s914_s1 = inlined_call_operand.vmem [shape: bf16[128,4], index: 1, kind: input, shape index: {}]   ;;  %s915_s2 = inlined_call_operand.vmem [shape: f32[128,1], index: 2, kind: input, shape index: {}]   ;;  %s916_s3 = inlined_call_operand.vmem [shape: f32[2,128,256], index: 3, kind: output, shape index: {}]  }
   0x1   :  { %s750_s14 = smov 0  }
   0x2 LB: > { %s25_s15 = sadd.s32 1, %s719_s13  ;;  %p637_p0 = scmp.ge.s32.totalorder %s723_s14, 1  ;;  %s723_s14 = sphi %s750_s14, %s13_s14   ;;  %s719_s13 = sphi %s748_s13, %s918_s13   ;;  %s715_s12 = sphi %s746_s12, %s917_s12  }
   0x3   : > { %p27_p1 = scmp.ge.s32.totalorder %s25_s15, 2  ;;  %p158_p2 = scmp.lt.s32.totalorder %s723_s14, 3 }
   0x5   : > { %s920_s15 = smov (%p27_p1, %s25_s15), 0  ;;  %p159_p3 = pnand %p637_p0, %p158_p2 }
   0x6   : > { %p191_p4 = scmp.lt.s32.totalorder (!%p159_p3), %s715_s12, 1 }
   0x7   : > { %162 = sbr.rel (%p159_p3) target bundleno = 250 (0xfa), region = 32 }
   0xc   : > { %v725_v0 = vmov 0   ;;  %s922_s12 = smov (!%p191_p4, %s715_s12), 1  ;;  %vm394_vm0 = vcmask 1041408   ;;  %v235_v4 = vld [vmem:[%s915_s2 + $0x10] sm:$0xff]  ;;  %v233_v7 = vld [vmem:[%s915_s2] sm:$0xff]  ;;  %v236_v8 = vld [vmem:[%s915_s2 + $0x18] sm:$0xff] }
   0xd   : > { %433 = vmatprep.mubr.bf16.mxu0 %v725_v0  ;;  %473 = vmatprep.mubr.bf16.mxu1 %v725_v0  ;;  %s661_s16 = sshll.u32 %s922_s12, 3  ;;  %v693_v9 = vld [vmem:[%s914_s1] sm:$0xff]   ;;  %v234_v11 = vld [vmem:[%s915_s2 + $0x8] sm:$0xff]  ;;  %vm369_vm1 = vcmask 31744   ;;  %v240_v14 = vld [vmem:[%s915_s2 + $0x38] sm:$0xff]  ;;  %s662_s22 = sshll.u32 %s922_s12, 8 }
   0xe   : > { %691 = vset.pattern.permute.xlu1 %v725_v0  ;;  %690 = vset.pattern.permute.xlu0 %v725_v0  ;;  %s198_s19 = scalar_lea.vmem %s913_s0, %s661_s16  ;;  %v694_v10 = vld [vmem:[%s914_s1 + $0x20] sm:$0xff]   ;;  %v238_v12 = vld [vmem:[%s915_s2 + $0x28] sm:$0xff]  ;;  %v239_v17 = vld [vmem:[%s915_s2 + $0x30] sm:$0xff]  ;;  %s862_s25 = scalar_lea.vmem %s916_s3, %s662_s22 }
   0xf   : > { %v211_v1 = vld [vmem:[%s198_s19] sm:$0xff]  ;;  %261 = vperm.xlu1 %691, %v235_v4   ;;  %251 = vperm.xlu0 %690, %v233_v7   ;;  %v695_v15 = vld [vmem:[%s914_s1 + $0x8] sm:$0xff]   ;;  %v244_v20 = vld [vmem:[%s915_s2 + $0x58] sm:$0xff] }
  0x10   : > { %v213_v2 = vcombine.high %v211_v1, %v211_v1  ;;  %v215_v3 = vpack.c.bf16 %v211_v1, %v211_v1  ;;  %v237_v13 = vld [vmem:[%s915_s2 + $0x20] sm:$0xff]  ;;  %v696_v16 = vld [vmem:[%s914_s1 + $0x28] sm:$0xff]   ;;  %v697_v21 = vld [vmem:[%s914_s1 + $0x10] sm:$0xff]  }
  0x11   : > { %v242_v18 = vld [vmem:[%s915_s2 + $0x48] sm:$0xff]  ;;  %v241_v19 = vld [vmem:[%s915_s2 + $0x40] sm:$0xff]  ;;  %v698_v22 = vld [vmem:[%s914_s1 + $0x30] sm:$0xff]  }
  0x12   : > { %v216_v5 = vpack.c.bf16 %v213_v2, %v213_v2  ;;  %v396_v6 = vsel %vm394_vm0, %v215_v3, 0  ;;  %v243_v23 = vld [vmem:[%s915_s2 + $0x50] sm:$0xff]  ;;  %v246_v24 = vld [vmem:[%s915_s2 + $0x68] sm:$0xff]  ;;  %v245_v25 = vld [vmem:[%s915_s2 + $0x60] sm:$0xff] }
  0x13   : > { %266 = vperm.xlu1 %691, %v236_v8   ;;  %256 = vperm.xlu0 %690, %v234_v11   ;;  %v248_v26 = vld [vmem:[%s915_s2 + $0x78] sm:$0xff]  ;;  %v247_v29 = vld [vmem:[%s915_s2 + $0x70] sm:$0xff] }
  0x14   : > { %650 = vmatprep.subr.msk.bf16.mxu0 %vm394_vm0, %v216_v5  ;;  %663 = vmatprep.subr.msk.bf16.mxu1 %vm394_vm0, %v216_v5  ;;  %v699_v27 = vld [vmem:[%s914_s1 + $0x18] sm:$0xff]  }
  0x15   : > { %416 = vmatpush1.bf16.msra.mxu0 %v396_v6  ;;  %664 = vmatpush1.bf16.msra.mxu1 %v396_v6  ;;  %v700_v28 = vld [vmem:[%s914_s1 + $0x38] sm:$0xff]  }
  0x17   : > { %276 = vperm.xlu1 %691, %v238_v12   ;;  %271 = vperm.xlu0 %690, %v237_v13  }
  0x18   : > { %651 = vmatmul.mubr.msk.bf16.vlgmr.msra.gmra.mxu0 %vm369_vm1, %v693_v9  ;;  %655 = vmatmul.mubr.msk.bf16.vlgmr.msra.gmra.mxu1 %vm369_vm1, %v694_v10 }
  0x19   : > { %443 = vmatprep.mubr.bf16.mxu0 %v725_v0  ;;  %483 = vmatprep.mubr.bf16.mxu1 %v725_v0 }
  0x1b   : > { %286 = vperm.xlu1 %691, %v240_v14   ;;  %281 = vperm.xlu0 %690, %v239_v17  }
  0x1f   : > { %296 = vperm.xlu1 %691, %v242_v18   ;;  %291 = vperm.xlu0 %690, %v241_v19  }
  0x20   : > { %652 = vmatmul.mubr.msk.bf16.gmra.mxu0 %vm369_vm1, %v695_v15  ;;  %656 = vmatmul.mubr.msk.bf16.gmra.mxu1 %vm369_vm1, %v696_v16 }
  0x21   : > { %453 = vmatprep.mubr.bf16.mxu0 %v725_v0  ;;  %493 = vmatprep.mubr.bf16.mxu1 %v725_v0 }
  0x23   : > { %306 = vperm.xlu1 %691, %v244_v20   ;;  %301 = vperm.xlu0 %690, %v243_v23  }
  0x27   : > { %316 = vperm.xlu1 %691, %v246_v24   ;;  %311 = vperm.xlu0 %690, %v245_v25  }
  0x28   : > { %653 = vmatmul.mubr.msk.bf16.gmra.mxu0 %vm369_vm1, %v697_v21  ;;  %657 = vmatmul.mubr.msk.bf16.gmra.mxu1 %vm369_vm1, %v698_v22 }
  0x29   : > { %463 = vmatprep.mubr.bf16.mxu0 %v725_v0  ;;  %503 = vmatprep.mubr.bf16.mxu1 %v725_v0 }
  0x2b   : > { %326 = vperm.xlu1 %691, %v248_v26   ;;  %321 = vperm.xlu0 %690, %v247_v29  }
  0x30   : > { %654 = vmatmul.mubr.msk.bf16.gmra.mxu0 %vm369_vm1, %v699_v27  ;;  %658 = vmatmul.mubr.msk.bf16.gmra.mxu1 %vm369_vm1, %v700_v28 }
  0x8a   : > { %v252_v30 = vpop.permute.xlu0 %251  ;;  %v262_v31 = vpop.permute.xlu1 %261 }
  0x8e   : > { %v257_v32 = vpop.permute.xlu0 %256  ;;  %v267_v33 = vpop.permute.xlu1 %266 }
  0x92   : > { %v850_v34 = vpop.permute.xlu0 %271  ;;  %v852_v35 = vpop.permute.xlu1 %276 }
  0x96   : > { %v854_v36 = vpop.permute.xlu0 %281  ;;  %v857_v37 = vpop.permute.xlu1 %286 }
  0x9a   : > { %v292_v38 = vpop.permute.xlu0 %291  ;;  %v297_v45 = vpop.permute.xlu1 %296 }
  0x9e   : > { %v302_v54 = vpop.permute.xlu0 %301  ;;  %v307_v63 = vpop.permute.xlu1 %306 }
  0xa2   : > { %v312_v8 = vpop.permute.xlu0 %311  ;;  %v317_v17 = vpop.permute.xlu1 %316 }
  0xa6   : > { %v322_v26 = vpop.permute.xlu0 %321 }
  0xd8   : > { %v435_v39 = vpop.f32.mrf.mxu0  ;;  %v475_v40 = vpop.f32.mrf.mxu1 }
  0xd9   : > { %v436_v41 = vadd.f32 %v435_v39, %v252_v30  ;;  %v476_v42 = vadd.f32 %v475_v40, %v292_v38 }
  0xda   : > { %v437_v43 = vpop.f32.mrf.mxu0  ;;  %v477_v44 = vpop.f32.mrf.mxu1 }
  0xdb   : > { %514 = vst [vmem:[%s862_s25] sm:$0xff] %v436_v41  ;;  %530 = vst [vmem:[%s862_s25 + $0x80] sm:$0xff] %v476_v42  ;;  %v438_v46 = vadd.f32 %v437_v43, %v252_v30  ;;  %v478_v47 = vadd.f32 %v477_v44, %v292_v38  ;;  %v327_v38 = vpop.permute.xlu1 %326 }
  0xdc   : > { %v439_v48 = vpop.f32.mrf.mxu0  ;;  %v479_v49 = vpop.f32.mrf.mxu1 }
  0xdd   : > { %515 = vst [vmem:[%s862_s25 + $0x8] sm:$0xff] %v438_v46  ;;  %531 = vst [vmem:[%s862_s25 + $0x88] sm:$0xff] %v478_v47  ;;  %v440_v50 = vadd.f32 %v439_v48, %v257_v32  ;;  %v480_v51 = vadd.f32 %v479_v49, %v297_v45 }
  0xde   : > { %v441_v52 = vpop.f32.mrf.mxu0  ;;  %v481_v53 = vpop.f32.mrf.mxu1 }
  0xdf   : > { %516 = vst [vmem:[%s862_s25 + $0x10] sm:$0xff] %v440_v50  ;;  %532 = vst [vmem:[%s862_s25 + $0x90] sm:$0xff] %v480_v51  ;;  %v442_v55 = vadd.f32 %v441_v52, %v257_v32  ;;  %v482_v56 = vadd.f32 %v481_v53, %v297_v45 }
  0xe0   : > { %v445_v57 = vpop.f32.mrf.mxu0  ;;  %v485_v58 = vpop.f32.mrf.mxu1 }
  0xe1   : > { %517 = vst [vmem:[%s862_s25 + $0x18] sm:$0xff] %v442_v55  ;;  %533 = vst [vmem:[%s862_s25 + $0x98] sm:$0xff] %v482_v56  ;;  %v446_v59 = vadd.f32 %v445_v57, %v262_v31  ;;  %v486_v60 = vadd.f32 %v485_v58, %v302_v54 }
  0xe2   : > { %v447_v61 = vpop.f32.mrf.mxu0  ;;  %v487_v62 = vpop.f32.mrf.mxu1 }
  0xe3   : > { %518 = vst [vmem:[%s862_s25 + $0x20] sm:$0xff] %v446_v59  ;;  %534 = vst [vmem:[%s862_s25 + $0xa0] sm:$0xff] %v486_v60  ;;  %v448_v0 = vadd.f32 %v447_v61, %v262_v31  ;;  %v488_v1 = vadd.f32 %v487_v62, %v302_v54 }
  0xe4   : > { %v449_v2 = vpop.f32.mrf.mxu0  ;;  %v489_v3 = vpop.f32.mrf.mxu1 }
  0xe5   : > { %519 = vst [vmem:[%s862_s25 + $0x28] sm:$0xff] %v448_v0  ;;  %535 = vst [vmem:[%s862_s25 + $0xa8] sm:$0xff] %v488_v1  ;;  %v450_v4 = vadd.f32 %v449_v2, %v267_v33  ;;  %v490_v5 = vadd.f32 %v489_v3, %v307_v63 }
  0xe6   : > { %v451_v6 = vpop.f32.mrf.mxu0  ;;  %v491_v7 = vpop.f32.mrf.mxu1 }
  0xe7   : > { %520 = vst [vmem:[%s862_s25 + $0x30] sm:$0xff] %v450_v4  ;;  %536 = vst [vmem:[%s862_s25 + $0xb0] sm:$0xff] %v490_v5  ;;  %v452_v9 = vadd.f32 %v451_v6, %v267_v33  ;;  %v492_v10 = vadd.f32 %v491_v7, %v307_v63 }
  0xe8   : > { %v455_v11 = vpop.f32.mrf.mxu0  ;;  %v495_v12 = vpop.f32.mrf.mxu1 }
  0xe9   : > { %521 = vst [vmem:[%s862_s25 + $0x38] sm:$0xff] %v452_v9  ;;  %537 = vst [vmem:[%s862_s25 + $0xb8] sm:$0xff] %v492_v10  ;;  %v456_v13 = vadd.f32 %v455_v11, %v850_v34  ;;  %v496_v14 = vadd.f32 %v495_v12, %v312_v8 }
  0xea   : > { %v457_v15 = vpop.f32.mrf.mxu0  ;;  %v497_v16 = vpop.f32.mrf.mxu1 }
  0xeb   : > { %522 = vst [vmem:[%s862_s25 + $0x40] sm:$0xff] %v456_v13  ;;  %538 = vst [vmem:[%s862_s25 + $0xc0] sm:$0xff] %v496_v14  ;;  %v458_v18 = vadd.f32 %v457_v15, %v850_v34  ;;  %v498_v19 = vadd.f32 %v497_v16, %v312_v8 }
  0xec   : > { %v459_v20 = vpop.f32.mrf.mxu0  ;;  %v499_v21 = vpop.f32.mrf.mxu1 }
  0xed   : > { %523 = vst [vmem:[%s862_s25 + $0x48] sm:$0xff] %v458_v18  ;;  %539 = vst [vmem:[%s862_s25 + $0xc8] sm:$0xff] %v498_v19  ;;  %v460_v22 = vadd.f32 %v459_v20, %v852_v35  ;;  %v500_v23 = vadd.f32 %v499_v21, %v317_v17 }
  0xee   : > { %v461_v24 = vpop.f32.mrf.mxu0  ;;  %v501_v25 = vpop.f32.mrf.mxu1 }
  0xef   : > { %524 = vst [vmem:[%s862_s25 + $0x50] sm:$0xff] %v460_v22  ;;  %540 = vst [vmem:[%s862_s25 + $0xd0] sm:$0xff] %v500_v23  ;;  %v462_v27 = vadd.f32 %v461_v24, %v852_v35  ;;  %v502_v28 = vadd.f32 %v501_v25, %v317_v17 }
  0xf0   : > { %v465_v29 = vpop.f32.mrf.mxu0  ;;  %v505_v30 = vpop.f32.mrf.mxu1 }
  0xf1   : > { %525 = vst [vmem:[%s862_s25 + $0x58] sm:$0xff] %v462_v27  ;;  %541 = vst [vmem:[%s862_s25 + $0xd8] sm:$0xff] %v502_v28  ;;  %v466_v31 = vadd.f32 %v465_v29, %v854_v36  ;;  %v506_v32 = vadd.f32 %v505_v30, %v322_v26 }
  0xf2   : > { %v467_v33 = vpop.f32.mrf.mxu0  ;;  %v507_v34 = vpop.f32.mrf.mxu1 }
  0xf3   : > { %526 = vst [vmem:[%s862_s25 + $0x60] sm:$0xff] %v466_v31  ;;  %542 = vst [vmem:[%s862_s25 + $0xe0] sm:$0xff] %v506_v32  ;;  %v468_v35 = vadd.f32 %v467_v33, %v854_v36  ;;  %v508_v39 = vadd.f32 %v507_v34, %v322_v26 }
  0xf4   : > { %v469_v40 = vpop.f32.mrf.mxu0  ;;  %v509_v41 = vpop.f32.mrf.mxu1 }
  0xf5   : > { %527 = vst [vmem:[%s862_s25 + $0x68] sm:$0xff] %v468_v35  ;;  %543 = vst [vmem:[%s862_s25 + $0xe8] sm:$0xff] %v508_v39  ;;  %v470_v42 = vadd.f32 %v469_v40, %v857_v37  ;;  %v510_v43 = vadd.f32 %v509_v41, %v327_v38 }
  0xf6   : > { %v471_v44 = vpop.f32.mrf.mxu0  ;;  %v511_v45 = vpop.f32.mrf.mxu1 }
  0xf7   : > { %528 = vst [vmem:[%s862_s25 + $0x70] sm:$0xff] %v470_v42  ;;  %544 = vst [vmem:[%s862_s25 + $0xf0] sm:$0xff] %v510_v43  ;;  %v472_v46 = vadd.f32 %v471_v44, %v857_v37  ;;  %v512_v47 = vadd.f32 %v511_v45, %v327_v38 }
  0xf9   : > { %529 = vst [vmem:[%s862_s25 + $0x78] sm:$0xff] %v472_v46  ;;  %545 = vst [vmem:[%s862_s25 + $0xf8] sm:$0xff] %v512_v47 }
  0xfa PF: > { %s13_s14 = sadd.s32 1, %s723_s14   ;;  %s917_s12 = smov %s719_s13 }
  0xfb   : > { %p10_p5 = scmp.ge.s32.totalorder %s13_s14, 4   ;;  %s918_s13 = smov %s920_s15 }
  0xfd   :  { %12 = sbr.rel (!%p10_p5) target bundleno = 2 (0x2), region = 62 }

// kernel: fpn_forward.6
= control target key start
LH: loop header
LB: loop body
LE: loop exit
PB: predicated region body
PF: predicated region fallthrough
CT: control target
= control target key end

     0   :  { %s715_s12 = smov 0   ;;  %s717_s13 = smov 0   ;;  %s866_s0 = inlined_call_operand.vmem [shape: f32[2,8,64], index: 0, kind: input, shape index: {}]   ;;  %s867_s1 = inlined_call_operand.vmem [shape: bf16[128,8], index: 1, kind: input, shape index: {}]   ;;  %s868_s2 = inlined_call_operand.vmem [shape: f32[128,1], index: 2, kind: input, shape index: {}]   ;;  %s869_s3 = inlined_call_operand.vmem [shape: f32[2,128,64], index: 3, kind: output, shape index: {}]  }
   0x1   :  { %s719_s14 = smov 0  }
   0x2 LB: > { %s25_s15 = sadd.s32 1, %s688_s13  ;;  %p581_p0 = scmp.ge.s32.totalorder %s692_s14, 1  ;;  %s692_s14 = sphi %s719_s14, %s13_s14   ;;  %s688_s13 = sphi %s717_s13, %s871_s13   ;;  %s684_s12 = sphi %s715_s12, %s870_s12  }
   0x3   : > { %p27_p1 = scmp.ge.s32.totalorder %s25_s15, 2  ;;  %p155_p2 = scmp.lt.s32.totalorder %s692_s14, 3 }
   0x5   : > { %s873_s15 = smov (%p27_p1, %s25_s15), 0  ;;  %p156_p3 = pnand %p581_p0, %p155_p2 }
   0x6   : > { %p184_p4 = scmp.lt.s32.totalorder (!%p156_p3), %s684_s12, 1 }
   0x7   : > { %159 = sbr.rel (%p156_p3) target bundleno = 232 (0xe8), region = 32 }
   0xc   : > { %v662_v0 = vld [vmem:[%s867_s1] sm:$0xff]   ;;  %vm354_vm0 = vcmask 64512   ;;  %s875_s12 = smov (!%p184_p4, %s684_s12), 1  ;;  %v694_v2 = vmov 0   ;;  %vm379_vm1 = vcmask 1043456   ;;  %v220_v5 = vld [vmem:[%s868_s2 + $0x10] sm:$0xff] }
   0xd   : > { %v663_v1 = vld [vmem:[%s867_s1 + $0x20] sm:$0xff]   ;;  %615 = vmatprep.mubr.msk.bf16.mxu0 %vm354_vm0, %v662_v0  ;;  %s582_s20 = sshll.u32 %s875_s12, 3  ;;  %661 = vset.pattern.permute.xlu1 %v694_v2  ;;  %v664_v7 = vld [vmem:[%s867_s1 + $0x8] sm:$0xff]   ;;  %v666_v10 = vld [vmem:[%s867_s1 + $0x10] sm:$0xff]   ;;  %s603_s22 = sshll.u32 %s875_s12, 7  ;;  %vm480_vm2 = vcmask 523264  }
   0xe   : > { %623 = vmatprep.mubr.msk.bf16.mxu1 %vm354_vm0, %v663_v1  ;;  %s190_s23 = scalar_lea.vmem %s866_s0, %s582_s20  ;;  %660 = vset.pattern.permute.xlu0 %v694_v2  ;;  %v665_v8 = vld [vmem:[%s867_s1 + $0x28] sm:$0xff]   ;;  %v218_v9 = vld [vmem:[%s868_s2] sm:$0xff]  ;;  %v667_v11 = vld [vmem:[%s867_s1 + $0x30] sm:$0xff]   ;;  %s823_s25 = scalar_lea.vmem %s869_s3, %s603_s22 }
   0xf   : > { %v200_v3 = vld [vmem:[%s190_s23] sm:$0xff]  ;;  %246 = vperm.xlu1 %661, %v220_v5   ;;  %236 = vperm.xlu0 %660, %v218_v9   ;;  %v221_v12 = vld [vmem:[%s868_s2 + $0x18] sm:$0xff]  ;;  %v219_v13 = vld [vmem:[%s868_s2 + $0x8] sm:$0xff] }
  0x10   : > { %v201_v4 = vpack.c.bf16 %v200_v3, %v200_v3  ;;  %v223_v14 = vld [vmem:[%s868_s2 + $0x28] sm:$0xff]  ;;  %v222_v15 = vld [vmem:[%s868_s2 + $0x20] sm:$0xff]  ;;  %v668_v16 = vld [vmem:[%s867_s1 + $0x18] sm:$0xff]  }
  0x11   : > { %v669_v17 = vld [vmem:[%s867_s1 + $0x38] sm:$0xff]   ;;  %v224_v19 = vld [vmem:[%s868_s2 + $0x30] sm:$0xff]  ;;  %v227_v20 = vld [vmem:[%s868_s2 + $0x48] sm:$0xff] }
  0x12   : > { %633 = vmatprep.subr.msk.bf16.mxu0 %vm379_vm1, %v201_v4  ;;  %634 = vmatprep.subr.msk.bf16.mxu1 %vm379_vm1, %v201_v4  ;;  %v381_v6 = vsel %vm379_vm1, %v201_v4, 0  ;;  %v225_v18 = vld [vmem:[%s868_s2 + $0x38] sm:$0xff]  ;;  %v226_v21 = vld [vmem:[%s868_s2 + $0x40] sm:$0xff]  ;;  %v228_v23 = vld [vmem:[%s868_s2 + $0x50] sm:$0xff] }
  0x13   : > { %614 = vmatpush3.bf16.msra.mxu0 %v381_v6  ;;  %632 = vmatpush3.bf16.msra.mxu1 %v381_v6  ;;  %v229_v22 = vld [vmem:[%s868_s2 + $0x58] sm:$0xff]  ;;  %v231_v24 = vld [vmem:[%s868_s2 + $0x68] sm:$0xff]  ;;  %v230_v25 = vld [vmem:[%s868_s2 + $0x60] sm:$0xff] }
  0x14   : > { %251 = vperm.xlu1 %661, %v221_v12   ;;  %241 = vperm.xlu0 %660, %v219_v13   ;;  %v233_v26 = vld [vmem:[%s868_s2 + $0x78] sm:$0xff]  ;;  %v232_v27 = vld [vmem:[%s868_s2 + $0x70] sm:$0xff] }
  0x16   : > { %616 = vmatmul.mubr.msk.bf16.vlgmr.msra.gmra.mxu0 %vm354_vm0, %v664_v7  ;;  %624 = vmatmul.mubr.msk.bf16.vlgmr.msra.gmra.mxu1 %vm354_vm0, %v665_v8 }
  0x17   : > { %619 = vmatprep.mubr.msk.bf16.mxu0 %vm354_vm0, %v666_v10  ;;  %627 = vmatprep.mubr.msk.bf16.mxu1 %vm354_vm0, %v667_v11 }
  0x18   : > { %261 = vperm.xlu1 %661, %v223_v14   ;;  %256 = vperm.xlu0 %660, %v222_v15  }
  0x1c   : > { %271 = vperm.xlu1 %661, %v225_v18   ;;  %266 = vperm.xlu0 %660, %v224_v19  }
  0x1e   : > { %620 = vmatmul.mubr.msk.bf16.gmra.mxu0 %vm354_vm0, %v668_v16  ;;  %628 = vmatmul.mubr.msk.bf16.gmra.mxu1 %vm354_vm0, %v669_v17 }
  0x20   : > { %281 = vperm.xlu1 %661, %v227_v20   ;;  %276 = vperm.xlu0 %660, %v226_v21  }
  0x24   : > { %291 = vperm.xlu1 %661, %v229_v22   ;;  %286 = vperm.xlu0 %660, %v228_v23  }
  0x28   : > { %301 = vperm.xlu1 %661, %v231_v24   ;;  %296 = vperm.xlu0 %660, %v230_v25  }
  0x2c   : > { %311 = vperm.xlu1 %661, %v233_v26   ;;  %306 = vperm.xlu0 %660, %v232_v27  }
  0x8a   : > { %v237_v28 = vpop.permute.xlu0 %236  ;;  %v247_v29 = vpop.permute.xlu1 %246 }
  0x8f   : > { %v242_v30 = vpop.permute.xlu0 %241  ;;  %v252_v31 = vpop.permute.xlu1 %251 }
  0x93   : > { %v257_v32 = vpop.permute.xlu0 %256  ;;  %v262_v33 = vpop.permute.xlu1 %261 }
  0x97   : > { %v267_v34 = vpop.permute.xlu0 %266  ;;  %v272_v35 = vpop.permute.xlu1 %271 }
  0x9b   : > { %v277_v36 = vpop.permute.xlu0 %276  ;;  %v282_v37 = vpop.permute.xlu1 %281 }
  0x9f   : > { %v287_v38 = vpop.permute.xlu0 %286  ;;  %v292_v39 = vpop.permute.xlu1 %291 }
  0xa3   : > { %v297_v42 = vpop.permute.xlu0 %296  ;;  %v302_v51 = vpop.permute.xlu1 %301 }
  0xa7   : > { %v307_v56 = vpop.permute.xlu0 %306  ;;  %v312_v1 = vpop.permute.xlu1 %311 }
  0xd6   : > { %v617_v40 = vpop.f32.mrf.mxu0  ;;  %v625_v41 = vpop.f32.mrf.mxu1 }
  0xd7   : > { %v426_v43 = vadd.f32 %v617_v40, %v247_v29  ;;  %v458_v44 = vadd.f32 %v625_v41, %v287_v38 }
  0xd8   : > { %v417_v45 = vpop.f32.mrf.mxu0  ;;  %v449_v46 = vpop.f32.mrf.mxu1 }
  0xd9   : > { %483 = vst.msk [vmem:[%s823_s25 + $0x10] sm:$0xff] %vm480_vm2, %v426_v43  ;;  %491 = vst.msk [vmem:[%s823_s25 + $0x50] sm:$0xff] %vm480_vm2, %v458_v44  ;;  %v418_v47 = vadd.f32 %v417_v45, %v237_v28  ;;  %v450_v48 = vadd.f32 %v449_v46, %v277_v36 }
  0xda   : > { %v618_v49 = vpop.f32.mrf.mxu0  ;;  %v626_v50 = vpop.f32.mrf.mxu1 }
  0xdb   : > { %481 = vst.msk [vmem:[%s823_s25] sm:$0xff] %vm480_vm2, %v418_v47  ;;  %489 = vst.msk [vmem:[%s823_s25 + $0x40] sm:$0xff] %vm480_vm2, %v450_v48  ;;  %v429_v52 = vadd.f32 %v618_v49, %v252_v31  ;;  %v461_v53 = vadd.f32 %v626_v50, %v292_v39 }
  0xdc   : > { %v420_v54 = vpop.f32.mrf.mxu0  ;;  %v452_v55 = vpop.f32.mrf.mxu1 }
  0xdd   : > { %484 = vst.msk [vmem:[%s823_s25 + $0x18] sm:$0xff] %vm480_vm2, %v429_v52  ;;  %492 = vst.msk [vmem:[%s823_s25 + $0x58] sm:$0xff] %vm480_vm2, %v461_v53  ;;  %v421_v57 = vadd.f32 %v420_v54, %v242_v30  ;;  %v453_v58 = vadd.f32 %v452_v55, %v282_v37 }
  0xde   : > { %v621_v59 = vpop.f32.mrf.mxu0  ;;  %v629_v60 = vpop.f32.mrf.mxu1 }
  0xdf   : > { %482 = vst.msk [vmem:[%s823_s25 + $0x8] sm:$0xff] %vm480_vm2, %v421_v57  ;;  %490 = vst.msk [vmem:[%s823_s25 + $0x48] sm:$0xff] %vm480_vm2, %v453_v58  ;;  %v442_v61 = vadd.f32 %v621_v59, %v267_v34  ;;  %v474_v62 = vadd.f32 %v629_v60, %v307_v56 }
  0xe0   : > { %v433_v63 = vpop.f32.mrf.mxu0  ;;  %v465_v0 = vpop.f32.mrf.mxu1 }
  0xe1   : > { %487 = vst.msk [vmem:[%s823_s25 + $0x30] sm:$0xff] %vm480_vm2, %v442_v61  ;;  %495 = vst.msk [vmem:[%s823_s25 + $0x70] sm:$0xff] %vm480_vm2, %v474_v62  ;;  %v434_v2 = vadd.f32 %v433_v63, %v257_v32  ;;  %v466_v3 = vadd.f32 %v465_v0, %v297_v42 }
  0xe2   : > { %v622_v4 = vpop.f32.mrf.mxu0  ;;  %v630_v5 = vpop.f32.mrf.mxu1 }
  0xe3   : > { %485 = vst.msk [vmem:[%s823_s25 + $0x20] sm:$0xff] %vm480_vm2, %v434_v2  ;;  %493 = vst.msk [vmem:[%s823_s25 + $0x60] sm:$0xff] %vm480_vm2, %v466_v3  ;;  %v445_v6 = vadd.f32 %v622_v4, %v272_v35  ;;  %v477_v7 = vadd.f32 %v630_v5, %v312_v1 }
  0xe4   : > { %v436_v8 = vpop.f32.mrf.mxu0  ;;  %v468_v9 = vpop.f32.mrf.mxu1 }
  0xe5   : > { %488 = vst.msk [vmem:[%s823_s25 + $0x38] sm:$0xff] %vm480_vm2, %v445_v6  ;;  %496 = vst.msk [vmem:[%s823_s25 + $0x78] sm:$0xff] %vm480_vm2, %v477_v7  ;;  %v437_v10 = vadd.f32 %v436_v8, %v262_v33  ;;  %v469_v11 = vadd.f32 %v468_v9, %v302_v51 }
  0xe7   : > { %486 = vst.msk [vmem:[%s823_s25 + $0x28] sm:$0xff] %vm480_vm2, %v437_v10  ;;  %494 = vst.msk [vmem:[%s823_s25 + $0x68] sm:$0xff] %vm480_vm2, %v469_v11 }
  0xe8 PF: > { %s13_s14 = sadd.s32 1, %s692_s14   ;;  %s870_s12 = smov %s688_s13 }
  0xe9   : > { %p10_p5 = scmp.ge.s32.totalorder %s13_s14, 4   ;;  %s871_s13 = smov %s873_s15 }
  0xeb   :  { %12 = sbr.rel (!%p10_p5) target bundleno = 2 (0x2), region = 62 }

// kernel: fpn_forward.7
= control target key start
LH: loop header
LB: loop body
LE: loop exit
PB: predicated region body
PF: predicated region fallthrough
CT: control target
= control target key end

     0   :  { %s717_s12 = smov 0   ;;  %s719_s13 = smov 0   ;;  %s868_s0 = inlined_call_operand.vmem [shape: f32[2,16,16], index: 0, kind: input, shape index: {}]   ;;  %s869_s1 = inlined_call_operand.vmem [shape: bf16[128,16], index: 1, kind: input, shape index: {}]   ;;  %s870_s2 = inlined_call_operand.vmem [shape: f32[128,1], index: 2, kind: input, shape index: {}]   ;;  %s871_s3 = inlined_call_operand.vmem [shape: f32[2,128,16], index: 3, kind: output, shape index: {}]  }
   0x1   :  { %s721_s14 = smov 0  }
   0x2 LB: > { %s25_s15 = sadd.s32 1, %s690_s13  ;;  %p583_p0 = scmp.ge.s32.totalorder %s694_s14, 1  ;;  %s694_s14 = sphi %s721_s14, %s13_s14   ;;  %s690_s13 = sphi %s719_s13, %s873_s13   ;;  %s686_s12 = sphi %s717_s12, %s872_s12  }
   0x3   : > { %p27_p1 = scmp.ge.s32.totalorder %s25_s15, 2  ;;  %p156_p2 = scmp.lt.s32.totalorder %s694_s14, 3 }
   0x5   : > { %s875_s15 = smov (%p27_p1, %s25_s15), 0  ;;  %p157_p3 = pnand %p583_p0, %p156_p2 }
   0x6   : > { %p186_p4 = scmp.lt.s32.totalorder (!%p157_p3), %s686_s12, 1 }
   0x7   : > { %160 = sbr.rel (%p157_p3) target bundleno = 232 (0xe8), region = 32 }
   0xc   : > { %v664_v0 = vld [vmem:[%s869_s1] sm:$0xff]   ;;  %vm358_vm0 = vcmask 130048   ;;  %s877_s12 = smov (!%p186_p4, %s686_s12), 1  ;;  %v696_v2 = vmov 0   ;;  %v666_v6 = vld [vmem:[%s869_s1 + $0x8] sm:$0xff]   ;;  %v224_v8 = vld [vmem:[%s870_s2 + $0x10] sm:$0xff] }
   0xd   : > { %v665_v1 = vld [vmem:[%s869_s1 + $0x20] sm:$0xff]   ;;  %619 = vmatprep.mubr.msk.bf16.mxu0 %vm358_vm0, %v664_v0  ;;  %s606_s20 = sshll.u32 %s877_s12, 4  ;;  %663 = vset.pattern.permute.xlu1 %v696_v2  ;;  %v667_v7 = vld [vmem:[%s869_s1 + $0x28] sm:$0xff]   ;;  %v668_v10 = vld [vmem:[%s869_s1 + $0x10] sm:$0xff]   ;;  %s607_s22 = sshll.u32 %s877_s12, 7 }
   0xe   : > { %627 = vmatprep.mubr.msk.bf16.mxu1 %vm358_vm0, %v665_v1  ;;  %662 = vset.pattern.permute.xlu0 %v696_v2  ;;  %s193_s23 = scalar_lea.vmem %s868_s0, %s606_s20  ;;  %v222_v9 = vld [vmem:[%s870_s2] sm:$0xff]  ;;  %v669_v11 = vld [vmem:[%s869_s1 + $0x30] sm:$0xff]   ;;  %v225_v12 = vld [vmem:[%s870_s2 + $0x18] sm:$0xff]  ;;  %s825_s25 = scalar_lea.vmem %s871_s3, %s607_s22 }
   0xf   : > { %v203_v3 = vld [vmem:[%s193_s23] sm:$0xff]  ;;  %v204_v4 = vld [vmem:[%s193_s23 + $0x8] sm:$0xff]  ;;  %250 = vperm.xlu1 %663, %v224_v8   ;;  %240 = vperm.xlu0 %662, %v222_v9   ;;  %v670_v16 = vld [vmem:[%s869_s1 + $0x18] sm:$0xff]  }
  0x10   : > { %v205_v5 = vpack.c.bf16 %v204_v4, %v203_v3  ;;  %v223_v13 = vld [vmem:[%s870_s2 + $0x8] sm:$0xff]  ;;  %v226_v15 = vld [vmem:[%s870_s2 + $0x20] sm:$0xff]  ;;  %v671_v17 = vld [vmem:[%s869_s1 + $0x38] sm:$0xff]  }
  0x11   : > { %v227_v14 = vld [vmem:[%s870_s2 + $0x28] sm:$0xff]  ;;  %v229_v18 = vld [vmem:[%s870_s2 + $0x38] sm:$0xff]  ;;  %v228_v19 = vld [vmem:[%s870_s2 + $0x30] sm:$0xff] }
  0x12   : > { %617 = vmatprep.subr.bf16.mxu0 %v205_v5  ;;  %635 = vmatprep.subr.bf16.mxu1 %v205_v5  ;;  %v231_v20 = vld [vmem:[%s870_s2 + $0x48] sm:$0xff]  ;;  %v230_v21 = vld [vmem:[%s870_s2 + $0x40] sm:$0xff]  ;;  %v233_v22 = vld [vmem:[%s870_s2 + $0x58] sm:$0xff] }
  0x13   : > { %618 = vmatpush3.bf16.msra.mxu0 %v205_v5  ;;  %636 = vmatpush3.bf16.msra.mxu1 %v205_v5  ;;  %v232_v23 = vld [vmem:[%s870_s2 + $0x50] sm:$0xff]  ;;  %v235_v24 = vld [vmem:[%s870_s2 + $0x68] sm:$0xff]  ;;  %v234_v25 = vld [vmem:[%s870_s2 + $0x60] sm:$0xff] }
  0x14   : > { %255 = vperm.xlu1 %663, %v225_v12   ;;  %245 = vperm.xlu0 %662, %v223_v13   ;;  %v237_v26 = vld [vmem:[%s870_s2 + $0x78] sm:$0xff]  ;;  %v236_v27 = vld [vmem:[%s870_s2 + $0x70] sm:$0xff] }
  0x16   : > { %620 = vmatmul.mubr.msk.bf16.vlgmr.msra.gmra.mxu0 %vm358_vm0, %v666_v6  ;;  %628 = vmatmul.mubr.msk.bf16.vlgmr.msra.gmra.mxu1 %vm358_vm0, %v667_v7 }
  0x17   : > { %623 = vmatprep.mubr.msk.bf16.mxu0 %vm358_vm0, %v668_v10  ;;  %631 = vmatprep.mubr.msk.bf16.mxu1 %vm358_vm0, %v669_v11 }
  0x18   : > { %265 = vperm.xlu1 %663, %v227_v14   ;;  %260 = vperm.xlu0 %662, %v226_v15  }
  0x1c   : > { %275 = vperm.xlu1 %663, %v229_v18   ;;  %270 = vperm.xlu0 %662, %v228_v19  }
  0x1e   : > { %624 = vmatmul.mubr.msk.bf16.gmra.mxu0 %vm358_vm0, %v670_v16  ;;  %632 = vmatmul.mubr.msk.bf16.gmra.mxu1 %vm358_vm0, %v671_v17 }
  0x20   : > { %285 = vperm.xlu1 %663, %v231_v20   ;;  %280 = vperm.xlu0 %662, %v230_v21  }
  0x24   : > { %295 = vperm.xlu1 %663, %v233_v22   ;;  %290 = vperm.xlu0 %662, %v232_v23  }
  0x28   : > { %305 = vperm.xlu1 %663, %v235_v24   ;;  %300 = vperm.xlu0 %662, %v234_v25  }
  0x2c   : > { %315 = vperm.xlu1 %663, %v237_v26   ;;  %310 = vperm.xlu0 %662, %v236_v27  }
  0x8a   : > { %v241_v28 = vpop.permute.xlu0 %240  ;;  %v251_v29 = vpop.permute.xlu1 %250 }
  0x8f   : > { %v246_v30 = vpop.permute.xlu0 %245  ;;  %v256_v31 = vpop.permute.xlu1 %255 }
  0x93   : > { %v261_v32 = vpop.permute.xlu0 %260  ;;  %v266_v33 = vpop.permute.xlu1 %265 }
  0x97   : > { %v271_v34 = vpop.permute.xlu0 %270  ;;  %v276_v35 = vpop.permute.xlu1 %275 }
  0x9b   : > { %v281_v36 = vpop.permute.xlu0 %280  ;;  %v286_v37 = vpop.permute.xlu1 %285 }
  0x9f   : > { %v291_v38 = vpop.permute.xlu0 %290  ;;  %v296_v39 = vpop.permute.xlu1 %295 }
  0xa3   : > { %v301_v42 = vpop.permute.xlu0 %300  ;;  %v306_v51 = vpop.permute.xlu1 %305 }
  0xa7   : > { %v311_v56 = vpop.permute.xlu0 %310  ;;  %v316_v1 = vpop.permute.xlu1 %315 }
  0xd6   : > { %v621_v40 = vpop.f32.mrf.mxu0  ;;  %v629_v41 = vpop.f32.mrf.mxu1 }
  0xd7   : > { %v426_v43 = vadd.f32 %v621_v40, %v251_v29  ;;  %v458_v44 = vadd.f32 %v629_v41, %v291_v38 }
  0xd8   : > { %v417_v45 = vpop.f32.mrf.mxu0  ;;  %v449_v46 = vpop.f32.mrf.mxu1 }
  0xd9   : > { %482 = vst.msk [vmem:[%s825_s25 + $0x10] sm:$0xff] %vm358_vm0, %v426_v43  ;;  %490 = vst.msk [vmem:[%s825_s25 + $0x50] sm:$0xff] %vm358_vm0, %v458_v44  ;;  %v418_v47 = vadd.f32 %v417_v45, %v241_v28  ;;  %v450_v48 = vadd.f32 %v449_v46, %v281_v36 }
  0xda   : > { %v622_v49 = vpop.f32.mrf.mxu0  ;;  %v630_v50 = vpop.f32.mrf.mxu1 }
  0xdb   : > { %480 = vst.msk [vmem:[%s825_s25] sm:$0xff] %vm358_vm0, %v418_v47  ;;  %488 = vst.msk [vmem:[%s825_s25 + $0x40] sm:$0xff] %vm358_vm0, %v450_v48  ;;  %v429_v52 = vadd.f32 %v622_v49, %v256_v31  ;;  %v461_v53 = vadd.f32 %v630_v50, %v296_v39 }
  0xdc   : > { %v420_v54 = vpop.f32.mrf.mxu0  ;;  %v452_v55 = vpop.f32.mrf.mxu1 }
  0xdd   : > { %483 = vst.msk [vmem:[%s825_s25 + $0x18] sm:$0xff] %vm358_vm0, %v429_v52  ;;  %491 = vst.msk [vmem:[%s825_s25 + $0x58] sm:$0xff] %vm358_vm0, %v461_v53  ;;  %v421_v57 = vadd.f32 %v420_v54, %v246_v30  ;;  %v453_v58 = vadd.f32 %v452_v55, %v286_v37 }
  0xde   : > { %v625_v59 = vpop.f32.mrf.mxu0  ;;  %v633_v60 = vpop.f32.mrf.mxu1 }
  0xdf   : > { %481 = vst.msk [vmem:[%s825_s25 + $0x8] sm:$0xff] %vm358_vm0, %v421_v57  ;;  %489 = vst.msk [vmem:[%s825_s25 + $0x48] sm:$0xff] %vm358_vm0, %v453_v58  ;;  %v442_v61 = vadd.f32 %v625_v59, %v271_v34  ;;  %v474_v62 = vadd.f32 %v633_v60, %v311_v56 }
  0xe0   : > { %v433_v63 = vpop.f32.mrf.mxu0  ;;  %v465_v0 = vpop.f32.mrf.mxu1 }
  0xe1   : > { %486 = vst.msk [vmem:[%s825_s25 + $0x30] sm:$0xff] %vm358_vm0, %v442_v61  ;;  %494 = vst.msk [vmem:[%s825_s25 + $0x70] sm:$0xff] %vm358_vm0, %v474_v62  ;;  %v434_v2 = vadd.f32 %v433_v63, %v261_v32  ;;  %v466_v3 = vadd.f32 %v465_v0, %v301_v42 }
  0xe2   : > { %v626_v4 = vpop.f32.mrf.mxu0  ;;  %v634_v5 = vpop.f32.mrf.mxu1 }
  0xe3   : > { %484 = vst.msk [vmem:[%s825_s25 + $0x20] sm:$0xff] %vm358_vm0, %v434_v2  ;;  %492 = vst.msk [vmem:[%s825_s25 + $0x60] sm:$0xff] %vm358_vm0, %v466_v3  ;;  %v445_v6 = vadd.f32 %v626_v4, %v276_v35  ;;  %v477_v7 = vadd.f32 %v634_v5, %v316_v1 }
  0xe4   : > { %v436_v8 = vpop.f32.mrf.mxu0  ;;  %v468_v9 = vpop.f32.mrf.mxu1 }
  0xe5   : > { %487 = vst.msk [vmem:[%s825_s25 + $0x38] sm:$0xff] %vm358_vm0, %v445_v6  ;;  %495 = vst.msk [vmem:[%s825_s25 + $0x78] sm:$0xff] %vm358_vm0, %v477_v7  ;;  %v437_v10 = vadd.f32 %v436_v8, %v266_v33  ;;  %v469_v11 = vadd.f32 %v468_v9, %v306_v51 }
  0xe7   : > { %485 = vst.msk [vmem:[%s825_s25 + $0x28] sm:$0xff] %vm358_vm0, %v437_v10  ;;  %493 = vst.msk [vmem:[%s825_s25 + $0x68] sm:$0xff] %vm358_vm0, %v469_v11 }
  0xe8 PF: > { %s13_s14 = sadd.s32 1, %s694_s14   ;;  %s872_s12 = smov %s690_s13 }
  0xe9   : > { %p10_p5 = scmp.ge.s32.totalorder %s13_s14, 4   ;;  %s873_s13 = smov %s875_s15 }
  0xeb   :  { %12 = sbr.rel (!%p10_p5) target bundleno = 2 (0x2), region = 62 }

</bundles_post_ra>
